<compile_context>
chip_gen: v6e
topology: v6e:2x2x1
jax: 0.10.0
libtpu: 0.0.40
codegen_flags: <defaults>
</compile_context>

<pallas_src>
import jax
import jax.numpy as jnp
from jax.experimental import pallas as pl
from jax.experimental.pallas import tpu as pltpu

D_MODEL = 128      # feature_dim (torch default is 512; small demo size)
KEY_DIM = 128      # key_feature_dim is hard-coded to 128 in the module
NUM_LAYERS = 2     # TODO(synk): `num_layers` is an undefined global in the reference; fixed to 2 here.

_COMPILER_PARAMS = pltpu.CompilerParams(
    dimension_semantics=("parallel",),
    vmem_limit_bytes=32 * 1024 * 1024,
)


# ----------------------------- in-kernel helpers -----------------------------

def _mm(x, w_bf16):
    """(M, Din) @ (Din, Dout): bf16 MXU operands, f32 accumulation."""
    return jnp.dot(x.astype(jnp.bfloat16), w_bf16, preferred_element_type=jnp.float32)


def _l2_normalize(x):
    """F.normalize(x, p=2, dim=-1, eps=1e-12) via rsqrt (EUP) instead of sqrt+divide."""
    ss = jnp.sum(x * x, axis=-1, keepdims=True)
    return x * jax.lax.rsqrt(jnp.maximum(ss, 1e-24))


def _trans_nonlinear(h, w1, b1, w2, b2, gamma, beta):
    """TransNonlinear.forward: FFN + residual + LayerNorm (dropouts = identity)."""
    t = jnp.maximum(_mm(h, w1) + b1, 0.0)
    y = _mm(t, w2) + b2
    s = h + y
    mu = jnp.mean(s, axis=-1, keepdims=True)
    var = jnp.mean(jnp.square(s - mu), axis=-1, keepdims=True)
    return (s - mu) * jax.lax.rsqrt(var + 1e-5) * gamma + beta


def _self_attn_full(x, wkqv, wt, w1, b1, w2, b2, gamma, beta):
    """RelationUnit + TransNonlinear for the full-sequence (encoder) case."""
    kqv = _mm(x, wkqv)                                    # one wide (L,D)@(D,2K+D) matmul
    w_k = _l2_normalize(kqv[:, :KEY_DIM])
    w_q = _l2_normalize(kqv[:, KEY_DIM:2 * KEY_DIM])
    w_v = kqv[:, 2 * KEY_DIM:]
    # logits bounded in [-1, 1] (both sides L2-normalized) -> exp is safe without row-max
    dot = jnp.einsum('qd,kd->qk', w_q.astype(jnp.bfloat16), w_k.astype(jnp.bfloat16),
                     preferred_element_type=jnp.float32)              # (Lq, Lk)
    e = jnp.exp(dot)
    aff = e * pl.reciprocal(jnp.sum(e, axis=-1, keepdims=True), approx=True)        # softmax over keys
    aff = aff * pl.reciprocal(1e-9 + jnp.sum(aff, axis=0, keepdims=True), approx=True)  # / sum over queries
    out = jnp.dot(aff.astype(jnp.bfloat16), w_v.astype(jnp.bfloat16),
                  preferred_element_type=jnp.float32)                 # (Lq, D)
    h = jnp.maximum(_mm(x - out, wt), 0.0)                            # relu(trans_conv(q - out))
    return _trans_nonlinear(h, w1, b1, w2, b2, gamma, beta)


def _add_instnorm_relu_seq(x, s):
    """relu(InstanceNorm1d(x + s)), normalizing over the sequence axis (axis 0 of (L, D))."""
    z = x + s
    mu = jnp.mean(z, axis=0, keepdims=True)
    var = jnp.mean(jnp.square(z - mu), axis=0, keepdims=True)
    return jnp.maximum((z - mu) * jax.lax.rsqrt(var + 1e-5), 0.0)


def _instnorm_len1_relu(z):
    """InstanceNorm1d over a length-1 sequence: mean == z, var == 0 -> relu(0) == 0.
    TODO(synk): some torch versions raise for length-1 InstanceNorm; we use the zero-output math."""
    return jnp.maximum((z - z) * jax.lax.rsqrt(jnp.full_like(z, 1e-5)), 0.0)


# ------------------------------- fused Pallas kernel -------------------------------

def _siamese_kernel(src_ref, tgt_ref,
                    wkqv_ref, wt_s_ref, w1_s_ref, b1_s_ref, w2_s_ref, b2_s_ref,
                    g_s_ref, be_s_ref,
                    wkv_c_ref, wq_c_ref, wt_c_ref, w1_c_ref, b1_c_ref, w2_c_ref,
                    b2_c_ref, g_c_ref, be_c_ref,
                    out_ref):
    """Whole TransformerSiamese forward for one batch element:
    encoder stack -> hoisted cross-attn memory projections -> decoder stack (all templates)."""
    # ---------------- shared self-attention / FFN weights (resident in VMEM) ----------------
    wkqv = wkqv_ref[...]
    wt_s = wt_s_ref[...]
    w1_s, b1_s, w2_s, b2_s = w1_s_ref[...], b1_s_ref[...], w2_s_ref[...], b2_s_ref[...]
    g_s, be_s = g_s_ref[...], be_s_ref[...]

    # ---------------- encoder stack (NUM_LAYERS, shared weights) ----------------
    x = src_ref[0]                                         # (Ls, D) f32
    for _ in range(NUM_LAYERS):
        s = _self_attn_full(x, wkqv, wt_s, w1_s, b1_s, w2_s, b2_s, g_s, be_s)
        x = _add_instnorm_relu_seq(x, s)
    # TODO(synk): the reference does `encoded_memory, _ = self.encoder(...)` although the
    # encoder returns a single tensor; we use the encoder output directly as the memory.

    # ---------------- hoisted cross-attention memory projections ----------------
    kv = _mm(x, wkv_c_ref[...])                            # (Ls, KEY_DIM + D) via [WK_c | WV_c]
    k_mem = _l2_normalize(kv[:, :KEY_DIM]).astype(jnp.bfloat16)
    v_mem = kv[:, KEY_DIM:].astype(jnp.bfloat16)

    # ---------------- decoder stack, all Nt (length-1) templates at once ----------------
    wv_s = wkqv[:, 2 * KEY_DIM:]                           # decoder self-attn only needs WV
    wq_c, wt_c = wq_c_ref[...], wt_c_ref[...]
    w1_c, b1_c, w2_c, b2_c = w1_c_ref[...], b1_c_ref[...], w2_c_ref[...], b2_c_ref[...]
    g_c, be_c = g_c_ref[...], be_c_ref[...]

    y = tgt_ref[0]                                         # (Nt, D): each row is a length-1 sequence
    aff_self = jnp.float32(1.0 / (1.0 + 1e-9))             # softmax over a single key is exactly 1
    for _ in range(NUM_LAYERS):
        # ---- self-attention: Lq = Lk = 1 per template, so WK/WQ cannot affect the output ----
        out = aff_self * _mm(y, wv_s)
        h = jnp.maximum(_mm(y - out, wt_s), 0.0)
        s = _trans_nonlinear(h, w1_s, b1_s, w2_s, b2_s, g_s, be_s)
        y = _instnorm_len1_relu(y + s)
        # ---- cross-attention against the hoisted encoder-memory projections ----
        w_q = _l2_normalize(_mm(y, wq_c))                  # (Nt, KEY_DIM)
        dot = jnp.einsum('qd,kd->qk', w_q.astype(jnp.bfloat16), k_mem,
                         preferred_element_type=jnp.float32)           # (Nt, Ls)
        e = jnp.exp(dot)
        aff = e * pl.reciprocal(jnp.sum(e, axis=-1, keepdims=True), approx=True)  # softmax over keys
        aff = aff * pl.reciprocal(1e-9 + aff, approx=True)             # query dim has size 1
        m = jnp.dot(aff.astype(jnp.bfloat16), v_mem, preferred_element_type=jnp.float32)
        m = jnp.maximum(_mm(y - m, wt_c), 0.0)
        s = _trans_nonlinear(m, w1_c, b1_c, w2_c, b2_c, g_c, be_c)
        y = _instnorm_len1_relu(y + s)

    out_ref[0] = y.astype(out_ref.dtype)


# ------------------------------ kernel wrapper ------------------------------

def _const_spec(shape):
    """Full-array BlockSpec with a constant index map -> weight stays resident across grid steps."""
    zeros = (0,) * len(shape)
    return pl.BlockSpec(shape, lambda b: zeros)


def run_siamese(mem_in, tgt_stacked, sp, cp):
    B, Ls, D = mem_in.shape
    _, Nt, _ = tgt_stacked.shape
    weights = (sp['wkqv'], sp['wt'], sp['w1'], sp['b1'], sp['w2'], sp['b2'],
               sp['gamma'], sp['beta'],
               cp['wkv'], cp['wq'], cp['wt'], cp['w1'], cp['b1'], cp['w2'],
               cp['b2'], cp['gamma'], cp['beta'])
    in_specs = [pl.BlockSpec((1, Ls, D), lambda b: (b, 0, 0)),
                pl.BlockSpec((1, Nt, D), lambda b: (b, 0, 0))] + \
               [_const_spec(w.shape) for w in weights]
    out_specs = pl.BlockSpec((1, Nt, D), lambda b: (b, 0, 0))
    out_shape = jax.ShapeDtypeStruct((B, Nt, D), jnp.float32)
    return pl.pallas_call(
        _siamese_kernel, grid=(B,), in_specs=in_specs, out_specs=out_specs,
        out_shape=out_shape, compiler_params=_COMPILER_PARAMS,
    )(mem_in, tgt_stacked, *weights)


# ---------------------------- model composition ----------------------------

@jax.jit
def transformer_siamese(search_feature, template_feature, params):
    # search_feature: (Ls, B, D), template_feature: (Nt, B, D)  -- torch "#pixel x batch x dim"
    sp, cp = params['self_attn'], params['cross_attn']
    mem_in = jnp.transpose(search_feature, (1, 0, 2))          # (B, Ls, D) internal layout
    tgt_stacked = jnp.transpose(template_feature, (1, 0, 2))   # (B, Nt, D): Nt length-1 sequences
    out = run_siamese(mem_in, tgt_stacked, sp, cp)             # (B, Nt, D), one fused pallas_call
    return jnp.transpose(out, (1, 0, 2))                       # (Nt, B, D)


# ------------------------------- parameters --------------------------------

def init_params(seed=0, d_model=D_MODEL, key_dim=KEY_DIM):
    """Deterministic synthetic weights with the shapes implied by __init__ (bf16 matmul weights)."""
    key = jax.random.PRNGKey(seed)

    def attn_params(k):
        ks = jax.random.split(k, 6)
        std_kq = (2.0 / key_dim) ** 0.5
        std_v = (2.0 / d_model) ** 0.5
        wk = std_kq * jax.random.normal(ks[0], (d_model, key_dim), jnp.float32)
        wq = std_kq * jax.random.normal(ks[1], (d_model, key_dim), jnp.float32)
        wv = std_v * jax.random.normal(ks[2], (d_model, d_model), jnp.float32)
        wt = (d_model ** -0.5) * jax.random.normal(ks[3], (d_model, d_model), jnp.float32)
        w1 = (d_model ** -0.5) * jax.random.normal(ks[4], (d_model, key_dim), jnp.float32)
        w2 = (key_dim ** -0.5) * jax.random.normal(ks[5], (key_dim, d_model), jnp.float32)
        return dict(
            # fused [WK | WQ | WV] for one wide MXU matmul (self-attention path)
            wkqv=jnp.concatenate([wk, wq, wv], axis=1).astype(jnp.bfloat16),
            # fused [WK | WV] used to pre-project the encoder memory (cross-attention path)
            wkv=jnp.concatenate([wk, wv], axis=1).astype(jnp.bfloat16),
            wq=wq.astype(jnp.bfloat16),
            wt=wt.astype(jnp.bfloat16),
            w1=w1.astype(jnp.bfloat16),
            b1=jnp.zeros((1, key_dim), jnp.float32),
            w2=w2.astype(jnp.bfloat16),
            b2=jnp.zeros((1, d_model), jnp.float32),
            gamma=jnp.ones((1, d_model), jnp.float32),
            beta=jnp.zeros((1, d_model), jnp.float32),
        )

    k_self, k_cross = jax.random.split(key)
    # self_attn is one shared MultiheadAttention used by every encoder layer and every decoder
    # layer's self-attention; cross_attn is shared across all decoder layers (via _get_clones).
    return dict(self_attn=attn_params(k_self), cross_attn=attn_params(k_cross))


# ---------------------------------- main ------------------------------------

if __name__ == "__main__":
    key = jax.random.PRNGKey(0)
    k_search, k_template = jax.random.split(key)

    Ls, B, Nt = 16, 2, 2   # search pixels, batch, template images
    search_feature = jax.random.normal(k_search, (Ls, B, D_MODEL), jnp.float32)
    template_feature = jax.random.normal(k_template, (Nt, B, D_MODEL), jnp.float32)

    params = init_params(0)

    out = transformer_siamese(search_feature, template_feature, params)
    out = jax.block_until_ready(out)
    assert out.shape == (Nt, B, D_MODEL), out.shape
    assert bool(jnp.all(jnp.isfinite(out)))
    print("KERNEL_OK")
</pallas_src>

<mosaic_0001>
module attributes {stable_mosaic.version = 11 : i64} {
  func.func @_siamese_kernel(%arg0: i32, %arg1: memref<1x16x128xf32, #tpu.memory_space<vmem>>, %arg2: memref<1x2x128xf32, #tpu.memory_space<vmem>>, %arg3: memref<128x384xbf16, #tpu.memory_space<vmem>>, %arg4: memref<128x128xbf16, #tpu.memory_space<vmem>>, %arg5: memref<128x128xbf16, #tpu.memory_space<vmem>>, %arg6: memref<1x128xf32, #tpu.memory_space<vmem>>, %arg7: memref<128x128xbf16, #tpu.memory_space<vmem>>, %arg8: memref<1x128xf32, #tpu.memory_space<vmem>>, %arg9: memref<1x128xf32, #tpu.memory_space<vmem>>, %arg10: memref<1x128xf32, #tpu.memory_space<vmem>>, %arg11: memref<128x256xbf16, #tpu.memory_space<vmem>>, %arg12: memref<128x128xbf16, #tpu.memory_space<vmem>>, %arg13: memref<128x128xbf16, #tpu.memory_space<vmem>>, %arg14: memref<128x128xbf16, #tpu.memory_space<vmem>>, %arg15: memref<1x128xf32, #tpu.memory_space<vmem>>, %arg16: memref<128x128xbf16, #tpu.memory_space<vmem>>, %arg17: memref<1x128xf32, #tpu.memory_space<vmem>>, %arg18: memref<1x128xf32, #tpu.memory_space<vmem>>, %arg19: memref<1x128xf32, #tpu.memory_space<vmem>>, %arg20: memref<1x2x128xf32, #tpu.memory_space<vmem>>) attributes {dimension_semantics = [#tpu.dimension_semantics<parallel>], iteration_bounds = array<i64: 2>, scalar_prefetch = 0 : i64, scratch_operands = 0 : i64, tpu.core_type = #tpu.core_type<tc>, window_params = [{transform_indices = @transform_0, window_bounds = array<i64: 1, 16, 128>}, {transform_indices = @transform_1, window_bounds = array<i64: 1, 2, 128>}, {pipeline_mode = #tpu.pipeline_mode<synchronous>, transform_indices = @transform_2, window_bounds = array<i64: 128, 384>}, {pipeline_mode = #tpu.pipeline_mode<synchronous>, transform_indices = @transform_3, window_bounds = array<i64: 128, 128>}, {pipeline_mode = #tpu.pipeline_mode<synchronous>, transform_indices = @transform_4, window_bounds = array<i64: 128, 128>}, {pipeline_mode = #tpu.pipeline_mode<synchronous>, transform_indices = @transform_5, window_bounds = array<i64: 1, 128>}, {pipeline_mode = #tpu.pipeline_mode<synchronous>, transform_indices = @transform_6, window_bounds = array<i64: 128, 128>}, {pipeline_mode = #tpu.pipeline_mode<synchronous>, transform_indices = @transform_7, window_bounds = array<i64: 1, 128>}, {pipeline_mode = #tpu.pipeline_mode<synchronous>, transform_indices = @transform_8, window_bounds = array<i64: 1, 128>}, {pipeline_mode = #tpu.pipeline_mode<synchronous>, transform_indices = @transform_9, window_bounds = array<i64: 1, 128>}, {pipeline_mode = #tpu.pipeline_mode<synchronous>, transform_indices = @transform_10, window_bounds = array<i64: 128, 256>}, {pipeline_mode = #tpu.pipeline_mode<synchronous>, transform_indices = @transform_11, window_bounds = array<i64: 128, 128>}, {pipeline_mode = #tpu.pipeline_mode<synchronous>, transform_indices = @transform_12, window_bounds = array<i64: 128, 128>}, {pipeline_mode = #tpu.pipeline_mode<synchronous>, transform_indices = @transform_13, window_bounds = array<i64: 128, 128>}, {pipeline_mode = #tpu.pipeline_mode<synchronous>, transform_indices = @transform_14, window_bounds = array<i64: 1, 128>}, {pipeline_mode = #tpu.pipeline_mode<synchronous>, transform_indices = @transform_15, window_bounds = array<i64: 128, 128>}, {pipeline_mode = #tpu.pipeline_mode<synchronous>, transform_indices = @transform_16, window_bounds = array<i64: 1, 128>}, {pipeline_mode = #tpu.pipeline_mode<synchronous>, transform_indices = @transform_17, window_bounds = array<i64: 1, 128>}, {pipeline_mode = #tpu.pipeline_mode<synchronous>, transform_indices = @transform_18, window_bounds = array<i64: 1, 128>}, {transform_indices = @transform_19, window_bounds = array<i64: 1, 2, 128>}]} {
    %c0 = arith.constant 0 : index
    %c0_0 = arith.constant 0 : index
    %0 = vector.load %arg3[%c0, %c0_0] : memref<128x384xbf16, #tpu.memory_space<vmem>>, vector<128x384xbf16>
    %c0_1 = arith.constant 0 : index
    %c0_2 = arith.constant 0 : index
    %1 = vector.load %arg4[%c0_1, %c0_2] : memref<128x128xbf16, #tpu.memory_space<vmem>>, vector<128x128xbf16>
    %c0_3 = arith.constant 0 : index
    %c0_4 = arith.constant 0 : index
    %2 = vector.load %arg5[%c0_3, %c0_4] : memref<128x128xbf16, #tpu.memory_space<vmem>>, vector<128x128xbf16>
    %c0_5 = arith.constant 0 : index
    %c0_6 = arith.constant 0 : index
    %3 = vector.load %arg6[%c0_5, %c0_6] : memref<1x128xf32, #tpu.memory_space<vmem>>, vector<1x128xf32>
    %c0_7 = arith.constant 0 : index
    %c0_8 = arith.constant 0 : index
    %4 = vector.load %arg7[%c0_7, %c0_8] : memref<128x128xbf16, #tpu.memory_space<vmem>>, vector<128x128xbf16>
    %c0_9 = arith.constant 0 : index
    %c0_10 = arith.constant 0 : index
    %5 = vector.load %arg8[%c0_9, %c0_10] : memref<1x128xf32, #tpu.memory_space<vmem>>, vector<1x128xf32>
    %c0_11 = arith.constant 0 : index
    %c0_12 = arith.constant 0 : index
    %6 = vector.load %arg9[%c0_11, %c0_12] : memref<1x128xf32, #tpu.memory_space<vmem>>, vector<1x128xf32>
    %c0_13 = arith.constant 0 : index
    %c0_14 = arith.constant 0 : index
    %7 = vector.load %arg10[%c0_13, %c0_14] : memref<1x128xf32, #tpu.memory_space<vmem>>, vector<1x128xf32>
    %c0_15 = arith.constant 0 : index
    %c0_16 = arith.constant 0 : index
    %c0_17 = arith.constant 0 : index
    %8 = vector.load %arg1[%c0_15, %c0_16, %c0_17] : memref<1x16x128xf32, #tpu.memory_space<vmem>>, vector<1x16x128xf32>
    %9 = vector.shape_cast %8 : vector<1x16x128xf32> to vector<16x128xf32>
    %10 = arith.truncf %9 : vector<16x128xf32> to vector<16x128xbf16>
    %cst = arith.constant dense<0.000000e+00> : vector<16x384xf32>
    %11 = tpu.matmul %10, %0, %cst {dimension_numbers = #tpu.dot_dimension_numbers<[1], [0], [0], [1], [0, 0, 1, 1], [], []>} : vector<16x128xbf16>, vector<128x384xbf16>, vector<16x384xf32> -> vector<16x384xf32>
    %12 = vector.extract_strided_slice %11 {offsets = [0, 0], sizes = [16, 128], strides = [1, 1]} : vector<16x384xf32> to vector<16x128xf32>
    %13 = arith.mulf %12, %12 : vector<16x128xf32>
    %cst_18 = arith.constant dense<0.000000e+00> : vector<16xf32>
    %14 = vector.multi_reduction <add>, %13, %cst_18 [1] : vector<16x128xf32> to vector<16xf32>
    %15 = vector.shape_cast %14 : vector<16xf32> to vector<16x1xf32>
    %cst_19 = arith.constant 1.000000e-24 : f32
    %16 = vector.broadcast %cst_19 : f32 to vector<16x1xf32>
    %17 = arith.maximumf %15, %16 : vector<16x1xf32>
    %18 = math.rsqrt %17 : vector<16x1xf32>
    %19 = vector.broadcast %18 : vector<16x1xf32> to vector<16x128xf32>
    %20 = arith.mulf %12, %19 : vector<16x128xf32>
    %21 = vector.extract_strided_slice %11 {offsets = [0, 128], sizes = [16, 128], strides = [1, 1]} : vector<16x384xf32> to vector<16x128xf32>
    %22 = arith.mulf %21, %21 : vector<16x128xf32>
    %cst_20 = arith.constant dense<0.000000e+00> : vector<16xf32>
    %23 = vector.multi_reduction <add>, %22, %cst_20 [1] : vector<16x128xf32> to vector<16xf32>
    %24 = vector.shape_cast %23 : vector<16xf32> to vector<16x1xf32>
    %cst_21 = arith.constant 1.000000e-24 : f32
    %25 = vector.broadcast %cst_21 : f32 to vector<16x1xf32>
    %26 = arith.maximumf %24, %25 : vector<16x1xf32>
    %27 = math.rsqrt %26 : vector<16x1xf32>
    %28 = vector.broadcast %27 : vector<16x1xf32> to vector<16x128xf32>
    %29 = arith.mulf %21, %28 : vector<16x128xf32>
    %30 = vector.extract_strided_slice %11 {offsets = [0, 256], sizes = [16, 128], strides = [1, 1]} : vector<16x384xf32> to vector<16x128xf32>
    %31 = arith.truncf %29 : vector<16x128xf32> to vector<16x128xbf16>
    %32 = arith.truncf %20 : vector<16x128xf32> to vector<16x128xbf16>
    "tpu.trace_start"() <{level = 10 : i32, message = "qd,kd->qk"}> : () -> ()
    %cst_22 = arith.constant dense<0.000000e+00> : vector<16x16xf32>
    %33 = tpu.matmul %31, %32, %cst_22 {dimension_numbers = #tpu.dot_dimension_numbers<[1], [1], [0], [0], [0, 0, 1, 0], [], []>} : vector<16x128xbf16>, vector<16x128xbf16>, vector<16x16xf32> -> vector<16x16xf32>
    "tpu.trace_stop"() : () -> ()
    %34 = math.exp %33 : vector<16x16xf32>
    %cst_23 = arith.constant dense<0.000000e+00> : vector<16xf32>
    %35 = vector.multi_reduction <add>, %34, %cst_23 [1] : vector<16x16xf32> to vector<16xf32>
    %36 = vector.shape_cast %35 : vector<16xf32> to vector<16x1xf32>
    %37 = tpu.reciprocal %36 {approx = true} : vector<16x1xf32> -> vector<16x1xf32>
    %38 = vector.broadcast %37 : vector<16x1xf32> to vector<16x16xf32>
    %39 = arith.mulf %34, %38 : vector<16x16xf32>
    %cst_24 = arith.constant dense<0.000000e+00> : vector<16xf32>
    %40 = vector.multi_reduction <add>, %39, %cst_24 [0] : vector<16x16xf32> to vector<16xf32>
    %41 = vector.shape_cast %40 : vector<16xf32> to vector<1x16xf32>
    %cst_25 = arith.constant 9.99999971E-10 : f32
    %42 = vector.broadcast %cst_25 : f32 to vector<1x16xf32>
    %43 = arith.addf %42, %41 : vector<1x16xf32>
    %44 = tpu.reciprocal %43 {approx = true} : vector<1x16xf32> -> vector<1x16xf32>
    %45 = vector.broadcast %44 : vector<1x16xf32> to vector<16x16xf32>
    %46 = arith.mulf %39, %45 : vector<16x16xf32>
    %47 = arith.truncf %46 : vector<16x16xf32> to vector<16x16xbf16>
    %48 = arith.truncf %30 : vector<16x128xf32> to vector<16x128xbf16>
    %cst_26 = arith.constant dense<0.000000e+00> : vector<16x128xf32>
    %49 = tpu.matmul %47, %48, %cst_26 {dimension_numbers = #tpu.dot_dimension_numbers<[1], [0], [0], [1], [0, 0, 1, 1], [], []>} : vector<16x16xbf16>, vector<16x128xbf16>, vector<16x128xf32> -> vector<16x128xf32>
    %50 = arith.subf %9, %49 : vector<16x128xf32>
    %51 = arith.truncf %50 : vector<16x128xf32> to vector<16x128xbf16>
    %cst_27 = arith.constant dense<0.000000e+00> : vector<16x128xf32>
    %52 = tpu.matmul %51, %1, %cst_27 {dimension_numbers = #tpu.dot_dimension_numbers<[1], [0], [0], [1], [0, 0, 1, 1], [], []>} : vector<16x128xbf16>, vector<128x128xbf16>, vector<16x128xf32> -> vector<16x128xf32>
    %cst_28 = arith.constant 0.000000e+00 : f32
    %53 = vector.broadcast %cst_28 : f32 to vector<16x128xf32>
    %54 = arith.maximumf %52, %53 : vector<16x128xf32>
    %55 = arith.truncf %54 : vector<16x128xf32> to vector<16x128xbf16>
    %cst_29 = arith.constant dense<0.000000e+00> : vector<16x128xf32>
    %56 = tpu.matmul %55, %2, %cst_29 {dimension_numbers = #tpu.dot_dimension_numbers<[1], [0], [0], [1], [0, 0, 1, 1], [], []>} : vector<16x128xbf16>, vector<128x128xbf16>, vector<16x128xf32> -> vector<16x128xf32>
    %57 = vector.broadcast %3 : vector<1x128xf32> to vector<16x128xf32>
    %58 = arith.addf %56, %57 : vector<16x128xf32>
    %cst_30 = arith.constant 0.000000e+00 : f32
    %59 = vector.broadcast %cst_30 : f32 to vector<16x128xf32>
    %60 = arith.maximumf %58, %59 : vector<16x128xf32>
    %61 = arith.truncf %60 : vector<16x128xf32> to vector<16x128xbf16>
    %cst_31 = arith.constant dense<0.000000e+00> : vector<16x128xf32>
    %62 = tpu.matmul %61, %4, %cst_31 {dimension_numbers = #tpu.dot_dimension_numbers<[1], [0], [0], [1], [0, 0, 1, 1], [], []>} : vector<16x128xbf16>, vector<128x128xbf16>, vector<16x128xf32> -> vector<16x128xf32>
    %63 = vector.broadcast %5 : vector<1x128xf32> to vector<16x128xf32>
    %64 = arith.addf %62, %63 : vector<16x128xf32>
    %65 = arith.addf %54, %64 : vector<16x128xf32>
    %cst_32 = arith.constant dense<0.000000e+00> : vector<16xf32>
    %66 = vector.multi_reduction <add>, %65, %cst_32 [1] : vector<16x128xf32> to vector<16xf32>
    %67 = vector.shape_cast %66 : vector<16xf32> to vector<16x1xf32>
    %cst_33 = arith.constant 1.280000e+02 : f32
    %68 = vector.broadcast %cst_33 : f32 to vector<16x1xf32>
    %69 = arith.divf %67, %68 : vector<16x1xf32>
    %70 = vector.broadcast %69 : vector<16x1xf32> to vector<16x128xf32>
    %71 = arith.subf %65, %70 : vector<16x128xf32>
    %72 = arith.mulf %71, %71 : vector<16x128xf32>
    %cst_34 = arith.constant dense<0.000000e+00> : vector<16xf32>
    %73 = vector.multi_reduction <add>, %72, %cst_34 [1] : vector<16x128xf32> to vector<16xf32>
    %74 = vector.shape_cast %73 : vector<16xf32> to vector<16x1xf32>
    %cst_35 = arith.constant 1.280000e+02 : f32
    %75 = vector.broadcast %cst_35 : f32 to vector<16x1xf32>
    %76 = arith.divf %74, %75 : vector<16x1xf32>
    %77 = vector.broadcast %69 : vector<16x1xf32> to vector<16x128xf32>
    %78 = arith.subf %65, %77 : vector<16x128xf32>
    %cst_36 = arith.constant 9.99999974E-6 : f32
    %79 = vector.broadcast %cst_36 : f32 to vector<16x1xf32>
    %80 = arith.addf %76, %79 : vector<16x1xf32>
    %81 = math.rsqrt %80 : vector<16x1xf32>
    %82 = vector.broadcast %81 : vector<16x1xf32> to vector<16x128xf32>
    %83 = arith.mulf %78, %82 : vector<16x128xf32>
    %84 = vector.broadcast %6 : vector<1x128xf32> to vector<16x128xf32>
    %85 = arith.mulf %83, %84 : vector<16x128xf32>
    %86 = vector.broadcast %7 : vector<1x128xf32> to vector<16x128xf32>
    %87 = arith.addf %85, %86 : vector<16x128xf32>
    %88 = arith.addf %9, %87 : vector<16x128xf32>
    %cst_37 = arith.constant dense<0.000000e+00> : vector<128xf32>
    %89 = vector.multi_reduction <add>, %88, %cst_37 [0] : vector<16x128xf32> to vector<128xf32>
    %90 = vector.shape_cast %89 : vector<128xf32> to vector<1x128xf32>
    %cst_38 = arith.constant 1.600000e+01 : f32
    %91 = vector.broadcast %cst_38 : f32 to vector<1x128xf32>
    %92 = arith.divf %90, %91 : vector<1x128xf32>
    %93 = vector.broadcast %92 : vector<1x128xf32> to vector<16x128xf32>
    %94 = arith.subf %88, %93 : vector<16x128xf32>
    %95 = arith.mulf %94, %94 : vector<16x128xf32>
    %cst_39 = arith.constant dense<0.000000e+00> : vector<128xf32>
    %96 = vector.multi_reduction <add>, %95, %cst_39 [0] : vector<16x128xf32> to vector<128xf32>
    %97 = vector.shape_cast %96 : vector<128xf32> to vector<1x128xf32>
    %cst_40 = arith.constant 1.600000e+01 : f32
    %98 = vector.broadcast %cst_40 : f32 to vector<1x128xf32>
    %99 = arith.divf %97, %98 : vector<1x128xf32>
    %100 = vector.broadcast %92 : vector<1x128xf32> to vector<16x128xf32>
    %101 = arith.subf %88, %100 : vector<16x128xf32>
    %cst_41 = arith.constant 9.99999974E-6 : f32
    %102 = vector.broadcast %cst_41 : f32 to vector<1x128xf32>
    %103 = arith.addf %99, %102 : vector<1x128xf32>
    %104 = math.rsqrt %103 : vector<1x128xf32>
    %105 = vector.broadcast %104 : vector<1x128xf32> to vector<16x128xf32>
    %106 = arith.mulf %101, %105 : vector<16x128xf32>
    %cst_42 = arith.constant 0.000000e+00 : f32
    %107 = vector.broadcast %cst_42 : f32 to vector<16x128xf32>
    %108 = arith.maximumf %106, %107 : vector<16x128xf32>
    %109 = arith.truncf %108 : vector<16x128xf32> to vector<16x128xbf16>
    %cst_43 = arith.constant dense<0.000000e+00> : vector<16x384xf32>
    %110 = tpu.matmul %109, %0, %cst_43 {dimension_numbers = #tpu.dot_dimension_numbers<[1], [0], [0], [1], [0, 0, 1, 1], [], []>} : vector<16x128xbf16>, vector<128x384xbf16>, vector<16x384xf32> -> vector<16x384xf32>
    %111 = vector.extract_strided_slice %110 {offsets = [0, 0], sizes = [16, 128], strides = [1, 1]} : vector<16x384xf32> to vector<16x128xf32>
    %112 = arith.mulf %111, %111 : vector<16x128xf32>
    %cst_44 = arith.constant dense<0.000000e+00> : vector<16xf32>
    %113 = vector.multi_reduction <add>, %112, %cst_44 [1] : vector<16x128xf32> to vector<16xf32>
    %114 = vector.shape_cast %113 : vector<16xf32> to vector<16x1xf32>
    %cst_45 = arith.constant 1.000000e-24 : f32
    %115 = vector.broadcast %cst_45 : f32 to vector<16x1xf32>
    %116 = arith.maximumf %114, %115 : vector<16x1xf32>
    %117 = math.rsqrt %116 : vector<16x1xf32>
    %118 = vector.broadcast %117 : vector<16x1xf32> to vector<16x128xf32>
    %119 = arith.mulf %111, %118 : vector<16x128xf32>
    %120 = vector.extract_strided_slice %110 {offsets = [0, 128], sizes = [16, 128], strides = [1, 1]} : vector<16x384xf32> to vector<16x128xf32>
    %121 = arith.mulf %120, %120 : vector<16x128xf32>
    %cst_46 = arith.constant dense<0.000000e+00> : vector<16xf32>
    %122 = vector.multi_reduction <add>, %121, %cst_46 [1] : vector<16x128xf32> to vector<16xf32>
    %123 = vector.shape_cast %122 : vector<16xf32> to vector<16x1xf32>
    %cst_47 = arith.constant 1.000000e-24 : f32
    %124 = vector.broadcast %cst_47 : f32 to vector<16x1xf32>
    %125 = arith.maximumf %123, %124 : vector<16x1xf32>
    %126 = math.rsqrt %125 : vector<16x1xf32>
    %127 = vector.broadcast %126 : vector<16x1xf32> to vector<16x128xf32>
    %128 = arith.mulf %120, %127 : vector<16x128xf32>
    %129 = vector.extract_strided_slice %110 {offsets = [0, 256], sizes = [16, 128], strides = [1, 1]} : vector<16x384xf32> to vector<16x128xf32>
    %130 = arith.truncf %128 : vector<16x128xf32> to vector<16x128xbf16>
    %131 = arith.truncf %119 : vector<16x128xf32> to vector<16x128xbf16>
    "tpu.trace_start"() <{level = 10 : i32, message = "qd,kd->qk"}> : () -> ()
    %cst_48 = arith.constant dense<0.000000e+00> : vector<16x16xf32>
    %132 = tpu.matmul %130, %131, %cst_48 {dimension_numbers = #tpu.dot_dimension_numbers<[1], [1], [0], [0], [0, 0, 1, 0], [], []>} : vector<16x128xbf16>, vector<16x128xbf16>, vector<16x16xf32> -> vector<16x16xf32>
    "tpu.trace_stop"() : () -> ()
    %133 = math.exp %132 : vector<16x16xf32>
    %cst_49 = arith.constant dense<0.000000e+00> : vector<16xf32>
    %134 = vector.multi_reduction <add>, %133, %cst_49 [1] : vector<16x16xf32> to vector<16xf32>
    %135 = vector.shape_cast %134 : vector<16xf32> to vector<16x1xf32>
    %136 = tpu.reciprocal %135 {approx = true} : vector<16x1xf32> -> vector<16x1xf32>
    %137 = vector.broadcast %136 : vector<16x1xf32> to vector<16x16xf32>
    %138 = arith.mulf %133, %137 : vector<16x16xf32>
    %cst_50 = arith.constant dense<0.000000e+00> : vector<16xf32>
    %139 = vector.multi_reduction <add>, %138, %cst_50 [0] : vector<16x16xf32> to vector<16xf32>
    %140 = vector.shape_cast %139 : vector<16xf32> to vector<1x16xf32>
    %cst_51 = arith.constant 9.99999971E-10 : f32
    %141 = vector.broadcast %cst_51 : f32 to vector<1x16xf32>
    %142 = arith.addf %141, %140 : vector<1x16xf32>
    %143 = tpu.reciprocal %142 {approx = true} : vector<1x16xf32> -> vector<1x16xf32>
    %144 = vector.broadcast %143 : vector<1x16xf32> to vector<16x16xf32>
    %145 = arith.mulf %138, %144 : vector<16x16xf32>
    %146 = arith.truncf %145 : vector<16x16xf32> to vector<16x16xbf16>
    %147 = arith.truncf %129 : vector<16x128xf32> to vector<16x128xbf16>
    %cst_52 = arith.constant dense<0.000000e+00> : vector<16x128xf32>
    %148 = tpu.matmul %146, %147, %cst_52 {dimension_numbers = #tpu.dot_dimension_numbers<[1], [0], [0], [1], [0, 0, 1, 1], [], []>} : vector<16x16xbf16>, vector<16x128xbf16>, vector<16x128xf32> -> vector<16x128xf32>
    %149 = arith.subf %108, %148 : vector<16x128xf32>
    %150 = arith.truncf %149 : vector<16x128xf32> to vector<16x128xbf16>
    %cst_53 = arith.constant dense<0.000000e+00> : vector<16x128xf32>
    %151 = tpu.matmul %150, %1, %cst_53 {dimension_numbers = #tpu.dot_dimension_numbers<[1], [0], [0], [1], [0, 0, 1, 1], [], []>} : vector<16x128xbf16>, vector<128x128xbf16>, vector<16x128xf32> -> vector<16x128xf32>
    %cst_54 = arith.constant 0.000000e+00 : f32
    %152 = vector.broadcast %cst_54 : f32 to vector<16x128xf32>
    %153 = arith.maximumf %151, %152 : vector<16x128xf32>
    %154 = arith.truncf %153 : vector<16x128xf32> to vector<16x128xbf16>
    %cst_55 = arith.constant dense<0.000000e+00> : vector<16x128xf32>
    %155 = tpu.matmul %154, %2, %cst_55 {dimension_numbers = #tpu.dot_dimension_numbers<[1], [0], [0], [1], [0, 0, 1, 1], [], []>} : vector<16x128xbf16>, vector<128x128xbf16>, vector<16x128xf32> -> vector<16x128xf32>
    %156 = vector.broadcast %3 : vector<1x128xf32> to vector<16x128xf32>
    %157 = arith.addf %155, %156 : vector<16x128xf32>
    %cst_56 = arith.constant 0.000000e+00 : f32
    %158 = vector.broadcast %cst_56 : f32 to vector<16x128xf32>
    %159 = arith.maximumf %157, %158 : vector<16x128xf32>
    %160 = arith.truncf %159 : vector<16x128xf32> to vector<16x128xbf16>
    %cst_57 = arith.constant dense<0.000000e+00> : vector<16x128xf32>
    %161 = tpu.matmul %160, %4, %cst_57 {dimension_numbers = #tpu.dot_dimension_numbers<[1], [0], [0], [1], [0, 0, 1, 1], [], []>} : vector<16x128xbf16>, vector<128x128xbf16>, vector<16x128xf32> -> vector<16x128xf32>
    %162 = vector.broadcast %5 : vector<1x128xf32> to vector<16x128xf32>
    %163 = arith.addf %161, %162 : vector<16x128xf32>
    %164 = arith.addf %153, %163 : vector<16x128xf32>
    %cst_58 = arith.constant dense<0.000000e+00> : vector<16xf32>
    %165 = vector.multi_reduction <add>, %164, %cst_58 [1] : vector<16x128xf32> to vector<16xf32>
    %166 = vector.shape_cast %165 : vector<16xf32> to vector<16x1xf32>
    %cst_59 = arith.constant 1.280000e+02 : f32
    %167 = vector.broadcast %cst_59 : f32 to vector<16x1xf32>
    %168 = arith.divf %166, %167 : vector<16x1xf32>
    %169 = vector.broadcast %168 : vector<16x1xf32> to vector<16x128xf32>
    %170 = arith.subf %164, %169 : vector<16x128xf32>
    %171 = arith.mulf %170, %170 : vector<16x128xf32>
    %cst_60 = arith.constant dense<0.000000e+00> : vector<16xf32>
    %172 = vector.multi_reduction <add>, %171, %cst_60 [1] : vector<16x128xf32> to vector<16xf32>
    %173 = vector.shape_cast %172 : vector<16xf32> to vector<16x1xf32>
    %cst_61 = arith.constant 1.280000e+02 : f32
    %174 = vector.broadcast %cst_61 : f32 to vector<16x1xf32>
    %175 = arith.divf %173, %174 : vector<16x1xf32>
    %176 = vector.broadcast %168 : vector<16x1xf32> to vector<16x128xf32>
    %177 = arith.subf %164, %176 : vector<16x128xf32>
    %cst_62 = arith.constant 9.99999974E-6 : f32
    %178 = vector.broadcast %cst_62 : f32 to vector<16x1xf32>
    %179 = arith.addf %175, %178 : vector<16x1xf32>
    %180 = math.rsqrt %179 : vector<16x1xf32>
    %181 = vector.broadcast %180 : vector<16x1xf32> to vector<16x128xf32>
    %182 = arith.mulf %177, %181 : vector<16x128xf32>
    %183 = vector.broadcast %6 : vector<1x128xf32> to vector<16x128xf32>
    %184 = arith.mulf %182, %183 : vector<16x128xf32>
    %185 = vector.broadcast %7 : vector<1x128xf32> to vector<16x128xf32>
    %186 = arith.addf %184, %185 : vector<16x128xf32>
    %187 = arith.addf %108, %186 : vector<16x128xf32>
    %cst_63 = arith.constant dense<0.000000e+00> : vector<128xf32>
    %188 = vector.multi_reduction <add>, %187, %cst_63 [0] : vector<16x128xf32> to vector<128xf32>
    %189 = vector.shape_cast %188 : vector<128xf32> to vector<1x128xf32>
    %cst_64 = arith.constant 1.600000e+01 : f32
    %190 = vector.broadcast %cst_64 : f32 to vector<1x128xf32>
    %191 = arith.divf %189, %190 : vector<1x128xf32>
    %192 = vector.broadcast %191 : vector<1x128xf32> to vector<16x128xf32>
    %193 = arith.subf %187, %192 : vector<16x128xf32>
    %194 = arith.mulf %193, %193 : vector<16x128xf32>
    %cst_65 = arith.constant dense<0.000000e+00> : vector<128xf32>
    %195 = vector.multi_reduction <add>, %194, %cst_65 [0] : vector<16x128xf32> to vector<128xf32>
    %196 = vector.shape_cast %195 : vector<128xf32> to vector<1x128xf32>
    %cst_66 = arith.constant 1.600000e+01 : f32
    %197 = vector.broadcast %cst_66 : f32 to vector<1x128xf32>
    %198 = arith.divf %196, %197 : vector<1x128xf32>
    %199 = vector.broadcast %191 : vector<1x128xf32> to vector<16x128xf32>
    %200 = arith.subf %187, %199 : vector<16x128xf32>
    %cst_67 = arith.constant 9.99999974E-6 : f32
    %201 = vector.broadcast %cst_67 : f32 to vector<1x128xf32>
    %202 = arith.addf %198, %201 : vector<1x128xf32>
    %203 = math.rsqrt %202 : vector<1x128xf32>
    %204 = vector.broadcast %203 : vector<1x128xf32> to vector<16x128xf32>
    %205 = arith.mulf %200, %204 : vector<16x128xf32>
    %cst_68 = arith.constant 0.000000e+00 : f32
    %206 = vector.broadcast %cst_68 : f32 to vector<16x128xf32>
    %207 = arith.maximumf %205, %206 : vector<16x128xf32>
    %c0_69 = arith.constant 0 : index
    %c0_70 = arith.constant 0 : index
    %208 = vector.load %arg11[%c0_69, %c0_70] : memref<128x256xbf16, #tpu.memory_space<vmem>>, vector<128x256xbf16>
    %209 = arith.truncf %207 : vector<16x128xf32> to vector<16x128xbf16>
    %cst_71 = arith.constant dense<0.000000e+00> : vector<16x256xf32>
    %210 = tpu.matmul %209, %208, %cst_71 {dimension_numbers = #tpu.dot_dimension_numbers<[1], [0], [0], [1], [0, 0, 1, 1], [], []>} : vector<16x128xbf16>, vector<128x256xbf16>, vector<16x256xf32> -> vector<16x256xf32>
    %211 = vector.extract_strided_slice %210 {offsets = [0, 0], sizes = [16, 128], strides = [1, 1]} : vector<16x256xf32> to vector<16x128xf32>
    %212 = arith.mulf %211, %211 : vector<16x128xf32>
    %cst_72 = arith.constant dense<0.000000e+00> : vector<16xf32>
    %213 = vector.multi_reduction <add>, %212, %cst_72 [1] : vector<16x128xf32> to vector<16xf32>
    %214 = vector.shape_cast %213 : vector<16xf32> to vector<16x1xf32>
    %cst_73 = arith.constant 1.000000e-24 : f32
    %215 = vector.broadcast %cst_73 : f32 to vector<16x1xf32>
    %216 = arith.maximumf %214, %215 : vector<16x1xf32>
    %217 = math.rsqrt %216 : vector<16x1xf32>
    %218 = vector.broadcast %217 : vector<16x1xf32> to vector<16x128xf32>
    %219 = arith.mulf %211, %218 : vector<16x128xf32>
    %220 = arith.truncf %219 : vector<16x128xf32> to vector<16x128xbf16>
    %221 = vector.extract_strided_slice %210 {offsets = [0, 128], sizes = [16, 128], strides = [1, 1]} : vector<16x256xf32> to vector<16x128xf32>
    %222 = arith.truncf %221 : vector<16x128xf32> to vector<16x128xbf16>
    %223 = vector.extract_strided_slice %0 {offsets = [0, 256], sizes = [128, 128], strides = [1, 1]} : vector<128x384xbf16> to vector<128x128xbf16>
    %c0_74 = arith.constant 0 : index
    %c0_75 = arith.constant 0 : index
    %224 = vector.load %arg12[%c0_74, %c0_75] : memref<128x128xbf16, #tpu.memory_space<vmem>>, vector<128x128xbf16>
    %c0_76 = arith.constant 0 : index
    %c0_77 = arith.constant 0 : index
    %225 = vector.load %arg13[%c0_76, %c0_77] : memref<128x128xbf16, #tpu.memory_space<vmem>>, vector<128x128xbf16>
    %c0_78 = arith.constant 0 : index
    %c0_79 = arith.constant 0 : index
    %226 = vector.load %arg14[%c0_78, %c0_79] : memref<128x128xbf16, #tpu.memory_space<vmem>>, vector<128x128xbf16>
    %c0_80 = arith.constant 0 : index
    %c0_81 = arith.constant 0 : index
    %227 = vector.load %arg15[%c0_80, %c0_81] : memref<1x128xf32, #tpu.memory_space<vmem>>, vector<1x128xf32>
    %c0_82 = arith.constant 0 : index
    %c0_83 = arith.constant 0 : index
    %228 = vector.load %arg16[%c0_82, %c0_83] : memref<128x128xbf16, #tpu.memory_space<vmem>>, vector<128x128xbf16>
    %c0_84 = arith.constant 0 : index
    %c0_85 = arith.constant 0 : index
    %229 = vector.load %arg17[%c0_84, %c0_85] : memref<1x128xf32, #tpu.memory_space<vmem>>, vector<1x128xf32>
    %c0_86 = arith.constant 0 : index
    %c0_87 = arith.constant 0 : index
    %230 = vector.load %arg18[%c0_86, %c0_87] : memref<1x128xf32, #tpu.memory_space<vmem>>, vector<1x128xf32>
    %c0_88 = arith.constant 0 : index
    %c0_89 = arith.constant 0 : index
    %231 = vector.load %arg19[%c0_88, %c0_89] : memref<1x128xf32, #tpu.memory_space<vmem>>, vector<1x128xf32>
    %c0_90 = arith.constant 0 : index
    %c0_91 = arith.constant 0 : index
    %c0_92 = arith.constant 0 : index
    %232 = vector.load %arg2[%c0_90, %c0_91, %c0_92] : memref<1x2x128xf32, #tpu.memory_space<vmem>>, vector<1x2x128xf32>
    %233 = vector.shape_cast %232 : vector<1x2x128xf32> to vector<2x128xf32>
    %234 = arith.truncf %233 : vector<2x128xf32> to vector<2x128xbf16>
    %cst_93 = arith.constant dense<0.000000e+00> : vector<2x128xf32>
    %235 = tpu.matmul %234, %223, %cst_93 {dimension_numbers = #tpu.dot_dimension_numbers<[1], [0], [0], [1], [0, 0, 1, 1], [], []>} : vector<2x128xbf16>, vector<128x128xbf16>, vector<2x128xf32> -> vector<2x128xf32>
    %cst_94 = arith.constant 1.000000e+00 : f32
    %236 = vector.broadcast %cst_94 : f32 to vector<2x128xf32>
    %237 = arith.mulf %236, %235 : vector<2x128xf32>
    %238 = arith.subf %233, %237 : vector<2x128xf32>
    %239 = arith.truncf %238 : vector<2x128xf32> to vector<2x128xbf16>
    %cst_95 = arith.constant dense<0.000000e+00> : vector<2x128xf32>
    %240 = tpu.matmul %239, %1, %cst_95 {dimension_numbers = #tpu.dot_dimension_numbers<[1], [0], [0], [1], [0, 0, 1, 1], [], []>} : vector<2x128xbf16>, vector<128x128xbf16>, vector<2x128xf32> -> vector<2x128xf32>
    %cst_96 = arith.constant 0.000000e+00 : f32
    %241 = vector.broadcast %cst_96 : f32 to vector<2x128xf32>
    %242 = arith.maximumf %240, %241 : vector<2x128xf32>
    %243 = arith.truncf %242 : vector<2x128xf32> to vector<2x128xbf16>
    %cst_97 = arith.constant dense<0.000000e+00> : vector<2x128xf32>
    %244 = tpu.matmul %243, %2, %cst_97 {dimension_numbers = #tpu.dot_dimension_numbers<[1], [0], [0], [1], [0, 0, 1, 1], [], []>} : vector<2x128xbf16>, vector<128x128xbf16>, vector<2x128xf32> -> vector<2x128xf32>
    %245 = vector.broadcast %3 : vector<1x128xf32> to vector<2x128xf32>
    %246 = arith.addf %244, %245 : vector<2x128xf32>
    %cst_98 = arith.constant 0.000000e+00 : f32
    %247 = vector.broadcast %cst_98 : f32 to vector<2x128xf32>
    %248 = arith.maximumf %246, %247 : vector<2x128xf32>
    %249 = arith.truncf %248 : vector<2x128xf32> to vector<2x128xbf16>
    %cst_99 = arith.constant dense<0.000000e+00> : vector<2x128xf32>
    %250 = tpu.matmul %249, %4, %cst_99 {dimension_numbers = #tpu.dot_dimension_numbers<[1], [0], [0], [1], [0, 0, 1, 1], [], []>} : vector<2x128xbf16>, vector<128x128xbf16>, vector<2x128xf32> -> vector<2x128xf32>
    %251 = vector.broadcast %5 : vector<1x128xf32> to vector<2x128xf32>
    %252 = arith.addf %250, %251 : vector<2x128xf32>
    %253 = arith.addf %242, %252 : vector<2x128xf32>
    %cst_100 = arith.constant dense<0.000000e+00> : vector<2xf32>
    %254 = vector.multi_reduction <add>, %253, %cst_100 [1] : vector<2x128xf32> to vector<2xf32>
    %255 = vector.shape_cast %254 : vector<2xf32> to vector<2x1xf32>
    %cst_101 = arith.constant 1.280000e+02 : f32
    %256 = vector.broadcast %cst_101 : f32 to vector<2x1xf32>
    %257 = arith.divf %255, %256 : vector<2x1xf32>
    %258 = vector.broadcast %257 : vector<2x1xf32> to vector<2x128xf32>
    %259 = arith.subf %253, %258 : vector<2x128xf32>
    %260 = arith.mulf %259, %259 : vector<2x128xf32>
    %cst_102 = arith.constant dense<0.000000e+00> : vector<2xf32>
    %261 = vector.multi_reduction <add>, %260, %cst_102 [1] : vector<2x128xf32> to vector<2xf32>
    %262 = vector.shape_cast %261 : vector<2xf32> to vector<2x1xf32>
    %cst_103 = arith.constant 1.280000e+02 : f32
    %263 = vector.broadcast %cst_103 : f32 to vector<2x1xf32>
    %264 = arith.divf %262, %263 : vector<2x1xf32>
    %265 = vector.broadcast %257 : vector<2x1xf32> to vector<2x128xf32>
    %266 = arith.subf %253, %265 : vector<2x128xf32>
    %cst_104 = arith.constant 9.99999974E-6 : f32
    %267 = vector.broadcast %cst_104 : f32 to vector<2x1xf32>
    %268 = arith.addf %264, %267 : vector<2x1xf32>
    %269 = math.rsqrt %268 : vector<2x1xf32>
    %270 = vector.broadcast %269 : vector<2x1xf32> to vector<2x128xf32>
    %271 = arith.mulf %266, %270 : vector<2x128xf32>
    %272 = vector.broadcast %6 : vector<1x128xf32> to vector<2x128xf32>
    %273 = arith.mulf %271, %272 : vector<2x128xf32>
    %274 = vector.broadcast %7 : vector<1x128xf32> to vector<2x128xf32>
    %275 = arith.addf %273, %274 : vector<2x128xf32>
    %276 = arith.addf %233, %275 : vector<2x128xf32>
    %277 = arith.subf %276, %276 : vector<2x128xf32>
    %cst_105 = arith.constant 9.99999974E-6 : f32
    %278 = vector.broadcast %cst_105 : f32 to vector<2x128xf32>
    %279 = math.rsqrt %278 : vector<2x128xf32>
    %280 = arith.mulf %277, %279 : vector<2x128xf32>
    %cst_106 = arith.constant 0.000000e+00 : f32
    %281 = vector.broadcast %cst_106 : f32 to vector<2x128xf32>
    %282 = arith.maximumf %280, %281 : vector<2x128xf32>
    %283 = arith.truncf %282 : vector<2x128xf32> to vector<2x128xbf16>
    %cst_107 = arith.constant dense<0.000000e+00> : vector<2x128xf32>
    %284 = tpu.matmul %283, %224, %cst_107 {dimension_numbers = #tpu.dot_dimension_numbers<[1], [0], [0], [1], [0, 0, 1, 1], [], []>} : vector<2x128xbf16>, vector<128x128xbf16>, vector<2x128xf32> -> vector<2x128xf32>
    %285 = arith.mulf %284, %284 : vector<2x128xf32>
    %cst_108 = arith.constant dense<0.000000e+00> : vector<2xf32>
    %286 = vector.multi_reduction <add>, %285, %cst_108 [1] : vector<2x128xf32> to vector<2xf32>
    %287 = vector.shape_cast %286 : vector<2xf32> to vector<2x1xf32>
    %cst_109 = arith.constant 1.000000e-24 : f32
    %288 = vector.broadcast %cst_109 : f32 to vector<2x1xf32>
    %289 = arith.maximumf %287, %288 : vector<2x1xf32>
    %290 = math.rsqrt %289 : vector<2x1xf32>
    %291 = vector.broadcast %290 : vector<2x1xf32> to vector<2x128xf32>
    %292 = arith.mulf %284, %291 : vector<2x128xf32>
    %293 = arith.truncf %292 : vector<2x128xf32> to vector<2x128xbf16>
    "tpu.trace_start"() <{level = 10 : i32, message = "qd,kd->qk"}> : () -> ()
    %cst_110 = arith.constant dense<0.000000e+00> : vector<2x16xf32>
    %294 = tpu.matmul %293, %220, %cst_110 {dimension_numbers = #tpu.dot_dimension_numbers<[1], [1], [0], [0], [0, 0, 1, 0], [], []>} : vector<2x128xbf16>, vector<16x128xbf16>, vector<2x16xf32> -> vector<2x16xf32>
    "tpu.trace_stop"() : () -> ()
    %295 = math.exp %294 : vector<2x16xf32>
    %cst_111 = arith.constant dense<0.000000e+00> : vector<2xf32>
    %296 = vector.multi_reduction <add>, %295, %cst_111 [1] : vector<2x16xf32> to vector<2xf32>
    %297 = vector.shape_cast %296 : vector<2xf32> to vector<2x1xf32>
    %298 = tpu.reciprocal %297 {approx = true} : vector<2x1xf32> -> vector<2x1xf32>
    %299 = vector.broadcast %298 : vector<2x1xf32> to vector<2x16xf32>
    %300 = arith.mulf %295, %299 : vector<2x16xf32>
    %cst_112 = arith.constant 9.99999971E-10 : f32
    %301 = vector.broadcast %cst_112 : f32 to vector<2x16xf32>
    %302 = arith.addf %301, %300 : vector<2x16xf32>
    %303 = tpu.reciprocal %302 {approx = true} : vector<2x16xf32> -> vector<2x16xf32>
    %304 = arith.mulf %300, %303 : vector<2x16xf32>
    %305 = arith.truncf %304 : vector<2x16xf32> to vector<2x16xbf16>
    %cst_113 = arith.constant dense<0.000000e+00> : vector<2x128xf32>
    %306 = tpu.matmul %305, %222, %cst_113 {dimension_numbers = #tpu.dot_dimension_numbers<[1], [0], [0], [1], [0, 0, 1, 1], [], []>} : vector<2x16xbf16>, vector<16x128xbf16>, vector<2x128xf32> -> vector<2x128xf32>
    %307 = arith.subf %282, %306 : vector<2x128xf32>
    %308 = arith.truncf %307 : vector<2x128xf32> to vector<2x128xbf16>
    %cst_114 = arith.constant dense<0.000000e+00> : vector<2x128xf32>
    %309 = tpu.matmul %308, %225, %cst_114 {dimension_numbers = #tpu.dot_dimension_numbers<[1], [0], [0], [1], [0, 0, 1, 1], [], []>} : vector<2x128xbf16>, vector<128x128xbf16>, vector<2x128xf32> -> vector<2x128xf32>
    %cst_115 = arith.constant 0.000000e+00 : f32
    %310 = vector.broadcast %cst_115 : f32 to vector<2x128xf32>
    %311 = arith.maximumf %309, %310 : vector<2x128xf32>
    %312 = arith.truncf %311 : vector<2x128xf32> to vector<2x128xbf16>
    %cst_116 = arith.constant dense<0.000000e+00> : vector<2x128xf32>
    %313 = tpu.matmul %312, %226, %cst_116 {dimension_numbers = #tpu.dot_dimension_numbers<[1], [0], [0], [1], [0, 0, 1, 1], [], []>} : vector<2x128xbf16>, vector<128x128xbf16>, vector<2x128xf32> -> vector<2x128xf32>
    %314 = vector.broadcast %227 : vector<1x128xf32> to vector<2x128xf32>
    %315 = arith.addf %313, %314 : vector<2x128xf32>
    %cst_117 = arith.constant 0.000000e+00 : f32
    %316 = vector.broadcast %cst_117 : f32 to vector<2x128xf32>
    %317 = arith.maximumf %315, %316 : vector<2x128xf32>
    %318 = arith.truncf %317 : vector<2x128xf32> to vector<2x128xbf16>
    %cst_118 = arith.constant dense<0.000000e+00> : vector<2x128xf32>
    %319 = tpu.matmul %318, %228, %cst_118 {dimension_numbers = #tpu.dot_dimension_numbers<[1], [0], [0], [1], [0, 0, 1, 1], [], []>} : vector<2x128xbf16>, vector<128x128xbf16>, vector<2x128xf32> -> vector<2x128xf32>
    %320 = vector.broadcast %229 : vector<1x128xf32> to vector<2x128xf32>
    %321 = arith.addf %319, %320 : vector<2x128xf32>
    %322 = arith.addf %311, %321 : vector<2x128xf32>
    %cst_119 = arith.constant dense<0.000000e+00> : vector<2xf32>
    %323 = vector.multi_reduction <add>, %322, %cst_119 [1] : vector<2x128xf32> to vector<2xf32>
    %324 = vector.shape_cast %323 : vector<2xf32> to vector<2x1xf32>
    %cst_120 = arith.constant 1.280000e+02 : f32
    %325 = vector.broadcast %cst_120 : f32 to vector<2x1xf32>
    %326 = arith.divf %324, %325 : vector<2x1xf32>
    %327 = vector.broadcast %326 : vector<2x1xf32> to vector<2x128xf32>
    %328 = arith.subf %322, %327 : vector<2x128xf32>
    %329 = arith.mulf %328, %328 : vector<2x128xf32>
    %cst_121 = arith.constant dense<0.000000e+00> : vector<2xf32>
    %330 = vector.multi_reduction <add>, %329, %cst_121 [1] : vector<2x128xf32> to vector<2xf32>
    %331 = vector.shape_cast %330 : vector<2xf32> to vector<2x1xf32>
    %cst_122 = arith.constant 1.280000e+02 : f32
    %332 = vector.broadcast %cst_122 : f32 to vector<2x1xf32>
    %333 = arith.divf %331, %332 : vector<2x1xf32>
    %334 = vector.broadcast %326 : vector<2x1xf32> to vector<2x128xf32>
    %335 = arith.subf %322, %334 : vector<2x128xf32>
    %cst_123 = arith.constant 9.99999974E-6 : f32
    %336 = vector.broadcast %cst_123 : f32 to vector<2x1xf32>
    %337 = arith.addf %333, %336 : vector<2x1xf32>
    %338 = math.rsqrt %337 : vector<2x1xf32>
    %339 = vector.broadcast %338 : vector<2x1xf32> to vector<2x128xf32>
    %340 = arith.mulf %335, %339 : vector<2x128xf32>
    %341 = vector.broadcast %230 : vector<1x128xf32> to vector<2x128xf32>
    %342 = arith.mulf %340, %341 : vector<2x128xf32>
    %343 = vector.broadcast %231 : vector<1x128xf32> to vector<2x128xf32>
    %344 = arith.addf %342, %343 : vector<2x128xf32>
    %345 = arith.addf %282, %344 : vector<2x128xf32>
    %346 = arith.subf %345, %345 : vector<2x128xf32>
    %cst_124 = arith.constant 9.99999974E-6 : f32
    %347 = vector.broadcast %cst_124 : f32 to vector<2x128xf32>
    %348 = math.rsqrt %347 : vector<2x128xf32>
    %349 = arith.mulf %346, %348 : vector<2x128xf32>
    %cst_125 = arith.constant 0.000000e+00 : f32
    %350 = vector.broadcast %cst_125 : f32 to vector<2x128xf32>
    %351 = arith.maximumf %349, %350 : vector<2x128xf32>
    %352 = arith.truncf %351 : vector<2x128xf32> to vector<2x128xbf16>
    %cst_126 = arith.constant dense<0.000000e+00> : vector<2x128xf32>
    %353 = tpu.matmul %352, %223, %cst_126 {dimension_numbers = #tpu.dot_dimension_numbers<[1], [0], [0], [1], [0, 0, 1, 1], [], []>} : vector<2x128xbf16>, vector<128x128xbf16>, vector<2x128xf32> -> vector<2x128xf32>
    %cst_127 = arith.constant 1.000000e+00 : f32
    %354 = vector.broadcast %cst_127 : f32 to vector<2x128xf32>
    %355 = arith.mulf %354, %353 : vector<2x128xf32>
    %356 = arith.subf %351, %355 : vector<2x128xf32>
    %357 = arith.truncf %356 : vector<2x128xf32> to vector<2x128xbf16>
    %cst_128 = arith.constant dense<0.000000e+00> : vector<2x128xf32>
    %358 = tpu.matmul %357, %1, %cst_128 {dimension_numbers = #tpu.dot_dimension_numbers<[1], [0], [0], [1], [0, 0, 1, 1], [], []>} : vector<2x128xbf16>, vector<128x128xbf16>, vector<2x128xf32> -> vector<2x128xf32>
    %cst_129 = arith.constant 0.000000e+00 : f32
    %359 = vector.broadcast %cst_129 : f32 to vector<2x128xf32>
    %360 = arith.maximumf %358, %359 : vector<2x128xf32>
    %361 = arith.truncf %360 : vector<2x128xf32> to vector<2x128xbf16>
    %cst_130 = arith.constant dense<0.000000e+00> : vector<2x128xf32>
    %362 = tpu.matmul %361, %2, %cst_130 {dimension_numbers = #tpu.dot_dimension_numbers<[1], [0], [0], [1], [0, 0, 1, 1], [], []>} : vector<2x128xbf16>, vector<128x128xbf16>, vector<2x128xf32> -> vector<2x128xf32>
    %363 = vector.broadcast %3 : vector<1x128xf32> to vector<2x128xf32>
    %364 = arith.addf %362, %363 : vector<2x128xf32>
    %cst_131 = arith.constant 0.000000e+00 : f32
    %365 = vector.broadcast %cst_131 : f32 to vector<2x128xf32>
    %366 = arith.maximumf %364, %365 : vector<2x128xf32>
    %367 = arith.truncf %366 : vector<2x128xf32> to vector<2x128xbf16>
    %cst_132 = arith.constant dense<0.000000e+00> : vector<2x128xf32>
    %368 = tpu.matmul %367, %4, %cst_132 {dimension_numbers = #tpu.dot_dimension_numbers<[1], [0], [0], [1], [0, 0, 1, 1], [], []>} : vector<2x128xbf16>, vector<128x128xbf16>, vector<2x128xf32> -> vector<2x128xf32>
    %369 = vector.broadcast %5 : vector<1x128xf32> to vector<2x128xf32>
    %370 = arith.addf %368, %369 : vector<2x128xf32>
    %371 = arith.addf %360, %370 : vector<2x128xf32>
    %cst_133 = arith.constant dense<0.000000e+00> : vector<2xf32>
    %372 = vector.multi_reduction <add>, %371, %cst_133 [1] : vector<2x128xf32> to vector<2xf32>
    %373 = vector.shape_cast %372 : vector<2xf32> to vector<2x1xf32>
    %cst_134 = arith.constant 1.280000e+02 : f32
    %374 = vector.broadcast %cst_134 : f32 to vector<2x1xf32>
    %375 = arith.divf %373, %374 : vector<2x1xf32>
    %376 = vector.broadcast %375 : vector<2x1xf32> to vector<2x128xf32>
    %377 = arith.subf %371, %376 : vector<2x128xf32>
    %378 = arith.mulf %377, %377 : vector<2x128xf32>
    %cst_135 = arith.constant dense<0.000000e+00> : vector<2xf32>
    %379 = vector.multi_reduction <add>, %378, %cst_135 [1] : vector<2x128xf32> to vector<2xf32>
    %380 = vector.shape_cast %379 : vector<2xf32> to vector<2x1xf32>
    %cst_136 = arith.constant 1.280000e+02 : f32
    %381 = vector.broadcast %cst_136 : f32 to vector<2x1xf32>
    %382 = arith.divf %380, %381 : vector<2x1xf32>
    %383 = vector.broadcast %375 : vector<2x1xf32> to vector<2x128xf32>
    %384 = arith.subf %371, %383 : vector<2x128xf32>
    %cst_137 = arith.constant 9.99999974E-6 : f32
    %385 = vector.broadcast %cst_137 : f32 to vector<2x1xf32>
    %386 = arith.addf %382, %385 : vector<2x1xf32>
    %387 = math.rsqrt %386 : vector<2x1xf32>
    %388 = vector.broadcast %387 : vector<2x1xf32> to vector<2x128xf32>
    %389 = arith.mulf %384, %388 : vector<2x128xf32>
    %390 = vector.broadcast %6 : vector<1x128xf32> to vector<2x128xf32>
    %391 = arith.mulf %389, %390 : vector<2x128xf32>
    %392 = vector.broadcast %7 : vector<1x128xf32> to vector<2x128xf32>
    %393 = arith.addf %391, %392 : vector<2x128xf32>
    %394 = arith.addf %351, %393 : vector<2x128xf32>
    %395 = arith.subf %394, %394 : vector<2x128xf32>
    %cst_138 = arith.constant 9.99999974E-6 : f32
    %396 = vector.broadcast %cst_138 : f32 to vector<2x128xf32>
    %397 = math.rsqrt %396 : vector<2x128xf32>
    %398 = arith.mulf %395, %397 : vector<2x128xf32>
    %cst_139 = arith.constant 0.000000e+00 : f32
    %399 = vector.broadcast %cst_139 : f32 to vector<2x128xf32>
    %400 = arith.maximumf %398, %399 : vector<2x128xf32>
    %401 = arith.truncf %400 : vector<2x128xf32> to vector<2x128xbf16>
    %cst_140 = arith.constant dense<0.000000e+00> : vector<2x128xf32>
    %402 = tpu.matmul %401, %224, %cst_140 {dimension_numbers = #tpu.dot_dimension_numbers<[1], [0], [0], [1], [0, 0, 1, 1], [], []>} : vector<2x128xbf16>, vector<128x128xbf16>, vector<2x128xf32> -> vector<2x128xf32>
    %403 = arith.mulf %402, %402 : vector<2x128xf32>
    %cst_141 = arith.constant dense<0.000000e+00> : vector<2xf32>
    %404 = vector.multi_reduction <add>, %403, %cst_141 [1] : vector<2x128xf32> to vector<2xf32>
    %405 = vector.shape_cast %404 : vector<2xf32> to vector<2x1xf32>
    %cst_142 = arith.constant 1.000000e-24 : f32
    %406 = vector.broadcast %cst_142 : f32 to vector<2x1xf32>
    %407 = arith.maximumf %405, %406 : vector<2x1xf32>
    %408 = math.rsqrt %407 : vector<2x1xf32>
    %409 = vector.broadcast %408 : vector<2x1xf32> to vector<2x128xf32>
    %410 = arith.mulf %402, %409 : vector<2x128xf32>
    %411 = arith.truncf %410 : vector<2x128xf32> to vector<2x128xbf16>
    "tpu.trace_start"() <{level = 10 : i32, message = "qd,kd->qk"}> : () -> ()
    %cst_143 = arith.constant dense<0.000000e+00> : vector<2x16xf32>
    %412 = tpu.matmul %411, %220, %cst_143 {dimension_numbers = #tpu.dot_dimension_numbers<[1], [1], [0], [0], [0, 0, 1, 0], [], []>} : vector<2x128xbf16>, vector<16x128xbf16>, vector<2x16xf32> -> vector<2x16xf32>
    "tpu.trace_stop"() : () -> ()
    %413 = math.exp %412 : vector<2x16xf32>
    %cst_144 = arith.constant dense<0.000000e+00> : vector<2xf32>
    %414 = vector.multi_reduction <add>, %413, %cst_144 [1] : vector<2x16xf32> to vector<2xf32>
    %415 = vector.shape_cast %414 : vector<2xf32> to vector<2x1xf32>
    %416 = tpu.reciprocal %415 {approx = true} : vector<2x1xf32> -> vector<2x1xf32>
    %417 = vector.broadcast %416 : vector<2x1xf32> to vector<2x16xf32>
    %418 = arith.mulf %413, %417 : vector<2x16xf32>
    %cst_145 = arith.constant 9.99999971E-10 : f32
    %419 = vector.broadcast %cst_145 : f32 to vector<2x16xf32>
    %420 = arith.addf %419, %418 : vector<2x16xf32>
    %421 = tpu.reciprocal %420 {approx = true} : vector<2x16xf32> -> vector<2x16xf32>
    %422 = arith.mulf %418, %421 : vector<2x16xf32>
    %423 = arith.truncf %422 : vector<2x16xf32> to vector<2x16xbf16>
    %cst_146 = arith.constant dense<0.000000e+00> : vector<2x128xf32>
    %424 = tpu.matmul %423, %222, %cst_146 {dimension_numbers = #tpu.dot_dimension_numbers<[1], [0], [0], [1], [0, 0, 1, 1], [], []>} : vector<2x16xbf16>, vector<16x128xbf16>, vector<2x128xf32> -> vector<2x128xf32>
    %425 = arith.subf %400, %424 : vector<2x128xf32>
    %426 = arith.truncf %425 : vector<2x128xf32> to vector<2x128xbf16>
    %cst_147 = arith.constant dense<0.000000e+00> : vector<2x128xf32>
    %427 = tpu.matmul %426, %225, %cst_147 {dimension_numbers = #tpu.dot_dimension_numbers<[1], [0], [0], [1], [0, 0, 1, 1], [], []>} : vector<2x128xbf16>, vector<128x128xbf16>, vector<2x128xf32> -> vector<2x128xf32>
    %cst_148 = arith.constant 0.000000e+00 : f32
    %428 = vector.broadcast %cst_148 : f32 to vector<2x128xf32>
    %429 = arith.maximumf %427, %428 : vector<2x128xf32>
    %430 = arith.truncf %429 : vector<2x128xf32> to vector<2x128xbf16>
    %cst_149 = arith.constant dense<0.000000e+00> : vector<2x128xf32>
    %431 = tpu.matmul %430, %226, %cst_149 {dimension_numbers = #tpu.dot_dimension_numbers<[1], [0], [0], [1], [0, 0, 1, 1], [], []>} : vector<2x128xbf16>, vector<128x128xbf16>, vector<2x128xf32> -> vector<2x128xf32>
    %432 = vector.broadcast %227 : vector<1x128xf32> to vector<2x128xf32>
    %433 = arith.addf %431, %432 : vector<2x128xf32>
    %cst_150 = arith.constant 0.000000e+00 : f32
    %434 = vector.broadcast %cst_150 : f32 to vector<2x128xf32>
    %435 = arith.maximumf %433, %434 : vector<2x128xf32>
    %436 = arith.truncf %435 : vector<2x128xf32> to vector<2x128xbf16>
    %cst_151 = arith.constant dense<0.000000e+00> : vector<2x128xf32>
    %437 = tpu.matmul %436, %228, %cst_151 {dimension_numbers = #tpu.dot_dimension_numbers<[1], [0], [0], [1], [0, 0, 1, 1], [], []>} : vector<2x128xbf16>, vector<128x128xbf16>, vector<2x128xf32> -> vector<2x128xf32>
    %438 = vector.broadcast %229 : vector<1x128xf32> to vector<2x128xf32>
    %439 = arith.addf %437, %438 : vector<2x128xf32>
    %440 = arith.addf %429, %439 : vector<2x128xf32>
    %cst_152 = arith.constant dense<0.000000e+00> : vector<2xf32>
    %441 = vector.multi_reduction <add>, %440, %cst_152 [1] : vector<2x128xf32> to vector<2xf32>
    %442 = vector.shape_cast %441 : vector<2xf32> to vector<2x1xf32>
    %cst_153 = arith.constant 1.280000e+02 : f32
    %443 = vector.broadcast %cst_153 : f32 to vector<2x1xf32>
    %444 = arith.divf %442, %443 : vector<2x1xf32>
    %445 = vector.broadcast %444 : vector<2x1xf32> to vector<2x128xf32>
    %446 = arith.subf %440, %445 : vector<2x128xf32>
    %447 = arith.mulf %446, %446 : vector<2x128xf32>
    %cst_154 = arith.constant dense<0.000000e+00> : vector<2xf32>
    %448 = vector.multi_reduction <add>, %447, %cst_154 [1] : vector<2x128xf32> to vector<2xf32>
    %449 = vector.shape_cast %448 : vector<2xf32> to vector<2x1xf32>
    %cst_155 = arith.constant 1.280000e+02 : f32
    %450 = vector.broadcast %cst_155 : f32 to vector<2x1xf32>
    %451 = arith.divf %449, %450 : vector<2x1xf32>
    %452 = vector.broadcast %444 : vector<2x1xf32> to vector<2x128xf32>
    %453 = arith.subf %440, %452 : vector<2x128xf32>
    %cst_156 = arith.constant 9.99999974E-6 : f32
    %454 = vector.broadcast %cst_156 : f32 to vector<2x1xf32>
    %455 = arith.addf %451, %454 : vector<2x1xf32>
    %456 = math.rsqrt %455 : vector<2x1xf32>
    %457 = vector.broadcast %456 : vector<2x1xf32> to vector<2x128xf32>
    %458 = arith.mulf %453, %457 : vector<2x128xf32>
    %459 = vector.broadcast %230 : vector<1x128xf32> to vector<2x128xf32>
    %460 = arith.mulf %458, %459 : vector<2x128xf32>
    %461 = vector.broadcast %231 : vector<1x128xf32> to vector<2x128xf32>
    %462 = arith.addf %460, %461 : vector<2x128xf32>
    %463 = arith.addf %400, %462 : vector<2x128xf32>
    %464 = arith.subf %463, %463 : vector<2x128xf32>
    %cst_157 = arith.constant 9.99999974E-6 : f32
    %465 = vector.broadcast %cst_157 : f32 to vector<2x128xf32>
    %466 = math.rsqrt %465 : vector<2x128xf32>
    %467 = arith.mulf %464, %466 : vector<2x128xf32>
    %cst_158 = arith.constant 0.000000e+00 : f32
    %468 = vector.broadcast %cst_158 : f32 to vector<2x128xf32>
    %469 = arith.maximumf %467, %468 : vector<2x128xf32>
    %c0_159 = arith.constant 0 : index
    %c0_160 = arith.constant 0 : index
    %c0_161 = arith.constant 0 : index
    %470 = vector.load %arg20[%c0_159, %c0_160, %c0_161] : memref<1x2x128xf32, #tpu.memory_space<vmem>>, vector<1x2x128xf32>
    %471 = vector.shape_cast %470 : vector<1x2x128xf32> to vector<2x128xf32>
    %472 = vector.shape_cast %469 : vector<2x128xf32> to vector<1x2x128xf32>
    tpu.vector_store %arg20[%c0_159, %c0_160, %c0_161], %472 {strides = array<i32>} : memref<1x2x128xf32, #tpu.memory_space<vmem>>, vector<1x2x128xf32>,
    return
  }
  func.func @transform_0(%arg0: i32) -> (i32, i32, i32) {
    %c0_i32 = arith.constant 0 : i32
    %c0_i32_0 = arith.constant 0 : i32
    %c0_i32_1 = arith.constant 0 : i32
    return %arg0, %c0_i32, %c0_i32_0 : i32, i32, i32
  }
  func.func @transform_1(%arg0: i32) -> (i32, i32, i32) {
    %c0_i32 = arith.constant 0 : i32
    %c0_i32_0 = arith.constant 0 : i32
    %c0_i32_1 = arith.constant 0 : i32
    return %arg0, %c0_i32, %c0_i32_0 : i32, i32, i32
  }
  func.func @transform_2(%arg0: i32) -> (i32, i32) {
    %c0_i32 = arith.constant 0 : i32
    %c0_i32_0 = arith.constant 0 : i32
    %c0_i32_1 = arith.constant 0 : i32
    return %c0_i32, %c0_i32_0 : i32, i32
  }
  func.func @transform_3(%arg0: i32) -> (i32, i32) {
    %c0_i32 = arith.constant 0 : i32
    %c0_i32_0 = arith.constant 0 : i32
    %c0_i32_1 = arith.constant 0 : i32
    return %c0_i32, %c0_i32_0 : i32, i32
  }
  func.func @transform_4(%arg0: i32) -> (i32, i32) {
    %c0_i32 = arith.constant 0 : i32
    %c0_i32_0 = arith.constant 0 : i32
    %c0_i32_1 = arith.constant 0 : i32
    return %c0_i32, %c0_i32_0 : i32, i32
  }
  func.func @transform_5(%arg0: i32) -> (i32, i32) {
    %c0_i32 = arith.constant 0 : i32
    %c0_i32_0 = arith.constant 0 : i32
    %c0_i32_1 = arith.constant 0 : i32
    return %c0_i32, %c0_i32_0 : i32, i32
  }
  func.func @transform_6(%arg0: i32) -> (i32, i32) {
    %c0_i32 = arith.constant 0 : i32
    %c0_i32_0 = arith.constant 0 : i32
    %c0_i32_1 = arith.constant 0 : i32
    return %c0_i32, %c0_i32_0 : i32, i32
  }
  func.func @transform_7(%arg0: i32) -> (i32, i32) {
    %c0_i32 = arith.constant 0 : i32
    %c0_i32_0 = arith.constant 0 : i32
    %c0_i32_1 = arith.constant 0 : i32
    return %c0_i32, %c0_i32_0 : i32, i32
  }
  func.func @transform_8(%arg0: i32) -> (i32, i32) {
    %c0_i32 = arith.constant 0 : i32
    %c0_i32_0 = arith.constant 0 : i32
    %c0_i32_1 = arith.constant 0 : i32
    return %c0_i32, %c0_i32_0 : i32, i32
  }
  func.func @transform_9(%arg0: i32) -> (i32, i32) {
    %c0_i32 = arith.constant 0 : i32
    %c0_i32_0 = arith.constant 0 : i32
    %c0_i32_1 = arith.constant 0 : i32
    return %c0_i32, %c0_i32_0 : i32, i32
  }
  func.func @transform_10(%arg0: i32) -> (i32, i32) {
    %c0_i32 = arith.constant 0 : i32
    %c0_i32_0 = arith.constant 0 : i32
    %c0_i32_1 = arith.constant 0 : i32
    return %c0_i32, %c0_i32_0 : i32, i32
  }
  func.func @transform_11(%arg0: i32) -> (i32, i32) {
    %c0_i32 = arith.constant 0 : i32
    %c0_i32_0 = arith.constant 0 : i32
    %c0_i32_1 = arith.constant 0 : i32
    return %c0_i32, %c0_i32_0 : i32, i32
  }
  func.func @transform_12(%arg0: i32) -> (i32, i32) {
    %c0_i32 = arith.constant 0 : i32
    %c0_i32_0 = arith.constant 0 : i32
    %c0_i32_1 = arith.constant 0 : i32
    return %c0_i32, %c0_i32_0 : i32, i32
  }
  func.func @transform_13(%arg0: i32) -> (i32, i32) {
    %c0_i32 = arith.constant 0 : i32
    %c0_i32_0 = arith.constant 0 : i32
    %c0_i32_1 = arith.constant 0 : i32
    return %c0_i32, %c0_i32_0 : i32, i32
  }
  func.func @transform_14(%arg0: i32) -> (i32, i32) {
    %c0_i32 = arith.constant 0 : i32
    %c0_i32_0 = arith.constant 0 : i32
    %c0_i32_1 = arith.constant 0 : i32
    return %c0_i32, %c0_i32_0 : i32, i32
  }
  func.func @transform_15(%arg0: i32) -> (i32, i32) {
    %c0_i32 = arith.constant 0 : i32
    %c0_i32_0 = arith.constant 0 : i32
    %c0_i32_1 = arith.constant 0 : i32
    return %c0_i32, %c0_i32_0 : i32, i32
  }
  func.func @transform_16(%arg0: i32) -> (i32, i32) {
    %c0_i32 = arith.constant 0 : i32
    %c0_i32_0 = arith.constant 0 : i32
    %c0_i32_1 = arith.constant 0 : i32
    return %c0_i32, %c0_i32_0 : i32, i32
  }
  func.func @transform_17(%arg0: i32) -> (i32, i32) {
    %c0_i32 = arith.constant 0 : i32
    %c0_i32_0 = arith.constant 0 : i32
    %c0_i32_1 = arith.constant 0 : i32
    return %c0_i32, %c0_i32_0 : i32, i32
  }
  func.func @transform_18(%arg0: i32) -> (i32, i32) {
    %c0_i32 = arith.constant 0 : i32
    %c0_i32_0 = arith.constant 0 : i32
    %c0_i32_1 = arith.constant 0 : i32
    return %c0_i32, %c0_i32_0 : i32, i32
  }
  func.func @transform_19(%arg0: i32) -> (i32, i32, i32) {
    %c0_i32 = arith.constant 0 : i32
    %c0_i32_0 = arith.constant 0 : i32
    %c0_i32_1 = arith.constant 0 : i32
    return %arg0, %c0_i32, %c0_i32_0 : i32, i32, i32
  }
}

</mosaic_0001>

<bundles_post_ra>
// kernel: transformer_siamese.1
= control target key start
LH: loop header
LB: loop body
LE: loop exit
PB: predicated region body
PF: predicated region fallthrough
CT: control target
= control target key end

     0   :  { %s6086_s0 = inlined_call_operand.vmem [shape: f32[2,16,128], index: 0, kind: input, shape index: {}]   ;;  %s6087_s1 = inlined_call_operand.vmem [shape: f32[2,2,128], index: 1, kind: input, shape index: {}]   ;;  %s6088_s2 = inlined_call_operand.hbm [shape: bf16[128,384], index: 2, kind: input, shape index: {}]   ;;  %s6089_s3 = inlined_call_operand.vmem [shape: bf16[128,128], index: 3, kind: input, shape index: {}]   ;;  %s6090_s4 = inlined_call_operand.hbm [shape: bf16[128,128], index: 4, kind: input, shape index: {}]   ;;  %s6091_s5 = inlined_call_operand.vmem [shape: f32[1,128], index: 5, kind: input, shape index: {}]   ;;  %s6092_s6 = inlined_call_operand.hbm [shape: bf16[128,128], index: 6, kind: input, shape index: {}]   ;;  %s6093_s7 = inlined_call_operand.vmem [shape: f32[1,128], index: 7, kind: input, shape index: {}]   ;;  %s6094_s8 = inlined_call_operand.vmem [shape: f32[1,128], index: 8, kind: input, shape index: {}]   ;;  %s6095_s9 = inlined_call_operand.vmem [shape: f32[1,128], index: 9, kind: input, shape index: {}]   ;;  %s6096_s10 = inlined_call_operand.hbm [shape: bf16[128,256], index: 10, kind: input, shape index: {}]   ;;  %s6097_s11 = inlined_call_operand.hbm [shape: bf16[128,128], index: 11, kind: input, shape index: {}]   ;;  %s6098_s12 = inlined_call_operand.hbm [shape: bf16[128,128], index: 12, kind: input, shape index: {}]   ;;  %s6099_s13 = inlined_call_operand.hbm [shape: bf16[128,128], index: 13, kind: input, shape index: {}]   ;;  %s6100_s14 = inlined_call_operand.vmem [shape: f32[1,128], index: 14, kind: input, shape index: {}]   ;;  %s6101_s15 = inlined_call_operand.hbm [shape: bf16[128,128], index: 15, kind: input, shape index: {}]   ;;  %s6102_s16 = inlined_call_operand.vmem [shape: f32[1,128], index: 16, kind: input, shape index: {}]   ;;  %s6103_s17 = inlined_call_operand.vmem [shape: f32[1,128], index: 17, kind: input, shape index: {}]   ;;  %s6104_s18 = inlined_call_operand.vmem [shape: f32[1,128], index: 18, kind: input, shape index: {}]   ;;  %s6105_s19 = inlined_call_operand.vmem [shape: f32[2,2,128], index: 19, kind: output, shape index: {}]  }
   0x1   :  { %6112 = sst [smem:[#allocation21_spill]] %s6086_s0 }
   0x2   :  { %6113 = sst [smem:[#allocation22_spill]] %s6087_s1 }
   0x3   :  { %6114 = sst [smem:[#allocation23_spill]] %s6088_s2 }
   0x4   :  { %6115 = sst [smem:[#allocation24_spill]] %s6089_s3 }
   0x5   :  { %6116 = sst [smem:[#allocation25_spill]] %s6090_s4 }
   0x6   :  { %6117 = sst [smem:[#allocation26_spill]] %s6096_s10 }
   0x7   :  { %6118 = sst [smem:[#allocation27_spill]] %s6098_s12 }
   0x8   :  { %24 = vsyncpa [#allocation3], 0 }
   0x9   :  { %25 = vsyncpa [#allocation5], 0 }
   0xa   :  { %26 = vsyncpa [#allocation8], 0 }
   0xb   :  { %27 = vsyncpa [#allocation11], 0 }
   0xc   :  { %28 = vsyncpa [#allocation14], 0  ;;  %s5056_s0 = smov 0  }
   0xd LB: > { %6119 = sst [smem:[#allocation20_spill]] %s4937_s0  ;;  %s4939_s30 = smov [#allocation4]   ;;  %s4937_s0 = sphi %s5056_s0, %s34_s0  }
   0xe   : > { %s502_s20 = sshll.u32 %s4939_s30, 4  ;;  %s5062_s21 = sadd.s32 4294967295, %s4937_s0   ;;  %s503_s20 = int_to_ptr.vmem [resolvable:$true] %s502_s20 }
   0xf   : > { %p3487_p0 = scmp.ge.s32.totalorder %s4937_s0, 1  ;;  %p474_p1 = scmp.lt.s32.totalorder %s4937_s0, 3 }
  0x10   : > { %p4438_p2 = scmp.eq.s32.totalorder %s5062_s21, 0  ;;  %s4940_s22 = smov [#allocation7]  }
  0x11   : > { %p5067_p3 = pnand %p3487_p0, %p474_p1  ;;  %s540_s2 = sshll.u32 %s4940_s22, 4  ;;  %s5073_s2 = int_to_ptr.vmem [resolvable:$true] %s540_s2 }
  0x12   : > { %s4941_s24 = smov [#allocation10]   ;;  %s4714_s26 = scalar_lea.vmem %s503_s20, 1024 }
  0x13   : > { %p4413_p4 = pneg %p5067_p3  ;;  %s5081_s25 = sshll.u32 %s4941_s24, 4  ;;  %s567_s25 = int_to_ptr.vmem [resolvable:$true] %s5081_s25 }
  0x14   : > { %p4715_p7 = scmp.ne.s32.totalorder %s503_s20, %s4714_s26  ;;  %p4722_p10 = scmp.lt.s32.totalorder %s503_s20, %s503_s20 }
  0x15   : > { %p5077_p5 = pnand %p4438_p2, %p4413_p4  ;;  %p4723_p11 = scmp.lt.s32.totalorder %s4714_s26, %s4714_s26 }
  0x17   : > { %p5085_p6 = pneg %p5077_p5  ;;  %p4724_p12 = por %p4723_p11, %p4722_p10 }
  0x19   : > { %p4717_p8 = pnand %p4715_p7, %p5085_p6 }
  0x1b   : > { %p4718_p9 = pneg %p4717_p8 }
  0x1d   : > { %p4725_p13 = pnand %p4724_p12, %p4718_p9 }
  0x1f   : > { %4728 = shalt.err (!%p4725_p13)
}
  0x20   : > { %s6107_s27 = smov 64   ;;  %s6109_s28 = smov 4  }
  0x21   : > { %s6123_s4 = sld [smem:[#allocation25_spill]]  ;;  %s4740_s22 = scalar_lea.vmem %s5073_s2, 2048 }
  0x22   : > { %p4741_p0 = scmp.ne.s32.totalorder %s5073_s2, %s4740_s22  ;;  %p4748_p7 = scmp.lt.s32.totalorder %s5073_s2, %s5073_s2 }
  0x23   : > { %p4749_p8 = scmp.lt.s32.totalorder %s4740_s22, %s4740_s22 }
  0x24   : > { %p4743_p1 = pnand %p4741_p0, %p5085_p6 }
  0x25   : > { %p4750_p9 = por %p4749_p8, %p4748_p7 }
  0x26   : > { %p4744_p4 = pneg %p4743_p1 }
  0x27   : > { %4419 = dma.hbm_to_vmem [thread:$0]  (!%p5077_p5), %s6123_s4, 1024, %s503_s20, [#allocation5], %s6107_s27, %s6107_s27, %s6109_s28  }
  0x28   : > { %p4751_p10 = pnand %p4750_p9, %p4744_p4 }
  0x2a   : > { %4754 = shalt.err (!%p4751_p10)
}
  0x2b   : > { %s4944_s24 = smov 128   ;;  %s4945_s26 = smov 8  }
  0x2c   : > { %s6124_s10 = sld [smem:[#allocation26_spill]]  ;;  %s4946_s30 = smov [#allocation2]  }
  0x2d   : > { %s486_s27 = sshll.u32 %s4946_s30, 4  ;;  %s4766_s28 = scalar_lea.vmem %s567_s25, 1024  ;;  %s487_s27 = int_to_ptr.vmem [resolvable:$true] %s486_s27 }
  0x2e   : > { %p4767_p11 = scmp.ne.s32.totalorder %s567_s25, %s4766_s28  ;;  %p4774_p0 = scmp.lt.s32.totalorder %s567_s25, %s567_s25 }
  0x2f   : > { %p4775_p1 = scmp.lt.s32.totalorder %s4766_s28, %s4766_s28 }
  0x30   : > { %p4769_p12 = pnand %p4767_p11, %p5085_p6 }
  0x31   : > { %p4776_p4 = por %p4775_p1, %p4774_p0 }
  0x32   : > { %4425 = dma.hbm_to_vmem [thread:$0]  (!%p5077_p5), %s6124_s10, 2048, %s5073_s2, [#allocation8], %s4944_s24, %s4944_s24, %s4945_s26  }
  0x33   : > { %p4770_p13 = pneg %p4769_p12 }
  0x35   : > { %p4777_p7 = pnand %p4776_p4, %p4770_p13 }
  0x37   : > { %4780 = shalt.err (!%p4777_p7)
}
  0x38   : > { %s6125_s22 = smov 4   ;;  %s6126_s4 = smov 64  }
  0x39   : > { %s6127_s12 = sld [smem:[#allocation27_spill]]  ;;  %s4792_s24 = scalar_lea.vmem %s487_s27, 3072 }
  0x3a   : > { %p4793_p8 = scmp.ne.s32.totalorder %s487_s27, %s4792_s24  ;;  %p4800_p11 = scmp.lt.s32.totalorder %s487_s27, %s487_s27 }
  0x3b   : > { %p4801_p12 = scmp.lt.s32.totalorder %s4792_s24, %s4792_s24 }
  0x3c   : > { %p4795_p9 = pnand %p4793_p8, %p5085_p6 }
  0x3d   : > { %p4802_p13 = por %p4801_p12, %p4800_p11 }
  0x3e   : > { %p4796_p10 = pneg %p4795_p9 }
  0x3f   : > { %4431 = dma.hbm_to_vmem [thread:$0]  (!%p5077_p5), %s6127_s12, 1024, %s567_s25, [#allocation11], %s6126_s4, %s6126_s4, %s6125_s22  }
  0x40   : > { %p4803_p0 = pnand %p4802_p13, %p4796_p10 }
  0x42   : > { %4806 = shalt.err (!%p4803_p0)
}
  0x43   : > { %s4947_s28 = smov 192   ;;  %s4948_s26 = smov 12  }
  0x44   : > { %s6128_s29 = sld [smem:[#allocation23_spill]]  ;;  %s4949_s25 = smov [#allocation6]  }
  0x45   : > { %s518_s2 = sshll.u32 %s4949_s25, 4  ;;  %s4950_s10 = smov [#allocation9]   ;;  %s519_s2 = int_to_ptr.vmem [resolvable:$true] %s518_s2 }
  0x46   : > { %s553_s12 = sshll.u32 %s4950_s10, 4  ;;  %s4818_s0 = scalar_lea.vmem %s519_s2, 1024  ;;  %s554_s12 = int_to_ptr.vmem [resolvable:$true] %s553_s12 }
  0x47   : > { %p4819_p1 = scmp.ne.s32.totalorder %s519_s2, %s4818_s0  ;;  %p4826_p8 = scmp.lt.s32.totalorder %s519_s2, %s519_s2 }
  0x48   : > { %p4827_p9 = scmp.lt.s32.totalorder %s4818_s0, %s4818_s0 }
  0x49   : > { %p4821_p4 = pnand %p4819_p1, %p5085_p6 }
  0x4a   : > { %4416 = dma.hbm_to_vmem [thread:$0]  (!%p5077_p5), %s6128_s29, 3072, %s487_s27, [#allocation3], %s4947_s28, %s4947_s28, %s4948_s26  }
  0x4b   : > { %p4822_p7 = pneg %p4821_p4  ;;  %p4828_p10 = por %p4827_p9, %p4826_p8 }
  0x4d   : > { %p4829_p11 = pnand %p4828_p10, %p4822_p7 }
  0x4f   : > { %4832 = shalt.err (!%p4829_p11)
}
  0x50   : > { %4422 = dma.hbm_to_vmem [thread:$0]  (!%p5077_p5), %s6092_s6, 1024, %s519_s2, [#allocation5], %s6126_s4, %s6126_s4, %s6125_s22  }
  0x51   : > { %s4844_s10 = scalar_lea.vmem %s554_s12, 1024  ;;  %p4852_p1 = scmp.lt.s32.totalorder %s554_s12, %s554_s12 }
  0x52   : > { %p4845_p12 = scmp.ne.s32.totalorder %s554_s12, %s4844_s10  ;;  %p4853_p4 = scmp.lt.s32.totalorder %s4844_s10, %s4844_s10 }
  0x54   : > { %p4847_p13 = pnand %p4845_p12, %p5085_p6  ;;  %p4854_p7 = por %p4853_p4, %p4852_p1 }
  0x56   : > { %p4848_p0 = pneg %p4847_p13 }
  0x58   : > { %p4855_p8 = pnand %p4854_p7, %p4848_p0 }
  0x5a   : > { %4858 = shalt.err (!%p4855_p8)
}
  0x5b   : > { %4428 = dma.hbm_to_vmem [thread:$0]  (!%p5077_p5), %s6097_s11, 1024, %s554_s12, [#allocation8], %s6126_s4, %s6126_s4, %s6125_s22  }
  0x5c   : > { %s4951_s26 = smov [#allocation12]   ;;  %s4952_s30 = smov [#allocation13]  }
  0x5d   : > { %s579_s20 = sshll.u32 %s4951_s26, 4  ;;  %s595_s29 = sshll.u32 %s4952_s30, 4  ;;  %s580_s20 = int_to_ptr.vmem [resolvable:$true] %s579_s20  ;;  %s596_s29 = int_to_ptr.vmem [resolvable:$true] %s595_s29 }
  0x5e   : > { %s4870_s25 = scalar_lea.vmem %s580_s20, 1024  ;;  %p4878_p12 = scmp.lt.s32.totalorder %s580_s20, %s580_s20 }
  0x5f   : > { %p4871_p9 = scmp.ne.s32.totalorder %s580_s20, %s4870_s25  ;;  %p4879_p13 = scmp.lt.s32.totalorder %s4870_s25, %s4870_s25 }
  0x61   : > { %p4873_p10 = pnand %p4871_p9, %p5085_p6  ;;  %p4880_p0 = por %p4879_p13, %p4878_p12 }
  0x63   : > { %p4874_p11 = pneg %p4873_p10 }
  0x65   : > { %p4881_p1 = pnand %p4880_p0, %p4874_p11 }
  0x67   : > { %4884 = shalt.err (!%p4881_p1)
}
  0x68   : > { %4434 = dma.hbm_to_vmem [thread:$0]  (!%p5077_p5), %s6099_s13, 1024, %s580_s20, [#allocation11], %s6126_s4, %s6126_s4, %s6125_s22  }
  0x69   : > { %s4896_s27 = scalar_lea.vmem %s596_s29, 1024  ;;  %p4904_p9 = scmp.lt.s32.totalorder %s596_s29, %s596_s29 }
  0x6a   : > { %p4897_p4 = scmp.ne.s32.totalorder %s596_s29, %s4896_s27  ;;  %p4905_p10 = scmp.lt.s32.totalorder %s4896_s27, %s4896_s27 }
  0x6c   : > { %p4899_p7 = pnand %p4897_p4, %p5085_p6  ;;  %p4906_p11 = por %p4905_p10, %p4904_p9 }
  0x6e   : > { %p4900_p8 = pneg %p4899_p7 }
  0x70   : > { %p4907_p12 = pnand %p4906_p11, %p4900_p8 }
  0x72   : > { %4910 = shalt.err (!%p4907_p12)
}
  0x73   : > { %4437 = dma.hbm_to_vmem [thread:$0]  (!%p5077_p5), %s6101_s15, 1024, %s596_s29, [#allocation14], %s6126_s4, %s6126_s4, %s6125_s22  }
  0x74   : > { %635 = sbr.rel (%p5067_p3) target bundleno = 9783 (0x2637), region = 96 }
  0x79   : > { %4916 = dma.done.wait (%p4438_p2), [#allocation3], 3072  }
  0x7a   : > { %4918 = vsyncadd (%p4438_p2), [#allocation3], 4294964224 }
  0x7b   : > { %4920 = dma.done.wait (%p4438_p2), [#allocation5], 2048  }
  0x7c   : > { %4922 = vsyncadd (%p4438_p2), [#allocation5], 4294965248 }
  0x7d   : > { %4924 = dma.done.wait (%p4438_p2), [#allocation8], 3072  }
  0x7e   : > { %4926 = vsyncadd (%p4438_p2), [#allocation8], 4294964224 }
  0x7f   : > { %4928 = dma.done.wait (%p4438_p2), [#allocation11], 2048  }
  0x80   : > { %4930 = vsyncadd (%p4438_p2), [#allocation11], 4294965248 }
  0x81   : > { %4932 = dma.done.wait (%p4438_p2), [#allocation14], 1024  }
  0x82   : > { %4934 = vsyncadd (%p4438_p2), [#allocation14], 4294966272  ;;  %v4953_v0 = vmov 0   ;;  %v5192_v1 = vld [vmem:[#allocation2 + $0xac] ss:$12 sps:$4 sm:$0xff]   ;;  %p722_p3 = scmp.lt.s32.totalorder %s5062_s21, 1 }
  0x83   : > { %983 = vmatprep.mubr.bf16.mxu0 %v4953_v0  ;;  %v5194_v2 = vld [vmem:[#allocation2 + $0xa8] ss:$12 sps:$4 sm:$0xff]   ;;  %951 = vmatprep.subr.bf16.mxu0 %v5192_v1  ;;  %v5201_v4 = vld [vmem:[#allocation2 + $0x90] ss:$12 sps:$4 sm:$0xff]   ;;  %v5210_v6 = vld [vmem:[#allocation2 + $0x78] ss:$12 sps:$4 sm:$0xff]  }
  0x84   : > { %v5197_v3 = vld [vmem:[#allocation2 + $0x94] ss:$12 sps:$4 sm:$0xff]   ;;  %952 = vmatpush1.bf16.msra.mxu0 %v5194_v2  ;;  %v5204_v5 = vld [vmem:[#allocation2 + $0x7c] ss:$12 sps:$4 sm:$0xff]   ;;  %s6134_s21 = smov (!%p722_p3, %s5062_s21), 1  ;;  %s6129_s3 = sld [smem:[#allocation21_spill]] }
  0x85   : > { %953 = vmatprep.subr.bf16.mxu0 %v5197_v3  ;;  %v5213_v7 = vld [vmem:[#allocation2 + $0x64] ss:$12 sps:$4 sm:$0xff]   ;;  %v5215_v8 = vld [vmem:[#allocation2 + $0x60] ss:$12 sps:$4 sm:$0xff]   ;;  %s3620_s4 = sshll.u32 %s6134_s21, 4  ;;  %v4954_v21 = vmov 0.0  }
  0x86   : > { %v5219_v9 = vld [vmem:[#allocation2 + $0x4c] ss:$12 sps:$4 sm:$0xff]   ;;  %v5222_v10 = vld [vmem:[#allocation2 + $0x48] ss:$12 sps:$4 sm:$0xff]   ;;  %v5228_v12 = vld [vmem:[#allocation2 + $0x30] ss:$12 sps:$4 sm:$0xff]   ;;  %3853 = vmatprep.subr.bf16.mxu1 %v4954_v21 }
  0x87   : > { %v5224_v11 = vld [vmem:[#allocation2 + $0x34] ss:$12 sps:$4 sm:$0xff]   ;;  %v5230_v13 = vld [vmem:[#allocation2 + $0x1c] ss:$12 sps:$4 sm:$0xff]   ;;  %v5234_v14 = vld [vmem:[#allocation2 + $0x18] ss:$12 sps:$4 sm:$0xff]  }
  0x88   : > { %954 = vmatpush1.bf16.msra.mxu0 %v5201_v4  ;;  %v5236_v15 = vld [vmem:[#allocation2 + $0x4] ss:$12 sps:$4 sm:$0xff]   ;;  %v5243_v16 = vld [vmem:[#allocation2] ss:$12 sps:$4 sm:$0xff]   ;;  %v5267_v24 = vld [vmem:[#allocation2 + $0x68] ss:$12 sps:$4 sm:$0xff]  }
  0x89   : > { %955 = vmatprep.subr.bf16.mxu0 %v5204_v5  ;;  %v5254_v20 = vld [vmem:[#allocation2 + $0xb0] ss:$12 sps:$4 sm:$0xff]   ;;  %v5259_v22 = vld [vmem:[#allocation2 + $0x98] ss:$12 sps:$4 sm:$0xff]   ;;  %v5263_v23 = vld [vmem:[#allocation2 + $0x80] ss:$12 sps:$4 sm:$0xff]  }
  0x8a   : > { %s726_s22 = scalar_lea.vmem %s6129_s3, %s3620_s4  ;;  %3854 = vmatpush3.bf16.msra.mxu1 %v5254_v20  ;;  %v5272_v33 = vld [vmem:[#allocation2 + $0x50] ss:$12 sps:$4 sm:$0xff]   ;;  %v5276_v34 = vld [vmem:[#allocation2 + $0x38] ss:$12 sps:$4 sm:$0xff]   ;;  %v5280_v35 = vld [vmem:[#allocation2 + $0x20] ss:$12 sps:$4 sm:$0xff]  }
  0x8b   : > { %v5245_v17 = vld [vmem:[%s726_s22] sm:$0xff]  ;;  %v5247_v18 = vld [vmem:[%s726_s22 + $0x8] sm:$0xff]  ;;  %3855 = vmatprep.subr.bf16.mxu1 %v4954_v21  ;;  %vm4955_vm0 = vmmov 0   ;;  %vm1106_vm1 = vcmask 130048   ;;  %s6130_s26 = sld [smem:[#allocation24_spill]]  ;;  %s3508_s27 = sshll.u32 %s6134_s21, 1 }
  0x8c   : > { %956 = vmatpush1.bf16.msra.mxu0 %v5210_v6  ;;  %v822_v19 = vpack.c.bf16 %v5247_v18, %v5245_v17  ;;  %3869 = vmatprep.mubr.msk.bf16.mxu1 %vm4955_vm0, %v4954_v21  ;;  %v5287_v36 = vld [vmem:[#allocation2 + $0x8] ss:$12 sps:$4 sm:$0xff]   ;;  %s6131_s4 = sld [smem:[#allocation22_spill]]  ;;  %vm2338_vm2 = vcmask 1041408   ;;  %vm2497_vm3 = vcmask 123904   ;;  %s734_s28 = scalar_lea.vmem %s6105_s19, %s3508_s27 }
  0x8d   : > { %957 = vmatprep.subr.bf16.mxu0 %v5213_v7 }
  0x8e   : > { %3856 = vmatpush3.bf16.msra.mxu1 %v5259_v22 }
  0x8f   : > { %3857 = vmatprep.subr.bf16.mxu1 %v4954_v21 }
  0x90   : > { %958 = vmatpush1.bf16.msra.mxu0 %v5215_v8 }
  0x91   : > { %959 = vmatprep.subr.bf16.mxu0 %v5219_v9 }
  0x92   : > { %3858 = vmatpush3.bf16.msra.mxu1 %v5263_v23  ;;  %s730_s1 = scalar_lea.vmem %s6131_s4, %s3508_s27 }
  0x93   : > { %3859 = vmatprep.subr.bf16.mxu1 %v4954_v21 }
  0x94   : > { %960 = vmatpush1.bf16.msra.mxu0 %v5222_v10 }
  0x95   : > { %961 = vmatprep.subr.bf16.mxu0 %v5224_v11 }
  0x96   : > { %3860 = vmatpush3.bf16.msra.mxu1 %v5267_v24 }
  0x97   : > { %3861 = vmatprep.subr.bf16.mxu1 %v4954_v21 }
  0x98   : > { %962 = vmatpush1.bf16.msra.mxu0 %v5228_v12 }
  0x99   : > { %963 = vmatprep.subr.bf16.mxu0 %v5230_v13 }
  0x9a   : > { %3862 = vmatpush3.bf16.msra.mxu1 %v5272_v33 }
  0x9b   : > { %3863 = vmatprep.subr.bf16.mxu1 %v4954_v21 }
  0x9c   : > { %964 = vmatpush1.bf16.msra.mxu0 %v5234_v14 }
  0x9d   : > { %965 = vmatprep.subr.bf16.mxu0 %v5236_v15 }
  0x9e   : > { %3864 = vmatpush3.bf16.msra.mxu1 %v5276_v34 }
  0x9f   : > { %3865 = vmatprep.subr.bf16.mxu1 %v4954_v21 }
  0xa0   : > { %966 = vmatpush1.bf16.msra.mxu0 %v5243_v16 }
  0xa1   : > { %3885 = vmatprep.subr.bf16.mxu0 %v4954_v21 }
  0xa2   : > { %3866 = vmatpush3.bf16.msra.mxu1 %v5280_v35 }
  0xa3   : > { %984 = vmatmul.mubr.bf16.vlgmr.msra.gmra.mxu0 %v822_v19  ;;  %3867 = vmatprep.subr.bf16.mxu1 %v4954_v21 }
  0xa4   : > { %3901 = vmatprep.mubr.msk.bf16.mxu0 %vm4955_vm0, %v4954_v21 }
  0xa6   : > { %3868 = vmatpush3.bf16.msra.mxu1 %v5287_v36 }
  0xa7   : > { %3873 = vmatprep.subr.bf16.mxu1 %v4954_v21 }
  0xa9   : > { %3870 = vmatmul.mubr.bf16.vlgmr.msra.gmra.mxu1 %v822_v19 }
  0xaa   : > { %3875 = vmatprep.mubr.msk.bf16.mxu1 %vm4955_vm0, %v4954_v21 }
 0x163   : > { %v985_v25 = vpop.f32.mrf.mxu0 }
 0x164   : > { %v1035_v26 = vmul.f32 %v985_v25, %v985_v25 }
 0x165   : > { %v987_v27 = vpop.f32.mrf.mxu0 }
 0x166   : > { %1037 = vadd.xlane.f32.xlu0 %v1035_v26  ;;  %v1047_v28 = vmul.f32 %v987_v27, %v987_v27 }
 0x167   : > { %v989_v29 = vpop.f32.mrf.mxu0 }
 0x168   : > { %1049 = vadd.xlane.f32.xlu1 %v1047_v28  ;;  %v1036_v30 = vmul.f32 %v989_v29, %v989_v29 }
 0x169   : > { %v991_v31 = vpop.f32.mrf.mxu0  ;;  %v1028_v55 = vpop.f32.mrf.mxu1 }
 0x16a   : > { %1039 = vadd.xlane.f32.xlu0 %v1036_v30  ;;  %v1048_v32 = vmul.f32 %v991_v31, %v991_v31  ;;  %v5303_v30 = vld [vmem:[%s6130_s26 + $0x38] sm:$0xff]  }
 0x16b   : > { %v3871_v56 = vpop.f32.mrf.mxu1  ;;  %3886 = vmatpush3.bf16.msra.mxu0 %v5303_v30 }
 0x16c   : > { %1051 = vadd.xlane.f32.xlu1 %v1048_v32  ;;  %3887 = vmatprep.subr.bf16.mxu0 %v4954_v21  ;;  %v5316_v32 = vld [vmem:[%s6130_s26 + $0x28] sm:$0xff]  }
 0x16d   : > { %v1031_v57 = vpop.f32.mrf.mxu1 }
 0x16e   : > { %v1131_v58 = vpack.c.bf16 %v1031_v57, %v1028_v55 }
 0x16f   : > { %v3872_v59 = vpop.f32.mrf.mxu1 }
 0x1ef   : > { %v1038_v37 = vpop.xlane.xlu0 %1037 }
 0x1f0   : > { %v1041_v38 = vmax.f32 %v1038_v37, 1e-24  ;;  %v5323_v37 = vld [vmem:[%s6130_s26 + $0x20] sm:$0xff]  }
 0x1f1   : > { %v1050_v39 = vpop.xlane.xlu1 %1049 }
 0x1f2   : > { %4591 = vrsqrt.f32 %v1041_v38  ;;  %v1053_v44 = vmax.f32 %v1050_v39, 1e-24  ;;  %v5330_v38 = vld [vmem:[%s6130_s26 + $0x18] sm:$0xff]   ;;  %v5337_v39 = vld [vmem:[%s6130_s26 + $0x10] sm:$0xff]  }
 0x1f3   : > { %v1040_v40 = vpop.xlane.xlu0 %1039 }
 0x1f4   : > { %v1042_v41 = vmax.f32 %v1040_v40, 1e-24 }
 0x1f5   : > { %v1052_v42 = vpop.xlane.xlu1 %1051 }
 0x1f6   : > { %4593 = vrsqrt.f32 %v1042_v41  ;;  %v1054_v43 = vmax.f32 %v1052_v42, 1e-24 }
 0x1f8   : > { %4595 = vrsqrt.f32 %v1054_v43 }
 0x1f9   : > { %4597 = vrsqrt.f32 %v1053_v44 }
 0x1ff   : > { %v4592_v45 = vpop.eup %4591 }
 0x200   : > { %v1045_v47 = vmul.f32 %v4592_v45, %v985_v25 }
 0x203   : > { %v4594_v46 = vpop.eup %4593 }
 0x204   : > { %v1046_v48 = vmul.f32 %v4594_v46, %v989_v29 }
 0x205   : > { %v4596_v49 = vpop.eup %4595 }
 0x206   : > { %v1060_v50 = vpack.c.bf16 %v1046_v48, %v1045_v47  ;;  %v4598_v51 = vpop.eup %4597  ;;  %v1058_v52 = vmul.f32 %v4596_v49, %v991_v31  ;;  %v5309_v31 = vld [vmem:[%s6130_s26 + $0x30] sm:$0xff]  }
 0x207   : > { %v1057_v53 = vmul.f32 %v4598_v51, %v987_v27  ;;  %3888 = vmatpush3.bf16.msra.mxu0 %v5309_v31 }
 0x208   : > { %3874 = vmatpush3.bf16.xpose.msra.mxu1 %v1060_v50  ;;  %3889 = vmatprep.subr.bf16.mxu0 %v4954_v21 }
 0x209   : > { %3879 = vmatprep.subr.bf16.mxu1 %v4954_v21  ;;  %v1059_v54 = vpack.c.bf16 %v1058_v52, %v1057_v53 }
 0x20b   : > { %3890 = vmatpush3.bf16.msra.mxu0 %v5316_v32 }
 0x20c   : > { %3891 = vmatprep.subr.bf16.mxu0 %v4954_v21 }
 0x20f   : > { %3876 = vmatmul.mubr.bf16.vlgmr.msra.gmra.mxu1 %v1059_v54  ;;  %3892 = vmatpush3.bf16.msra.mxu0 %v5323_v37 }
 0x210   : > { %3881 = vmatprep.mubr.msk.bf16.mxu1 %vm4955_vm0, %v4954_v21  ;;  %3880 = vmatpush3.bf16.msra.mxu1 %v1131_v58 }
 0x211   : > { %3905 = vmatprep.subr.bf16.mxu1 %v4954_v21  ;;  %3893 = vmatprep.subr.bf16.mxu0 %v4954_v21 }
 0x213   : > { %3894 = vmatpush3.bf16.msra.mxu0 %v5330_v38 }
 0x214   : > { %3895 = vmatprep.subr.bf16.mxu0 %v4954_v21 }
 0x217   : > { %3896 = vmatpush3.bf16.msra.mxu0 %v5337_v39 }
 0x218   : > { %3897 = vmatprep.subr.bf16.mxu0 %v4954_v21 }
 0x2cf   : > { %v1095_v60 = vpop.f32.mrf.mxu1 }
 0x2d0   : > { %v1102_v61 = vmul.f32 1.442695, %v1095_v60  ;;  %v5350_v60 = vld [vmem:[%s6130_s26 + $0x8] sm:$0xff]  }
 0x2d1   : > { %v3877_v62 = vpop.f32.mrf.mxu1  ;;  %3898 = vmatpush3.bf16.msra.mxu0 %v5350_v60 }
 0x2d2   : > { %4599 = vpow2.f32 %v1102_v61  ;;  %3899 = vmatprep.subr.bf16.mxu0 %v4954_v21  ;;  %v5357_v61 = vld [vmem:[%s6130_s26] sm:$0xff]   ;;  %v5361_v62 = vld [vmem:[#allocation4 + $0x38] sm:$0xff]  }
 0x2d3   : > { %v1098_v63 = vpop.f32.mrf.mxu1 }
 0x2d4   : > { %v1104_v19 = vmul.f32 1.442695, %v1098_v63  ;;  %v5364_v63 = vld [vmem:[#allocation4 + $0x30] sm:$0xff]  }
 0x2d5   : > { %v3878_v25 = vpop.f32.mrf.mxu1  ;;  %3900 = vmatpush3.bf16.msra.mxu0 %v5357_v61 }
 0x2d6   : > { %4601 = vpow2.f32 %v1104_v19  ;;  %3925 = vmatprep.subr.bf16.mxu0 %v4954_v21  ;;  %v5368_v19 = vld [vmem:[#allocation4 + $0x28] sm:$0xff]   ;;  %v5372_v25 = vld [vmem:[#allocation4 + $0x20] sm:$0xff]  }
 0x2df   : > { %v4600_v26 = vpop.eup %4599 }
 0x2e0   : > { %v1107_v27 = vsel %vm1106_vm1, %v4600_v26, 0.0 }
 0x2e1   : > { %1108 = vadd.xlane.f32.xlu0 %v1107_v27  ;;  %v5380_v27 = vld [vmem:[#allocation4 + $0x10] sm:$0xff]  }
 0x2e3   : > { %v4602_v28 = vpop.eup %4601 }
 0x2e4   : > { %v1110_v29 = vsel %vm1106_vm1, %v4602_v28, 0.0 }
 0x2e5   : > { %1111 = vadd.xlane.f32.xlu1 %v1110_v29 }
 0x36a   : > { %v1109_v40 = vpop.xlane.xlu0 %1108 }
 0x36b   : > { %4603 = vrcp.f32 %v1109_v40 }
 0x36e   : > { %v1112_v41 = vpop.xlane.xlu1 %1111 }
 0x36f   : > { %4605 = vrcp.f32 %v1112_v41 }
 0x378   : > { %v4604_v42 = vpop.eup %4603 }
 0x379   : > { %v1115_v43 = vmul.f32 %v4604_v42, %v4600_v26  ;;  %v5376_v26 = vld [vmem:[#allocation4 + $0x18] sm:$0xff]  }
 0x37b   : > { %v1117_v46 = vsel %vm1106_vm1, %v1115_v43, 0.0 }
 0x37c   : > { %v4606_v44 = vpop.eup %4605 }
 0x37d   : > { %v1116_v45 = vmul.f32 %v4606_v44, %v4602_v28 }
 0x37f   : > { %v1118_v47 = vsel %vm1106_vm1, %v1116_v45, 0.0 }
 0x380   : > { %v1119_v48 = vadd.f32 %v1118_v47, %v1117_v46  ;;  %v5393_v46 = vld [vmem:[#allocation4] sm:$0xff]   ;;  %v5397_v47 = vld [vmem:[#allocation6 + $0x38] sm:$0xff]  }
 0x382   : > { %v1120_v49 = vrot.slane %v1119_v48, 4 }
 0x384   : > { %v1121_v50 = vadd.f32 %v1120_v49, %v1119_v48  ;;  %v5400_v48 = vld [vmem:[#allocation6 + $0x30] sm:$0xff]   ;;  %v5404_v49 = vld [vmem:[#allocation6 + $0x28] sm:$0xff]  }
 0x386   : > { %v1122_v51 = vrot.slane %v1121_v50, 2 }
 0x388   : > { %v1123_v52 = vadd.f32 %v1122_v51, %v1121_v50  ;;  %v5408_v50 = vld [vmem:[#allocation6 + $0x20] sm:$0xff]  }
 0x38a   : > { %v1124_v53 = vrot.slane %v1123_v52, 1 }
 0x38c   : > { %v1125_v54 = vadd.f32 %v1124_v53, %v1123_v52 }
 0x38e   : > { %v1126_v55 = vadd.f32 1e-09, %v1125_v54 }
 0x390   : > { %4607 = vrcp.f32 %v1126_v55 }
 0x39d   : > { %v4608_v56 = vpop.eup %4607 }
 0x39e   : > { %v1128_v57 = vmul.f32 %v4608_v56, %v1115_v43  ;;  %v1129_v58 = vmul.f32 %v4608_v56, %v1116_v45  ;;  %v5389_v45 = vld [vmem:[#allocation4 + $0x8] sm:$0xff]  }
 0x3a0   : > { %v1130_v59 = vpack.c.bf16 %v1129_v58, %v1128_v57 }
 0x3a2   : > { %3882 = vmatmul.mubr.msk.bf16.vlgmr.msra.gmra.mxu1 %vm1106_vm1, %v1130_v59 }
 0x3a3   : > { %3921 = vmatprep.mubr.msk.bf16.mxu1 %vm4955_vm0, %v4954_v21  ;;  %3906 = vmatpush3.bf16.msra.mxu1 %v5361_v62 }
 0x3a4   : > { %3907 = vmatprep.subr.bf16.mxu1 %v4954_v21 }
 0x3a7   : > { %3908 = vmatpush3.bf16.msra.mxu1 %v5364_v63 }
 0x3a8   : > { %3909 = vmatprep.subr.bf16.mxu1 %v4954_v21 }
 0x3ab   : > { %3910 = vmatpush3.bf16.msra.mxu1 %v5368_v19 }
 0x3ac   : > { %3911 = vmatprep.subr.bf16.mxu1 %v4954_v21 }
 0x3af   : > { %3912 = vmatpush3.bf16.msra.mxu1 %v5372_v25 }
 0x3b0   : > { %3913 = vmatprep.subr.bf16.mxu1 %v4954_v21 }
 0x3b3   : > { %3914 = vmatpush3.bf16.msra.mxu1 %v5376_v26 }
 0x3b4   : > { %3915 = vmatprep.subr.bf16.mxu1 %v4954_v21 }
 0x3b7   : > { %3916 = vmatpush3.bf16.msra.mxu1 %v5380_v27 }
 0x3b8   : > { %3917 = vmatprep.subr.bf16.mxu1 %v4954_v21 }
 0x3bb   : > { %3918 = vmatpush3.bf16.msra.mxu1 %v5389_v45 }
 0x3bc   : > { %3919 = vmatprep.subr.bf16.mxu1 %v4954_v21 }
 0x3bf   : > { %3920 = vmatpush3.bf16.msra.mxu1 %v5393_v46 }
 0x3c0   : > { %1535 = vmatprep.subr.bf16.mxu1 %v5192_v1  ;;  %v5412_v1 = vld [vmem:[#allocation6 + $0x18] sm:$0xff]  }
 0x462   : > { %v1169_v28 = vpop.f32.mrf.mxu1 }
 0x463   : > { %v1176_v41 = vsub.f32 %v5245_v17, %v1169_v28 }
 0x464   : > { %v3883_v29 = vpop.f32.mrf.mxu1 }
 0x466   : > { %v1172_v40 = vpop.f32.mrf.mxu1 }
 0x467   : > { %v1177_v42 = vsub.f32 %v5247_v18, %v1172_v40 }
 0x468   : > { %v3884_v43 = vpop.f32.mrf.mxu1 }
 0x469   : > { %v1178_v44 = vpack.c.bf16 %v1177_v42, %v1176_v41 }
 0x46b   : > { %3902 = vmatmul.mubr.bf16.vlgmr.msra.gmra.mxu0 %v1178_v44 }
 0x46c   : > { %3941 = vmatprep.mubr.msk.bf16.mxu0 %vm4955_vm0, %v4954_v21  ;;  %3926 = vmatpush3.bf16.msra.mxu0 %v5397_v47 }
 0x46d   : > { %3927 = vmatprep.subr.bf16.mxu0 %v4954_v21 }
 0x470   : > { %3928 = vmatpush3.bf16.msra.mxu0 %v5400_v48 }
 0x471   : > { %3929 = vmatprep.subr.bf16.mxu0 %v4954_v21 }
 0x474   : > { %3930 = vmatpush3.bf16.msra.mxu0 %v5404_v49 }
 0x475   : > { %3931 = vmatprep.subr.bf16.mxu0 %v4954_v21 }
 0x478   : > { %3932 = vmatpush3.bf16.msra.mxu0 %v5408_v50 }
 0x479   : > { %3933 = vmatprep.subr.bf16.mxu0 %v4954_v21 }
 0x47c   : > { %3934 = vmatpush3.bf16.msra.mxu0 %v5412_v1 }
 0x47d   : > { %3935 = vmatprep.subr.bf16.mxu0 %v4954_v21 }
 0x52b   : > { %v5417_v51 = vpop.f32.mrf.mxu0 }
 0x52c   : > { %v1268_v54 = vmax.f32 %v5417_v51, 0.0 }
 0x52d   : > { %v3903_v52 = vpop.f32.mrf.mxu0 }
 0x52f   : > { %v5419_v53 = vpop.f32.mrf.mxu0 }
 0x530   : > { %v1269_v55 = vmax.f32 %v5419_v53, 0.0 }
 0x531   : > { %v3904_v56 = vpop.f32.mrf.mxu0 }
 0x532   : > { %v1270_v57 = vpack.c.bf16 %v1269_v55, %v1268_v54 }
 0x534   : > { %3922 = vmatmul.mubr.bf16.vlgmr.msra.gmra.mxu1 %v1270_v57 }
 0x535   : > { %1536 = vmatpush1.bf16.msra.mxu1 %v5194_v2  ;;  %1567 = vmatprep.mubr.bf16.mxu1 %v4953_v0  ;;  %v5444_v2 = vld [vmem:[#allocation6 + $0x10] sm:$0xff]  }
 0x536   : > { %1537 = vmatprep.subr.bf16.mxu1 %v5197_v3  ;;  %3936 = vmatpush3.bf16.msra.mxu0 %v5444_v2  ;;  %v5448_v3 = vld [vmem:[#allocation6 + $0x8] sm:$0xff]  }
 0x537   : > { %3937 = vmatprep.subr.bf16.mxu0 %v4954_v21 }
 0x539   : > { %1538 = vmatpush1.bf16.msra.mxu1 %v5201_v4  ;;  %v5452_v4 = vld [vmem:[#allocation6] sm:$0xff]  }
 0x53a   : > { %1539 = vmatprep.subr.bf16.mxu1 %v5204_v5  ;;  %3938 = vmatpush3.bf16.msra.mxu0 %v5448_v3  ;;  %v5459_v5 = vld [vmem:[%s6091_s5] ss:$0 sm:$0xff] }
 0x53b   : > { %3939 = vmatprep.subr.bf16.mxu0 %v4954_v21 }
 0x53d   : > { %1540 = vmatpush1.bf16.msra.mxu1 %v5210_v6 }
 0x53e   : > { %1541 = vmatprep.subr.bf16.mxu1 %v5213_v7  ;;  %3940 = vmatpush3.bf16.msra.mxu0 %v5452_v4 }
 0x53f   : > { %3945 = vmatprep.subr.bf16.mxu0 %v4954_v21 }
 0x541   : > { %1542 = vmatpush1.bf16.msra.mxu1 %v5215_v8 }
 0x542   : > { %1543 = vmatprep.subr.bf16.mxu1 %v5219_v9 }
 0x545   : > { %1544 = vmatpush1.bf16.msra.mxu1 %v5222_v10 }
 0x546   : > { %1545 = vmatprep.subr.bf16.mxu1 %v5224_v11 }
 0x549   : > { %1546 = vmatpush1.bf16.msra.mxu1 %v5228_v12 }
 0x54a   : > { %1547 = vmatprep.subr.bf16.mxu1 %v5230_v13 }
 0x54d   : > { %1548 = vmatpush1.bf16.msra.mxu1 %v5234_v14 }
 0x54e   : > { %1549 = vmatprep.subr.bf16.mxu1 %v5236_v15  ;;  %v5484_v15 = vld [vmem:[%s6093_s7] ss:$0 sm:$0xff] }
 0x551   : > { %1550 = vmatpush1.bf16.msra.mxu1 %v5243_v16 }
 0x552   : > { %3965 = vmatprep.subr.bf16.mxu1 %v4954_v21 }
 0x5f4   : > { %v1359_v6 = vpop.f32.mrf.mxu1 }
 0x5f5   : > { %v1360_v8 = vadd.f32 %v5459_v5, %v1359_v6 }
 0x5f6   : > { %v3923_v7 = vpop.f32.mrf.mxu1 }
 0x5f7   : > { %v1366_v12 = vmax.f32 %v1360_v8, 0.0 }
 0x5f8   : > { %v1362_v9 = vpop.f32.mrf.mxu1 }
 0x5f9   : > { %v1363_v10 = vadd.f32 %v5459_v5, %v1362_v9 }
 0x5fa   : > { %v3924_v11 = vpop.f32.mrf.mxu1 }
 0x5fb   : > { %v1367_v13 = vmax.f32 %v1363_v10, 0.0 }
 0x5fd   : > { %v1368_v14 = vpack.c.bf16 %v1367_v13, %v1366_v12 }
 0x5ff   : > { %3942 = vmatmul.mubr.bf16.vlgmr.msra.gmra.mxu0 %v1368_v14 }
 0x600   : > { %3946 = vmatpush3.bf16.msra.mxu0 %v5254_v20  ;;  %3961 = vmatprep.mubr.msk.bf16.mxu0 %vm4955_vm0, %v4954_v21 }
 0x601   : > { %3947 = vmatprep.subr.bf16.mxu0 %v4954_v21 }
 0x604   : > { %3948 = vmatpush3.bf16.msra.mxu0 %v5259_v22 }
 0x605   : > { %3949 = vmatprep.subr.bf16.mxu0 %v4954_v21 }
 0x608   : > { %3950 = vmatpush3.bf16.msra.mxu0 %v5263_v23 }
 0x609   : > { %3951 = vmatprep.subr.bf16.mxu0 %v4954_v21 }
 0x60c   : > { %3952 = vmatpush3.bf16.msra.mxu0 %v5267_v24 }
 0x60d   : > { %3953 = vmatprep.subr.bf16.mxu0 %v4954_v21 }
 0x610   : > { %3954 = vmatpush3.bf16.msra.mxu0 %v5272_v33 }
 0x611   : > { %3955 = vmatprep.subr.bf16.mxu0 %v4954_v21 }
 0x614   : > { %3956 = vmatpush3.bf16.msra.mxu0 %v5276_v34 }
 0x615   : > { %3957 = vmatprep.subr.bf16.mxu0 %v4954_v21 }
 0x618   : > { %3958 = vmatpush3.bf16.msra.mxu0 %v5280_v35 }
 0x619   : > { %3959 = vmatprep.subr.bf16.mxu0 %v4954_v21 }
 0x61c   : > { %3960 = vmatpush3.bf16.msra.mxu0 %v5287_v36 }
 0x61d   : > { %3997 = vmatprep.subr.bf16.mxu0 %v4954_v21 }
 0x6bf   : > { %v1457_v16 = vpop.f32.mrf.mxu0 }
 0x6c0   : > { %v1458_v58 = vadd.f32 %v5484_v15, %v1457_v16 }
 0x6c1   : > { %v3943_v59 = vpop.f32.mrf.mxu0 }
 0x6c2   : > { %v1464_v28 = vadd.f32 %v1458_v58, %v1268_v54  ;;  %v5501_v58 = vld [vmem:[%s6095_s9] ss:$0 sm:$0xff] }
 0x6c3   : > { %v1460_v29 = vpop.f32.mrf.mxu0 }
 0x6c4   : > { %v1461_v40 = vadd.f32 %v5484_v15, %v1460_v29  ;;  %1466 = vadd.xlane.f32.xlu0 %v1464_v28 }
 0x6c5   : > { %v3944_v41 = vpop.f32.mrf.mxu0 }
 0x6c6   : > { %v1465_v42 = vadd.f32 %v1461_v40, %v1269_v55  ;;  %v5495_v55 = vld [vmem:[%s6094_s8] ss:$0 sm:$0xff] }
 0x6c8   : > { %1468 = vadd.xlane.f32.xlu1 %v1465_v42 }
 0x74d   : > { %v1467_v43 = vpop.xlane.xlu0 %1466 }
 0x74e   : > { %v1471_v44 = vmul.f32 0.0078125, %v1467_v43 }
 0x750   : > { %v1473_v52 = vsub.f32 %v1464_v28, %v1471_v44 }
 0x751   : > { %v1469_v56 = vpop.xlane.xlu1 %1468 }
 0x752   : > { %v1472_v57 = vmul.f32 0.0078125, %v1469_v56  ;;  %v1475_v6 = vmul.f32 %v1473_v52, %v1473_v52 }
 0x754   : > { %v1474_v7 = vsub.f32 %v1465_v42, %v1472_v57  ;;  %1477 = vadd.xlane.f32.xlu0 %v1475_v6 }
 0x756   : > { %v1476_v8 = vmul.f32 %v1474_v7, %v1474_v7 }
 0x758   : > { %1479 = vadd.xlane.f32.xlu1 %v1476_v8 }
 0x7dd   : > { %v1478_v51 = vpop.xlane.xlu0 %1477 }
 0x7de   : > { %v1481_v54 = vmul.f32 0.0078125, %v1478_v51 }
 0x7e0   : > { %v1483_v9 = vadd.f32 1e-05, %v1481_v54 }
 0x7e1   : > { %v1480_v10 = vpop.xlane.xlu1 %1479 }
 0x7e2   : > { %4609 = vrsqrt.f32 %v1483_v9  ;;  %v1482_v11 = vmul.f32 0.0078125, %v1480_v10 }
 0x7e4   : > { %v1484_v12 = vadd.f32 1e-05, %v1482_v11 }
 0x7e6   : > { %4611 = vrsqrt.f32 %v1484_v12 }
 0x7ef   : > { %v4610_v53 = vpop.eup %4609 }
 0x7f0   : > { %v1487_v13 = vmul.f32 %v4610_v53, %v1473_v52 }
 0x7f2   : > { %v1495_v14 = vmul.f32 %v5495_v55, %v1487_v13 }
 0x7f3   : > { %v4612_v16 = vpop.eup %4611 }
 0x7f4   : > { %v1488_v59 = vmul.f32 %v4612_v16, %v1474_v7  ;;  %v1503_v29 = vadd.f32 %v5501_v58, %v1495_v14 }
 0x7f6   : > { %v1496_v28 = vmul.f32 %v5495_v55, %v1488_v59  ;;  %v1505_v41 = vadd.f32 %v1503_v29, %v5245_v17 }
 0x7f8   : > { %v1504_v40 = vadd.f32 %v5501_v58, %v1496_v28 }
 0x7fa   : > { %v1506_v42 = vadd.f32 %v1504_v40, %v5247_v18 }
 0x7fc   : > { %v1507_v43 = vadd.f32 %v1506_v42, %v1505_v41 }
 0x7fe   : > { %v1508_v44 = vrot.slane %v1507_v43, 4 }
 0x800   : > { %v1509_v52 = vadd.f32 %v1508_v44, %v1507_v43 }
 0x802   : > { %v1510_v56 = vrot.slane %v1509_v52, 2 }
 0x804   : > { %v1511_v57 = vadd.f32 %v1510_v56, %v1509_v52 }
 0x806   : > { %v1512_v6 = vrot.slane %v1511_v57, 1 }
 0x808   : > { %v1513_v8 = vadd.f32 %v1512_v6, %v1511_v57 }
 0x80a   : > { %v1515_v51 = vmul.f32 0.0625, %v1513_v8 }
 0x80c   : > { %v1516_v54 = vsub.f32 %v1505_v41, %v1515_v51  ;;  %v1517_v7 = vsub.f32 %v1506_v42, %v1515_v51 }
 0x80e   : > { %v1518_v9 = vmul.f32 %v1516_v54, %v1516_v54  ;;  %v1519_v10 = vmul.f32 %v1517_v7, %v1517_v7 }
 0x810   : > { %v1520_v11 = vadd.f32 %v1519_v10, %v1518_v9 }
 0x812   : > { %v1521_v12 = vrot.slane %v1520_v11, 4 }
 0x814   : > { %v1522_v53 = vadd.f32 %v1521_v12, %v1520_v11 }
 0x816   : > { %v1523_v13 = vrot.slane %v1522_v53, 2 }
 0x818   : > { %v1524_v14 = vadd.f32 %v1523_v13, %v1522_v53 }
 0x81a   : > { %v1525_v17 = vrot.slane %v1524_v14, 1 }
 0x81c   : > { %v1526_v16 = vadd.f32 %v1525_v17, %v1524_v14 }
 0x81e   : > { %v1527_v18 = vmul.f32 0.0625, %v1526_v16 }
 0x820   : > { %v1528_v59 = vadd.f32 1e-05, %v1527_v18 }
 0x822   : > { %4613 = vrsqrt.f32 %v1528_v59 }
 0x82f   : > { %v4614_v28 = vpop.eup %4613 }
 0x830   : > { %v1530_v29 = vmul.f32 %v4614_v28, %v1516_v54  ;;  %v1531_v40 = vmul.f32 %v4614_v28, %v1517_v7 }
 0x832   : > { %v5508_v43 = vmax.f32 %v1530_v29, 0.0  ;;  %v5510_v44 = vmax.f32 %v1531_v40, 0.0 }
 0x834   : > { %v1534_v41 = vpack.c.bf16 %v5510_v44, %v5508_v43 }
 0x836   : > { %1568 = vmatmul.mubr.bf16.vlgmr.msra.gmra.mxu1 %v1534_v41  ;;  %3962 = vmatmul.mubr.bf16.vlgmr.msra.gmra.mxu0 %v1534_v41 }
 0x837   : > { %3967 = vmatprep.mubr.msk.bf16.mxu1 %vm4955_vm0, %v4954_v21  ;;  %3998 = vmatpush3.bf16.msra.mxu0 %v5361_v62 }
 0x838   : > { %3999 = vmatprep.subr.bf16.mxu0 %v4954_v21  ;;  %4013 = vmatprep.mubr.msk.bf16.mxu0 %vm4955_vm0, %v4954_v21 }
 0x83b   : > { %4000 = vmatpush3.bf16.msra.mxu0 %v5364_v63 }
 0x83c   : > { %4001 = vmatprep.subr.bf16.mxu0 %v4954_v21 }
 0x83f   : > { %4002 = vmatpush3.bf16.msra.mxu0 %v5368_v19 }
 0x840   : > { %4003 = vmatprep.subr.bf16.mxu0 %v4954_v21 }
 0x843   : > { %4004 = vmatpush3.bf16.msra.mxu0 %v5372_v25 }
 0x844   : > { %4005 = vmatprep.subr.bf16.mxu0 %v4954_v21 }
 0x847   : > { %4006 = vmatpush3.bf16.msra.mxu0 %v5376_v26 }
 0x848   : > { %4007 = vmatprep.subr.bf16.mxu0 %v4954_v21 }
 0x84b   : > { %4008 = vmatpush3.bf16.msra.mxu0 %v5380_v27 }
 0x84c   : > { %4009 = vmatprep.subr.bf16.mxu0 %v4954_v21 }
 0x84f   : > { %4010 = vmatpush3.bf16.msra.mxu0 %v5389_v45 }
 0x850   : > { %4011 = vmatprep.subr.bf16.mxu0 %v4954_v21 }
 0x853   : > { %4012 = vmatpush3.bf16.msra.mxu0 %v5393_v46 }
 0x8f6   : > { %v1569_v42 = vpop.f32.mrf.mxu1  ;;  %v1612_v52 = vpop.f32.mrf.mxu0 }
 0x8f7   : > { %v1619_v56 = vmul.f32 %v1569_v42, %v1569_v42 }
 0x8f8   : > { %v1571_v57 = vpop.f32.mrf.mxu1  ;;  %v3963_v6 = vpop.f32.mrf.mxu0 }
 0x8f9   : > { %1621 = vadd.xlane.f32.xlu0 %v1619_v56  ;;  %v1631_v7 = vmul.f32 %v1571_v57, %v1571_v57 }
 0x8fa   : > { %v1573_v8 = vpop.f32.mrf.mxu1  ;;  %v1615_v51 = vpop.f32.mrf.mxu0 }
 0x8fb   : > { %v1714_v54 = vpack.c.bf16 %v1615_v51, %v1612_v52  ;;  %v1620_v9 = vmul.f32 %v1573_v8, %v1573_v8 }
 0x8fc   : > { %v1575_v10 = vpop.f32.mrf.mxu1  ;;  %v3964_v11 = vpop.f32.mrf.mxu0 }
 0x8fd   : > { %1633 = vadd.xlane.f32.xlu0 %v1631_v7  ;;  %1623 = vadd.xlane.f32.xlu1 %v1620_v9  ;;  %v1632_v12 = vmul.f32 %v1575_v10, %v1575_v10 }
 0x901   : > { %1635 = vadd.xlane.f32.xlu1 %v1632_v12 }
 0x982   : > { %v1622_v53 = vpop.xlane.xlu0 %1621 }
 0x983   : > { %v1625_v13 = vmax.f32 %v1622_v53, 1e-24 }
 0x985   : > { %4615 = vrsqrt.f32 %v1625_v13 }
 0x986   : > { %v1624_v14 = vpop.xlane.xlu1 %1623  ;;  %v1634_v16 = vpop.xlane.xlu0 %1633 }
 0x987   : > { %v1626_v17 = vmax.f32 %v1624_v14, 1e-24  ;;  %v1637_v59 = vmax.f32 %v1634_v16, 1e-24 }
 0x989   : > { %4617 = vrsqrt.f32 %v1626_v17 }
 0x98a   : > { %v1636_v18 = vpop.xlane.xlu1 %1635 }
 0x98b   : > { %v1638_v28 = vmax.f32 %v1636_v18, 1e-24 }
 0x98d   : > { %4619 = vrsqrt.f32 %v1638_v28 }
 0x98e   : > { %4621 = vrsqrt.f32 %v1637_v59 }
 0x992   : > { %v4616_v29 = vpop.eup %4615 }
 0x993   : > { %v1629_v41 = vmul.f32 %v4616_v29, %v1569_v42 }
 0x996   : > { %v4618_v40 = vpop.eup %4617 }
 0x997   : > { %v1630_v52 = vmul.f32 %v4618_v40, %v1573_v8 }
 0x999   : > { %v1644_v6 = vpack.c.bf16 %v1630_v52, %v1629_v41 }
 0x99a   : > { %v4620_v56 = vpop.eup %4619 }
 0x99b   : > { %v4622_v51 = vpop.eup %4621  ;;  %3966 = vmatpush3.bf16.xpose.msra.mxu1 %v1644_v6  ;;  %v1642_v7 = vmul.f32 %v4620_v56, %v1575_v10 }
 0x99c   : > { %3971 = vmatprep.subr.bf16.mxu1 %v4954_v21  ;;  %v1641_v9 = vmul.f32 %v4622_v51, %v1571_v57 }
 0x99e   : > { %v1643_v11 = vpack.c.bf16 %v1642_v7, %v1641_v9 }
 0x9a2   : > { %3968 = vmatmul.mubr.bf16.vlgmr.msra.gmra.mxu1 %v1643_v11 }
 0x9a3   : > { %3972 = vmatpush3.bf16.msra.mxu1 %v1714_v54  ;;  %3973 = vmatprep.mubr.msk.bf16.mxu1 %vm4955_vm0, %v4954_v21 }
 0x9a4   : > { %3977 = vmatprep.subr.bf16.mxu1 %v4954_v21 }
 0xa62   : > { %v1679_v12 = vpop.f32.mrf.mxu1 }
 0xa63   : > { %v1686_v53 = vmul.f32 1.442695, %v1679_v12 }
 0xa64   : > { %v3969_v42 = vpop.f32.mrf.mxu1 }
 0xa65   : > { %4623 = vpow2.f32 %v1686_v53 }
 0xa66   : > { %v1682_v8 = vpop.f32.mrf.mxu1 }
 0xa67   : > { %v1688_v13 = vmul.f32 1.442695, %v1682_v8 }
 0xa68   : > { %v3970_v14 = vpop.f32.mrf.mxu1 }
 0xa69   : > { %4625 = vpow2.f32 %v1688_v13 }
 0xa72   : > { %v4624_v10 = vpop.eup %4623 }
 0xa73   : > { %v1690_v17 = vsel %vm1106_vm1, %v4624_v10, 0.0 }
 0xa74   : > { %1691 = vadd.xlane.f32.xlu0 %v1690_v17 }
 0xa76   : > { %v4626_v57 = vpop.eup %4625 }
 0xa77   : > { %v1693_v54 = vsel %vm1106_vm1, %v4626_v57, 0.0 }
 0xa78   : > { %1694 = vadd.xlane.f32.xlu1 %v1693_v54 }
 0xafd   : > { %v1692_v16 = vpop.xlane.xlu0 %1691 }
 0xafe   : > { %4627 = vrcp.f32 %v1692_v16 }
 0xb01   : > { %v1695_v18 = vpop.xlane.xlu1 %1694 }
 0xb02   : > { %4629 = vrcp.f32 %v1695_v18 }
 0xb0b   : > { %v4628_v59 = vpop.eup %4627 }
 0xb0c   : > { %v1698_v28 = vmul.f32 %v4628_v59, %v4624_v10 }
 0xb0e   : > { %v1700_v41 = vsel %vm1106_vm1, %v1698_v28, 0.0 }
 0xb0f   : > { %v4630_v29 = vpop.eup %4629 }
 0xb10   : > { %v1699_v40 = vmul.f32 %v4630_v29, %v4626_v57 }
 0xb12   : > { %v1701_v52 = vsel %vm1106_vm1, %v1699_v40, 0.0 }
 0xb13   : > { %v1702_v56 = vadd.f32 %v1701_v52, %v1700_v41 }
 0xb15   : > { %v1703_v6 = vrot.slane %v1702_v56, 4 }
 0xb17   : > { %v1704_v51 = vadd.f32 %v1703_v6, %v1702_v56 }
 0xb19   : > { %v1705_v7 = vrot.slane %v1704_v51, 2 }
 0xb1b   : > { %v1706_v9 = vadd.f32 %v1705_v7, %v1704_v51 }
 0xb1d   : > { %v1707_v11 = vrot.slane %v1706_v9, 1 }
 0xb1f   : > { %v1708_v12 = vadd.f32 %v1707_v11, %v1706_v9 }
 0xb21   : > { %v1709_v53 = vadd.f32 1e-09, %v1708_v12 }
 0xb23   : > { %4631 = vrcp.f32 %v1709_v53 }
 0xb30   : > { %v4632_v42 = vpop.eup %4631 }
 0xb31   : > { %v1711_v8 = vmul.f32 %v4632_v42, %v1698_v28  ;;  %v1712_v13 = vmul.f32 %v4632_v42, %v1699_v40 }
 0xb33   : > { %v1713_v14 = vpack.c.bf16 %v1712_v13, %v1711_v8  ;;  %v4537_v8 = vld [vmem:[#allocation7 + $0x74] ss:$8 sps:$4 sm:$0xff]   ;;  %v4540_v13 = vld [vmem:[#allocation7 + $0x64] ss:$8 sps:$4 sm:$0xff]  }
 0xb34   : > { %2044 = vmatprep.subr.bf16.mxu0 %v4537_v8 }
 0xb35   : > { %3974 = vmatmul.mubr.msk.bf16.vlgmr.msra.gmra.mxu1 %vm1106_vm1, %v1713_v14  ;;  %v4541_v14 = vld [vmem:[#allocation7 + $0x50] ss:$8 sps:$4 sm:$0xff]  }
 0xb36   : > { %3978 = vmatpush3.bf16.msra.mxu1 %v5303_v30  ;;  %3993 = vmatprep.mubr.msk.bf16.mxu1 %vm4955_vm0, %v4954_v21 }
 0xb37   : > { %3979 = vmatprep.subr.bf16.mxu1 %v4954_v21 }
 0xb3a   : > { %3980 = vmatpush3.bf16.msra.mxu1 %v5309_v31 }
 0xb3b   : > { %3981 = vmatprep.subr.bf16.mxu1 %v4954_v21 }
 0xb3e   : > { %3982 = vmatpush3.bf16.msra.mxu1 %v5316_v32 }
 0xb3f   : > { %3983 = vmatprep.subr.bf16.mxu1 %v4954_v21 }
 0xb42   : > { %3984 = vmatpush3.bf16.msra.mxu1 %v5323_v37 }
 0xb43   : > { %3985 = vmatprep.subr.bf16.mxu1 %v4954_v21 }
 0xb46   : > { %3986 = vmatpush3.bf16.msra.mxu1 %v5330_v38 }
 0xb47   : > { %3987 = vmatprep.subr.bf16.mxu1 %v4954_v21 }
 0xb4a   : > { %3988 = vmatpush3.bf16.msra.mxu1 %v5337_v39 }
 0xb4b   : > { %3989 = vmatprep.subr.bf16.mxu1 %v4954_v21 }
 0xb4e   : > { %3990 = vmatpush3.bf16.msra.mxu1 %v5350_v60 }
 0xb4f   : > { %3991 = vmatprep.subr.bf16.mxu1 %v4954_v21 }
 0xb52   : > { %3992 = vmatpush3.bf16.msra.mxu1 %v5357_v61 }
 0xb53   : > { %4017 = vmatprep.subr.bf16.mxu1 %v4954_v21 }
 0xbf5   : > { %v1752_v30 = vpop.f32.mrf.mxu1 }
 0xbf6   : > { %v1759_v37 = vsub.f32 %v5508_v43, %v1752_v30  ;;  %v4546_v30 = vld [vmem:[#allocation7 + $0x44] ss:$8 sps:$4 sm:$0xff]  }
 0xbf7   : > { %v3975_v31 = vpop.f32.mrf.mxu1 }
 0xbf8   : > { %v4544_v31 = vld [vmem:[#allocation7 + $0x40] ss:$8 sps:$4 sm:$0xff]  }
 0xbf9   : > { %v1755_v32 = vpop.f32.mrf.mxu1 }
 0xbfa   : > { %v1760_v38 = vsub.f32 %v5510_v44, %v1755_v32  ;;  %v4549_v32 = vld [vmem:[#allocation7 + $0x34] ss:$8 sps:$4 sm:$0xff]  }
 0xbfb   : > { %v3976_v10 = vpop.f32.mrf.mxu1 }
 0xbfc   : > { %v1761_v17 = vpack.c.bf16 %v1760_v38, %v1759_v37  ;;  %v4547_v37 = vld [vmem:[#allocation7 + $0x30] ss:$8 sps:$4 sm:$0xff]   ;;  %v4552_v38 = vld [vmem:[#allocation7 + $0x24] ss:$8 sps:$4 sm:$0xff]   ;;  %v4550_v10 = vld [vmem:[#allocation7 + $0x20] ss:$8 sps:$4 sm:$0xff]  }
 0xbfe   : > { %3994 = vmatmul.mubr.bf16.vlgmr.msra.gmra.mxu1 %v1761_v17  ;;  %v4555_v17 = vld [vmem:[#allocation7 + $0x14] ss:$8 sps:$4 sm:$0xff]  }
 0xbff   : > { %4018 = vmatpush3.bf16.msra.mxu1 %v5397_v47  ;;  %4033 = vmatprep.mubr.msk.bf16.mxu1 %vm4955_vm0, %v4954_v21 }
 0xc00   : > { %4019 = vmatprep.subr.bf16.mxu1 %v4954_v21 }
 0xc03   : > { %4020 = vmatpush3.bf16.msra.mxu1 %v5400_v48 }
 0xc04   : > { %4021 = vmatprep.subr.bf16.mxu1 %v4954_v21 }
 0xc07   : > { %4022 = vmatpush3.bf16.msra.mxu1 %v5404_v49 }
 0xc08   : > { %4023 = vmatprep.subr.bf16.mxu1 %v4954_v21 }
 0xc0b   : > { %4024 = vmatpush3.bf16.msra.mxu1 %v5408_v50 }
 0xc0c   : > { %4025 = vmatprep.subr.bf16.mxu1 %v4954_v21 }
 0xc0f   : > { %4026 = vmatpush3.bf16.msra.mxu1 %v5412_v1 }
 0xc10   : > { %4027 = vmatprep.subr.bf16.mxu1 %v4954_v21 }
 0xc13   : > { %4028 = vmatpush3.bf16.msra.mxu1 %v5444_v2 }
 0xc14   : > { %4029 = vmatprep.subr.bf16.mxu1 %v4954_v21 }
 0xc17   : > { %4030 = vmatpush3.bf16.msra.mxu1 %v5448_v3 }
 0xc18   : > { %4031 = vmatprep.subr.bf16.mxu1 %v4954_v21 }
 0xc1b   : > { %4032 = vmatpush3.bf16.msra.mxu1 %v5452_v4 }
 0xc1c   : > { %4037 = vmatprep.subr.bf16.mxu1 %v4954_v21 }
 0xcbe   : > { %v1796_v39 = vpop.f32.mrf.mxu1 }
 0xcbf   : > { %v1803_v16 = vmax.f32 %v1796_v39, 0.0  ;;  %v4553_v39 = vld [vmem:[#allocation7 + $0x10] ss:$8 sps:$4 sm:$0xff]  }
 0xcc0   : > { %v3995_v57 = vpop.f32.mrf.mxu1 }
 0xcc1   : > { %v4558_v57 = vld [vmem:[#allocation7 + $0x4] ss:$8 sps:$4 sm:$0xff]  }
 0xcc2   : > { %v1799_v54 = vpop.f32.mrf.mxu1 }
 0xcc3   : > { %v1804_v18 = vmax.f32 %v1799_v54, 0.0  ;;  %v4556_v54 = vld [vmem:[#allocation7] ss:$8 sps:$4 sm:$0xff]  }
 0xcc4   : > { %v3996_v59 = vpop.f32.mrf.mxu1 }
 0xcc5   : > { %v1805_v28 = vpack.c.bf16 %v1804_v18, %v1803_v16 }
 0xcc7   : > { %4014 = vmatmul.mubr.bf16.vlgmr.msra.gmra.mxu0 %v1805_v28 }
 0xcc8   : > { %2076 = vmatprep.mubr.bf16.mxu0 %v4953_v0 }
 0xd87   : > { %v1840_v29 = vpop.f32.mrf.mxu0 }
 0xd88   : > { %v1841_v41 = vadd.f32 %v5459_v5, %v1840_v29 }
 0xd89   : > { %v4015_v40 = vpop.f32.mrf.mxu0 }
 0xd8a   : > { %v1847_v51 = vmax.f32 %v1841_v41, 0.0 }
 0xd8b   : > { %v1843_v52 = vpop.f32.mrf.mxu0 }
 0xd8c   : > { %v1844_v56 = vadd.f32 %v5459_v5, %v1843_v52 }
 0xd8d   : > { %v4016_v6 = vpop.f32.mrf.mxu0 }
 0xd8e   : > { %v1848_v7 = vmax.f32 %v1844_v56, 0.0 }
 0xd90   : > { %v1849_v9 = vpack.c.bf16 %v1848_v7, %v1847_v51 }
 0xd92   : > { %4034 = vmatmul.mubr.bf16.vlgmr.msra.gmra.mxu1 %v1849_v9 }
 0xd93   : > { %4038 = vmatpush3.bf16.msra.mxu1 %v5254_v20  ;;  %4053 = vmatprep.mubr.msk.bf16.mxu1 %vm4955_vm0, %v4954_v21 }
 0xd94   : > { %4039 = vmatprep.subr.bf16.mxu1 %v4954_v21 }
 0xd97   : > { %4040 = vmatpush3.bf16.msra.mxu1 %v5259_v22 }
 0xd98   : > { %4041 = vmatprep.subr.bf16.mxu1 %v4954_v21 }
 0xd9b   : > { %4042 = vmatpush3.bf16.msra.mxu1 %v5263_v23 }
 0xd9c   : > { %4043 = vmatprep.subr.bf16.mxu1 %v4954_v21 }
 0xd9f   : > { %4044 = vmatpush3.bf16.msra.mxu1 %v5267_v24 }
 0xda0   : > { %4045 = vmatprep.subr.bf16.mxu1 %v4954_v21 }
 0xda3   : > { %4046 = vmatpush3.bf16.msra.mxu1 %v5272_v33 }
 0xda4   : > { %4047 = vmatprep.subr.bf16.mxu1 %v4954_v21 }
 0xda7   : > { %4048 = vmatpush3.bf16.msra.mxu1 %v5276_v34 }
 0xda8   : > { %4049 = vmatprep.subr.bf16.mxu1 %v4954_v21 }
 0xdab   : > { %4050 = vmatpush3.bf16.msra.mxu1 %v5280_v35  ;;  %v5609_v35 = vld [vmem:[%s730_s1] sm:$0x3] }
 0xdac   : > { %4051 = vmatprep.subr.bf16.mxu1 %v4954_v21 }
 0xdaf   : > { %4052 = vmatpush3.bf16.msra.mxu1 %v5287_v36  ;;  %v2170_v36 = vpack.c.bf16 %v5609_v35, %v5609_v35 }
 0xdb0   : > { %4077 = vmatprep.subr.bf16.mxu1 %v4954_v21 }
 0xdb2   : > { %4054 = vmatmul.mubr.bf16.vlgmr.msra.gmra.mxu1 %v2170_v36 }
 0xdb3   : > { %4078 = vmatpush3.bf16.msra.mxu1 %v5361_v62  ;;  %4093 = vmatprep.mubr.msk.bf16.mxu1 %vm4955_vm0, %v4954_v21 }
 0xdb4   : > { %4079 = vmatprep.subr.bf16.mxu1 %v4954_v21 }
 0xdb7   : > { %4080 = vmatpush3.bf16.msra.mxu1 %v5364_v63 }
 0xdb8   : > { %4081 = vmatprep.subr.bf16.mxu1 %v4954_v21 }
 0xdbb   : > { %4082 = vmatpush3.bf16.msra.mxu1 %v5368_v19 }
 0xdbc   : > { %4083 = vmatprep.subr.bf16.mxu1 %v4954_v21 }
 0xdbf   : > { %4084 = vmatpush3.bf16.msra.mxu1 %v5372_v25 }
 0xdc0   : > { %4085 = vmatprep.subr.bf16.mxu1 %v4954_v21 }
 0xdc3   : > { %4086 = vmatpush3.bf16.msra.mxu1 %v5376_v26 }
 0xdc4   : > { %4087 = vmatprep.subr.bf16.mxu1 %v4954_v21 }
 0xdc7   : > { %4088 = vmatpush3.bf16.msra.mxu1 %v5380_v27  ;;  %v4535_v27 = vld [vmem:[#allocation7 + $0x70] ss:$8 sps:$4 sm:$0xff]  }
 0xdc8   : > { %4089 = vmatprep.subr.bf16.mxu1 %v4954_v21  ;;  %2045 = vmatpush1.bf16.msra.mxu0 %v4535_v27 }
 0xdc9   : > { %2046 = vmatprep.subr.bf16.mxu0 %v4540_v13 }
 0xdcb   : > { %4090 = vmatpush3.bf16.msra.mxu1 %v5389_v45  ;;  %v4538_v45 = vld [vmem:[#allocation7 + $0x60] ss:$8 sps:$4 sm:$0xff]  }
 0xdcc   : > { %4091 = vmatprep.subr.bf16.mxu1 %v4954_v21  ;;  %2047 = vmatpush1.bf16.msra.mxu0 %v4538_v45 }
 0xdcf   : > { %4092 = vmatpush3.bf16.msra.mxu1 %v5393_v46  ;;  %v4543_v46 = vld [vmem:[#allocation7 + $0x54] ss:$8 sps:$4 sm:$0xff]  }
 0xdd0   : > { %4117 = vmatprep.subr.bf16.mxu1 %v4954_v21  ;;  %2048 = vmatprep.subr.bf16.mxu0 %v4543_v46 }
 0xdd1   : > { %2049 = vmatpush1.bf16.msra.mxu0 %v4541_v14 }
 0xdd2   : > { %2050 = vmatprep.subr.bf16.mxu0 %v4546_v30 }
 0xdd5   : > { %2051 = vmatpush1.bf16.msra.mxu0 %v4544_v31 }
 0xdd6   : > { %2052 = vmatprep.subr.bf16.mxu0 %v4549_v32 }
 0xdd9   : > { %2053 = vmatpush1.bf16.msra.mxu0 %v4547_v37 }
 0xdda   : > { %2054 = vmatprep.subr.bf16.mxu0 %v4552_v38 }
 0xddd   : > { %2055 = vmatpush1.bf16.msra.mxu0 %v4550_v10 }
 0xdde   : > { %2056 = vmatprep.subr.bf16.mxu0 %v4555_v17 }
 0xde1   : > { %2057 = vmatpush1.bf16.msra.mxu0 %v4553_v39 }
 0xde2   : > { %2058 = vmatprep.subr.bf16.mxu0 %v4558_v57 }
 0xde5   : > { %2059 = vmatpush1.bf16.msra.mxu0 %v4556_v54  ;;  %v5643_v54 = vld [vmem:[%s6130_s26 + $0x38] sm:$0xff]  }
 0xde6   : > { %4057 = vmatprep.subr.bf16.mxu0 %v4954_v21 }
 0xe52   : > { %v1884_v0 = vpop.f32.mrf.mxu1 }
 0xe53   : > { %v1885_v20 = vadd.f32 %v5484_v15, %v1884_v0 }
 0xe54   : > { %v4035_v22 = vpop.f32.mrf.mxu1 }
 0xe55   : > { %v1891_v23 = vadd.f32 %v1885_v20, %v1803_v16 }
 0xe56   : > { %v1887_v24 = vpop.f32.mrf.mxu1 }
 0xe57   : > { %v1888_v33 = vadd.f32 %v5484_v15, %v1887_v24  ;;  %1893 = vadd.xlane.f32.xlu0 %v1891_v23 }
 0xe58   : > { %v4036_v34 = vpop.f32.mrf.mxu1 }
 0xe59   : > { %v1892_v11 = vadd.f32 %v1888_v33, %v1804_v18 }
 0xe5b   : > { %1895 = vadd.xlane.f32.xlu1 %v1892_v11 }
 0xe72   : > { %v5632_v16 = vpop.f32.mrf.mxu1 }
 0xe74   : > { %v4055_v18 = vpop.f32.mrf.mxu1 }
 0xe75   : > { %v5652_v18 = vld [vmem:[%s6130_s26 + $0x30] sm:$0xff]  }
 0xe76   : > { %v2208_v59 = vpop.f32.mrf.mxu1 }
 0xe77   : > { %v5659_v59 = vld [vmem:[%s6130_s26 + $0x28] sm:$0xff]  }
 0xe78   : > { %v4056_v28 = vpop.f32.mrf.mxu1 }
 0xe79   : > { %v5666_v28 = vld [vmem:[%s6130_s26 + $0x20] sm:$0xff]  }
 0xee0   : > { %v1894_v62 = vpop.xlane.xlu0 %1893 }
 0xee1   : > { %v1897_v63 = vmul.f32 0.0078125, %v1894_v62 }
 0xee3   : > { %v1899_v19 = vsub.f32 %v1891_v23, %v1897_v63 }
 0xee4   : > { %v1896_v25 = vpop.xlane.xlu1 %1895 }
 0xee5   : > { %v1898_v12 = vmul.f32 0.0078125, %v1896_v25  ;;  %v1901_v26 = vmul.f32 %v1899_v19, %v1899_v19 }
 0xee7   : > { %v1900_v53 = vsub.f32 %v1892_v11, %v1898_v12  ;;  %1903 = vadd.xlane.f32.xlu0 %v1901_v26 }
 0xee9   : > { %v1902_v42 = vmul.f32 %v1900_v53, %v1900_v53 }
 0xeeb   : > { %1905 = vadd.xlane.f32.xlu1 %v1902_v42 }
 0xf70   : > { %v1904_v29 = vpop.xlane.xlu0 %1903 }
 0xf71   : > { %v1907_v40 = vmul.f32 0.0078125, %v1904_v29  ;;  %v5673_v29 = vld [vmem:[%s6130_s26 + $0x18] sm:$0xff]  }
 0xf73   : > { %v1909_v41 = vadd.f32 1e-05, %v1907_v40  ;;  %v5680_v40 = vld [vmem:[%s6130_s26 + $0x10] sm:$0xff]  }
 0xf74   : > { %v1906_v52 = vpop.xlane.xlu1 %1905 }
 0xf75   : > { %4633 = vrsqrt.f32 %v1909_v41  ;;  %v1908_v56 = vmul.f32 0.0078125, %v1906_v52  ;;  %v2211_v41 = vsub.f32 %v5609_v35, %v5632_v16 }
 0xf77   : > { %v1910_v6 = vadd.f32 1e-05, %v1908_v56  ;;  %v2212_v52 = vpack.c.bf16 %v2211_v41, %v2211_v41 }
 0xf79   : > { %4635 = vrsqrt.f32 %v1910_v6 }
 0xf82   : > { %v4634_v51 = vpop.eup %4633 }
 0xf83   : > { %v1913_v7 = vmul.f32 %v4634_v51, %v1899_v19 }
 0xf85   : > { %v1915_v9 = vmul.f32 %v5495_v55, %v1913_v7 }
 0xf86   : > { %v4636_v0 = vpop.eup %4635 }
 0xf87   : > { %v1914_v20 = vmul.f32 %v4636_v0, %v1900_v53  ;;  %v1917_v23 = vadd.f32 %v5501_v58, %v1915_v9 }
 0xf89   : > { %v1916_v22 = vmul.f32 %v5495_v55, %v1914_v20  ;;  %v1919_v33 = vadd.f32 %v1917_v23, %v5508_v43 }
 0xf8b   : > { %v1918_v24 = vadd.f32 %v5501_v58, %v1916_v22 }
 0xf8d   : > { %v1920_v34 = vadd.f32 %v1918_v24, %v5510_v44 }
 0xf8f   : > { %v1921_v11 = vadd.f32 %v1920_v34, %v1919_v33 }
 0xf91   : > { %v1922_v36 = vrot.slane %v1921_v11, 4 }
 0xf93   : > { %v1923_v62 = vadd.f32 %v1922_v36, %v1921_v11 }
 0xf95   : > { %v1924_v63 = vrot.slane %v1923_v62, 2 }
 0xf97   : > { %v1925_v25 = vadd.f32 %v1924_v63, %v1923_v62 }
 0xf99   : > { %v1926_v19 = vrot.slane %v1925_v25, 1 }
 0xf9b   : > { %v1927_v12 = vadd.f32 %v1926_v19, %v1925_v25 }
 0xf9d   : > { %v1928_v26 = vmul.f32 0.0625, %v1927_v12 }
 0xf9f   : > { %v1929_v42 = vsub.f32 %v1919_v33, %v1928_v26  ;;  %v1930_v53 = vsub.f32 %v1920_v34, %v1928_v26  ;;  %v5728_v26 = vld [vmem:[#allocation9 + $0x38] sm:$0xff]  }
 0xfa1   : > { %v1931_v27 = vmul.f32 %v1929_v42, %v1929_v42  ;;  %v1932_v8 = vmul.f32 %v1930_v53, %v1930_v53 }
 0xfa3   : > { %v1933_v13 = vadd.f32 %v1932_v8, %v1931_v27  ;;  %v5740_v27 = vld [vmem:[#allocation9 + $0x20] sm:$0xff]   ;;  %v5744_v8 = vld [vmem:[#allocation9 + $0x18] sm:$0xff]  }
 0xfa5   : > { %v1934_v45 = vrot.slane %v1933_v13, 4 }
 0xfa7   : > { %v1935_v46 = vadd.f32 %v1934_v45, %v1933_v13  ;;  %v5747_v13 = vld [vmem:[#allocation9 + $0x10] sm:$0xff]   ;;  %v5751_v45 = vld [vmem:[#allocation9 + $0x8] sm:$0xff]  }
 0xfa9   : > { %v1936_v14 = vrot.slane %v1935_v46, 2 }
 0xfab   : > { %v1937_v30 = vadd.f32 %v1936_v14, %v1935_v46  ;;  %v5755_v46 = vld [vmem:[#allocation9] sm:$0xff]  }
 0xfad   : > { %v1938_v43 = vrot.slane %v1937_v30, 1 }
 0xfaf   : > { %v1939_v31 = vadd.f32 %v1938_v43, %v1937_v30 }
 0xfb1   : > { %v1940_v44 = vmul.f32 0.0625, %v1939_v31 }
 0xfb3   : > { %v1941_v32 = vadd.f32 1e-05, %v1940_v44 }
 0xfb5   : > { %4637 = vrsqrt.f32 %v1941_v32 }
 0xfc2   : > { %v4638_v37 = vpop.eup %4637 }
 0xfc3   : > { %v1943_v38 = vmul.f32 %v4638_v37, %v1929_v42  ;;  %v1944_v10 = vmul.f32 %v4638_v37, %v1930_v53  ;;  %v5732_v42 = vld [vmem:[#allocation9 + $0x30] sm:$0xff]   ;;  %v5736_v53 = vld [vmem:[#allocation9 + $0x28] sm:$0xff]  }
 0xfc5   : > { %v1945_v17 = vmax.f32 %v1943_v38, 0.0  ;;  %v1946_v39 = vmax.f32 %v1944_v10, 0.0 }
 0xfc7   : > { %v1963_v57 = vpack.c.bf16 %v1946_v39, %v1945_v17 }
 0xfc9   : > { %2077 = vmatmul.mubr.bf16.vlgmr.msra.gmra.mxu0 %v1963_v57 }
 0xfca   : > { %4058 = vmatpush3.bf16.msra.mxu0 %v5643_v54  ;;  %4073 = vmatprep.mubr.msk.bf16.mxu0 %vm4955_vm0, %v4954_v21 }
 0xfcb   : > { %4059 = vmatprep.subr.bf16.mxu0 %v4954_v21 }
 0xfce   : > { %4060 = vmatpush3.bf16.msra.mxu0 %v5652_v18 }
 0xfcf   : > { %4061 = vmatprep.subr.bf16.mxu0 %v4954_v21 }
 0xfd2   : > { %4062 = vmatpush3.bf16.msra.mxu0 %v5659_v59 }
 0xfd3   : > { %4063 = vmatprep.subr.bf16.mxu0 %v4954_v21 }
 0xfd6   : > { %4064 = vmatpush3.bf16.msra.mxu0 %v5666_v28 }
 0xfd7   : > { %4065 = vmatprep.subr.bf16.mxu0 %v4954_v21 }
 0xfda   : > { %4066 = vmatpush3.bf16.msra.mxu0 %v5673_v29 }
 0xfdb   : > { %4067 = vmatprep.subr.bf16.mxu0 %v4954_v21 }
 0xfde   : > { %4068 = vmatpush3.bf16.msra.mxu0 %v5680_v40 }
 0xfdf   : > { %4069 = vmatprep.subr.bf16.mxu0 %v4954_v21 }
 0xfe2   : > { %4070 = vmatpush3.bf16.msra.mxu0 %v5350_v60 }
 0xfe3   : > { %4071 = vmatprep.subr.bf16.mxu0 %v4954_v21 }
 0xfe6   : > { %4072 = vmatpush3.bf16.msra.mxu0 %v5357_v61 }
 0xfe7   : > { %4097 = vmatprep.subr.bf16.mxu0 %v4954_v21 }
 0xfe9   : > { %4074 = vmatmul.mubr.bf16.vlgmr.msra.gmra.mxu0 %v2212_v52 }
 0xfea   : > { %4098 = vmatpush3.bf16.msra.mxu0 %v5397_v47  ;;  %4113 = vmatprep.mubr.msk.bf16.mxu0 %vm4955_vm0, %v4954_v21 }
 0xfeb   : > { %4099 = vmatprep.subr.bf16.mxu0 %v4954_v21 }
 0xfee   : > { %4100 = vmatpush3.bf16.msra.mxu0 %v5400_v48 }
 0xfef   : > { %4101 = vmatprep.subr.bf16.mxu0 %v4954_v21 }
 0xff2   : > { %4102 = vmatpush3.bf16.msra.mxu0 %v5404_v49 }
 0xff3   : > { %4103 = vmatprep.subr.bf16.mxu0 %v4954_v21 }
 0xff6   : > { %4104 = vmatpush3.bf16.msra.mxu0 %v5408_v50 }
 0xff7   : > { %4105 = vmatprep.subr.bf16.mxu0 %v4954_v21 }
 0xffa   : > { %4106 = vmatpush3.bf16.msra.mxu0 %v5412_v1 }
 0xffb   : > { %4107 = vmatprep.subr.bf16.mxu0 %v4954_v21 }
 0xffe   : > { %4108 = vmatpush3.bf16.msra.mxu0 %v5444_v2 }
 0xfff   : > { %4109 = vmatprep.subr.bf16.mxu0 %v4954_v21 }
0x1002   : > { %4110 = vmatpush3.bf16.msra.mxu0 %v5448_v3 }
0x1003   : > { %4111 = vmatprep.subr.bf16.mxu0 %v4954_v21 }
0x1006   : > { %4112 = vmatpush3.bf16.msra.mxu0 %v5452_v4 }
0x1007   : > { %4143 = vmatprep.subr.bf16.mxu0 %v4954_v21 }
0x1089   : > { %v5708_v60 = vpop.f32.mrf.mxu0 }
0x108a   : > { %v2087_v36 = vmul.f32 %v5708_v60, %v5708_v60 }
0x108b   : > { %v2080_v61 = vpop.f32.mrf.mxu0 }
0x108d   : > { %v5710_v47 = vpop.f32.mrf.mxu0 }
0x108f   : > { %v2084_v48 = vpop.f32.mrf.mxu0 }
0x1090   : > { %v5712_v49 = vpack.c.bf16 %v2084_v48, %v2080_v61 }
0x10a9   : > { %v2247_v50 = vpop.f32.mrf.mxu0 }
0x10aa   : > { %v2253_v1 = vmax.f32 %v2247_v50, 0.0 }
0x10ab   : > { %v4075_v2 = vpop.f32.mrf.mxu0 }
0x10ac   : > { %v2254_v16 = vpack.c.bf16 %v2253_v1, %v2253_v1 }
0x10ad   : > { %v2250_v56 = vpop.f32.mrf.mxu0 }
0x10ae   : > { %4094 = vmatmul.mubr.bf16.vlgmr.msra.gmra.mxu1 %v2254_v16 }
0x10af   : > { %v4076_v3 = vpop.f32.mrf.mxu0  ;;  %4133 = vmatprep.mubr.msk.bf16.mxu1 %vm4955_vm0, %v4954_v21  ;;  %4118 = vmatpush3.bf16.msra.mxu1 %v5728_v26 }
0x10b0   : > { %4119 = vmatprep.subr.bf16.mxu1 %v4954_v21 }
0x10b3   : > { %4120 = vmatpush3.bf16.msra.mxu1 %v5732_v42 }
0x10b4   : > { %4121 = vmatprep.subr.bf16.mxu1 %v4954_v21 }
0x10b7   : > { %4122 = vmatpush3.bf16.msra.mxu1 %v5736_v53 }
0x10b8   : > { %4123 = vmatprep.subr.bf16.mxu1 %v4954_v21 }
0x10bb   : > { %4124 = vmatpush3.bf16.msra.mxu1 %v5740_v27 }
0x10bc   : > { %4125 = vmatprep.subr.bf16.mxu1 %v4954_v21 }
0x10bf   : > { %4126 = vmatpush3.bf16.msra.mxu1 %v5744_v8 }
0x10c0   : > { %4127 = vmatprep.subr.bf16.mxu1 %v4954_v21 }
0x10c3   : > { %4128 = vmatpush3.bf16.msra.mxu1 %v5747_v13 }
0x10c4   : > { %4129 = vmatprep.subr.bf16.mxu1 %v4954_v21 }
0x10c7   : > { %4130 = vmatpush3.bf16.msra.mxu1 %v5751_v45 }
0x10c8   : > { %4131 = vmatprep.subr.bf16.mxu1 %v4954_v21 }
0x10cb   : > { %4132 = vmatpush3.bf16.msra.mxu1 %v5755_v46 }
0x10cc   : > { %4137 = vmatprep.subr.bf16.mxu1 %v4954_v21 }
0x116e   : > { %v2289_v4 = vpop.f32.mrf.mxu1 }
0x116f   : > { %v2290_v6 = vadd.f32 %v5459_v5, %v2289_v4 }
0x1170   : > { %v4095_v51 = vpop.f32.mrf.mxu1 }
0x1171   : > { %v2295_v7 = vmax.f32 %v2290_v6, 0.0 }
0x1172   : > { %v2292_v9 = vpop.f32.mrf.mxu1 }
0x1173   : > { %v2296_v0 = vpack.c.bf16 %v2295_v7, %v2295_v7 }
0x1174   : > { %v4096_v20 = vpop.f32.mrf.mxu1 }
0x1175   : > { %4114 = vmatmul.mubr.bf16.vlgmr.msra.gmra.mxu0 %v2296_v0 }
0x1176   : > { %4144 = vmatpush3.bf16.msra.mxu0 %v5712_v49  ;;  %4145 = vmatprep.mubr.msk.bf16.mxu0 %vm4955_vm0, %v4954_v21 }
0x1177   : > { %4149 = vmatprep.subr.bf16.mxu0 %v4954_v21 }
0x1235   : > { %v2331_v22 = vpop.f32.mrf.mxu0 }
0x1236   : > { %v2332_v23 = vadd.f32 %v5484_v15, %v2331_v22  ;;  %v2088_v15 = vmul.f32 %v5710_v47, %v5710_v47 }
0x1237   : > { %v4115_v24 = vpop.f32.mrf.mxu0 }
0x1238   : > { %v2337_v33 = vadd.f32 %v2332_v23, %v2253_v1 }
0x1239   : > { %v2334_v5 = vpop.f32.mrf.mxu0 }
0x123a   : > { %v2339_v34 = vsel %vm2338_vm2, %v2337_v33, 0.0 }
0x123b   : > { %2340 = vadd.xlane.f32.xlu0 %v2339_v34  ;;  %v4116_v11 = vpop.f32.mrf.mxu0 }
0x123f   : > { %2089 = vadd.xlane.f32.xlu0 %v2087_v36 }
0x12c4   : > { %v2341_v62 = vpop.xlane.xlu0 %2340 }
0x12c5   : > { %v2342_v63 = vmul.f32 0.0078125, %v2341_v62 }
0x12c7   : > { %v2343_v25 = vsub.f32 %v2337_v33, %v2342_v63 }
0x12c8   : > { %v2090_v44 = vpop.xlane.xlu0 %2089 }
0x12c9   : > { %v2344_v19 = vmul.f32 %v2343_v25, %v2343_v25  ;;  %v2093_v37 = vmax.f32 %v2090_v44, 1e-24  ;;  %v5805_v44 = vld [vmem:[#allocation10 + $0x8] sm:$0xff]  }
0x12cb   : > { %v2345_v12 = vsel %vm2338_vm2, %v2344_v19, 0.0  ;;  %v5779_v19 = vld [vmem:[#allocation10 + $0x38] sm:$0xff]  }
0x12cc   : > { %2346 = vadd.xlane.f32.xlu1 %v2345_v12 }
0x12d0   : > { %2091 = vadd.xlane.f32.xlu1 %v2088_v15  ;;  %v5783_v15 = vld [vmem:[#allocation10 + $0x30] sm:$0xff]  }
0x1355   : > { %v2347_v14 = vpop.xlane.xlu1 %2346 }
0x1356   : > { %v2348_v30 = vmul.f32 0.0078125, %v2347_v14  ;;  %v5789_v14 = vld [vmem:[#allocation10 + $0x28] sm:$0xff]  }
0x1358   : > { %v2349_v43 = vadd.f32 1e-05, %v2348_v30  ;;  %v5793_v30 = vld [vmem:[#allocation10 + $0x20] sm:$0xff]  }
0x1359   : > { %v2092_v31 = vpop.xlane.xlu1 %2091 }
0x135a   : > { %4639 = vrsqrt.f32 %v2349_v43  ;;  %v2094_v32 = vmax.f32 %v2092_v31, 1e-24  ;;  %v5797_v43 = vld [vmem:[#allocation10 + $0x18] sm:$0xff]   ;;  %v5801_v31 = vld [vmem:[#allocation10 + $0x10] sm:$0xff]  }
0x135c   : > { %4641 = vrsqrt.f32 %v2094_v32  ;;  %v5810_v32 = vld [vmem:[#allocation10] sm:$0xff]  }
0x135d   : > { %4643 = vrsqrt.f32 %v2093_v37  ;;  %v5814_v37 = vld [vmem:[#allocation12 + $0x38] sm:$0xff]  }
0x1367   : > { %v4640_v38 = vpop.eup %4639 }
0x1368   : > { %v2351_v10 = vmul.f32 %v4640_v38, %v2343_v25  ;;  %v5817_v38 = vld [vmem:[#allocation12 + $0x30] sm:$0xff]  }
0x1369   : > { %v4642_v41 = vpop.eup %4641 }
0x136a   : > { %v2352_v17 = vmul.f32 %v5495_v55, %v2351_v10  ;;  %v4644_v61 = vpop.eup %4643  ;;  %v2098_v50 = vmul.f32 %v4642_v41, %v5710_v47  ;;  %v5821_v10 = vld [vmem:[#allocation12 + $0x28] sm:$0xff]  }
0x136b   : > { %v2097_v2 = vmul.f32 %v4644_v61, %v5708_v60  ;;  %v5837_v41 = vld [vmem:[#allocation12 + $0x8] sm:$0xff]  }
0x136c   : > { %v2353_v39 = vadd.f32 %v5501_v58, %v2352_v17  ;;  %v5825_v17 = vld [vmem:[#allocation12 + $0x20] sm:$0xff]  }
0x136d   : > { %v5769_v56 = vpack.c.bf16 %v2098_v50, %v2097_v2 }
0x136e   : > { %v2354_v57 = vadd.f32 %v2353_v39, %v5609_v35  ;;  %v5829_v39 = vld [vmem:[#allocation12 + $0x18] sm:$0xff]  }
0x1370   : > { %v2355_v52 = vsub.f32 %v2354_v57, %v2354_v57  ;;  %v5833_v57 = vld [vmem:[#allocation12 + $0x10] sm:$0xff]  }
0x1372   : > { %v2356_v48 = vmul.f32 316.22778, %v2355_v52 }
0x1374   : > { %v5764_v1 = vmax.f32 %v2356_v48, 0.0 }
0x1376   : > { %v2358_v16 = vpack.c.bf16 %v5764_v1, %v5764_v1 }
0x1378   : > { %4134 = vmatmul.mubr.bf16.vlgmr.msra.gmra.mxu1 %v2358_v16 }
0x1379   : > { %4138 = vmatpush3.bf16.xpose.msra.mxu1 %v5769_v56  ;;  %4139 = vmatprep.mubr.msk.bf16.mxu1 %vm4955_vm0, %v4954_v21 }
0x137a   : > { %4169 = vmatprep.subr.bf16.mxu1 %v4954_v21 }
0x1438   : > { %v2441_v55 = vpop.f32.mrf.mxu1 }
0x1439   : > { %v2447_v58 = vmul.f32 %v2441_v55, %v2441_v55 }
0x143a   : > { %v4135_v35 = vpop.f32.mrf.mxu1 }
0x143b   : > { %v2448_v47 = vsel %vm2338_vm2, %v2447_v58, 0.0  ;;  %v5849_v58 = vld [vmem:[#allocation13 + $0x38] sm:$0xff]   ;;  %v5852_v35 = vld [vmem:[#allocation13 + $0x30] sm:$0xff]  }
0x143c   : > { %2449 = vadd.xlane.f32.xlu0 %v2448_v47  ;;  %v2444_v60 = vpop.f32.mrf.mxu1  ;;  %v5856_v47 = vld [vmem:[#allocation13 + $0x28] sm:$0xff]  }
0x143d   : > { %v5860_v60 = vld [vmem:[#allocation13 + $0x20] sm:$0xff]  }
0x143e   : > { %v4136_v3 = vpop.f32.mrf.mxu1 }
0x143f   : > { %v5864_v3 = vld [vmem:[#allocation13 + $0x18] sm:$0xff]  }
0x14c5   : > { %v2450_v4 = vpop.xlane.xlu0 %2449 }
0x14c6   : > { %v2451_v6 = vmax.f32 %v2450_v4, 1e-24  ;;  %v5868_v4 = vld [vmem:[#allocation13 + $0x10] sm:$0xff]  }
0x14c8   : > { %4645 = vrsqrt.f32 %v2451_v6 }
0x14d5   : > { %v4646_v51 = vpop.eup %4645 }
0x14d6   : > { %v2453_v7 = vmul.f32 %v4646_v51, %v2441_v55  ;;  %v5845_v55 = vld [vmem:[#allocation12] sm:$0xff]  }
0x14d8   : > { %v2454_v9 = vpack.c.bf16 %v2453_v7, %v2453_v7 }
0x14da   : > { %4140 = vmatmul.mubr.bf16.vlgmr.msra.gmra.mxu1 %v2454_v9 }
0x14db   : > { %4185 = vmatprep.mubr.msk.bf16.mxu1 %vm4955_vm0, %v4954_v21  ;;  %4170 = vmatpush3.bf16.msra.mxu1 %v5814_v37 }
0x14dc   : > { %4171 = vmatprep.subr.bf16.mxu1 %v4954_v21 }
0x14df   : > { %4172 = vmatpush3.bf16.msra.mxu1 %v5817_v38 }
0x14e0   : > { %4173 = vmatprep.subr.bf16.mxu1 %v4954_v21 }
0x14e3   : > { %4174 = vmatpush3.bf16.msra.mxu1 %v5821_v10 }
0x14e4   : > { %4175 = vmatprep.subr.bf16.mxu1 %v4954_v21 }
0x14e7   : > { %4176 = vmatpush3.bf16.msra.mxu1 %v5825_v17 }
0x14e8   : > { %4177 = vmatprep.subr.bf16.mxu1 %v4954_v21 }
0x14eb   : > { %4178 = vmatpush3.bf16.msra.mxu1 %v5829_v39 }
0x14ec   : > { %4179 = vmatprep.subr.bf16.mxu1 %v4954_v21 }
0x14ef   : > { %4180 = vmatpush3.bf16.msra.mxu1 %v5833_v57 }
0x14f0   : > { %4181 = vmatprep.subr.bf16.mxu1 %v4954_v21 }
0x14f3   : > { %4182 = vmatpush3.bf16.msra.mxu1 %v5837_v41 }
0x14f4   : > { %4183 = vmatprep.subr.bf16.mxu1 %v4954_v21 }
0x14f7   : > { %4184 = vmatpush3.bf16.msra.mxu1 %v5845_v55 }
0x14f8   : > { %4209 = vmatprep.subr.bf16.mxu1 %v4954_v21 }
0x159a   : > { %v2489_v0 = vpop.f32.mrf.mxu1 }
0x159b   : > { %v2495_v20 = vmul.f32 1.442695, %v2489_v0 }
0x159c   : > { %v4141_v22 = vpop.f32.mrf.mxu1 }
0x159d   : > { %4647 = vpow2.f32 %v2495_v20  ;;  %v4673_v22 = vld [vmem:[#allocation2 + $0xb0] ss:$12 sps:$4 sm:$0xff]  }
0x159e   : > { %v2492_v23 = vpop.f32.mrf.mxu1 }
0x159f   : > { %v4674_v23 = vld [vmem:[#allocation2 + $0x98] ss:$12 sps:$4 sm:$0xff]  }
0x15a0   : > { %v4142_v24 = vpop.f32.mrf.mxu1 }
0x15a1   : > { %v4675_v24 = vld [vmem:[#allocation2 + $0x80] ss:$12 sps:$4 sm:$0xff]  }
0x15aa   : > { %v4648_v33 = vpop.eup %4647 }
0x15ab   : > { %v2498_v5 = vsel %vm2497_vm3, %v4648_v33, 0.0 }
0x15ac   : > { %2499 = vadd.xlane.f32.xlu1 %v2498_v5  ;;  %v4677_v5 = vld [vmem:[#allocation2 + $0x50] ss:$12 sps:$4 sm:$0xff]  }
0x1635   : > { %v2500_v34 = vpop.xlane.xlu1 %2499 }
0x1636   : > { %4649 = vrcp.f32 %v2500_v34  ;;  %v4678_v34 = vld [vmem:[#allocation2 + $0x38] ss:$12 sps:$4 sm:$0xff]  }
0x1643   : > { %v4650_v11 = vpop.eup %4649 }
0x1644   : > { %v2502_v36 = vmul.f32 %v4650_v11, %v4648_v33  ;;  %v4676_v33 = vld [vmem:[#allocation2 + $0x68] ss:$12 sps:$4 sm:$0xff]   ;;  %v4679_v11 = vld [vmem:[#allocation2 + $0x20] ss:$12 sps:$4 sm:$0xff]  }
0x1646   : > { %v2503_v62 = vadd.f32 1e-09, %v2502_v36 }
0x1648   : > { %4651 = vrcp.f32 %v2503_v62  ;;  %v5887_v62 = vld [vmem:[#allocation13 + $0x8] sm:$0xff]  }
0x1655   : > { %v4652_v63 = vpop.eup %4651 }
0x1656   : > { %v2505_v25 = vmul.f32 %v4652_v63, %v2502_v36  ;;  %v4680_v36 = vld [vmem:[#allocation2 + $0x8] ss:$12 sps:$4 sm:$0xff]   ;;  %v5891_v63 = vld [vmem:[#allocation13] sm:$0xff]  }
0x1658   : > { %v2506_v12 = vpack.c.bf16 %v2505_v25, %v2505_v25  ;;  %v5898_v25 = vld [vmem:[%s6100_s14] ss:$0 sm:$0xff] }
0x165a   : > { %4146 = vmatmul.mubr.msk.bf16.vlgmr.msra.gmra.mxu0 %vm1106_vm1, %v2506_v12 }
0x165b   : > { %4150 = vmatpush3.bf16.msra.mxu0 %v5779_v19  ;;  %4165 = vmatprep.mubr.msk.bf16.mxu0 %vm4955_vm0, %v4954_v21 }
0x165c   : > { %4151 = vmatprep.subr.bf16.mxu0 %v4954_v21 }
0x165f   : > { %4152 = vmatpush3.bf16.msra.mxu0 %v5783_v15 }
0x1660   : > { %4153 = vmatprep.subr.bf16.mxu0 %v4954_v21 }
0x1663   : > { %4154 = vmatpush3.bf16.msra.mxu0 %v5789_v14 }
0x1664   : > { %4155 = vmatprep.subr.bf16.mxu0 %v4954_v21 }
0x1667   : > { %4156 = vmatpush3.bf16.msra.mxu0 %v5793_v30 }
0x1668   : > { %4157 = vmatprep.subr.bf16.mxu0 %v4954_v21 }
0x166b   : > { %4158 = vmatpush3.bf16.msra.mxu0 %v5797_v43 }
0x166c   : > { %4159 = vmatprep.subr.bf16.mxu0 %v4954_v21 }
0x166f   : > { %4160 = vmatpush3.bf16.msra.mxu0 %v5801_v31 }
0x1670   : > { %4161 = vmatprep.subr.bf16.mxu0 %v4954_v21 }
0x1673   : > { %4162 = vmatpush3.bf16.msra.mxu0 %v5805_v44 }
0x1674   : > { %4163 = vmatprep.subr.bf16.mxu0 %v4954_v21 }
0x1677   : > { %4164 = vmatpush3.bf16.msra.mxu0 %v5810_v32 }
0x1678   : > { %4189 = vmatprep.subr.bf16.mxu0 %v4954_v21 }
0x171a   : > { %v2544_v52 = vpop.f32.mrf.mxu0 }
0x171b   : > { %v2550_v61 = vsub.f32 %v5764_v1, %v2544_v52 }
0x171c   : > { %v4147_v48 = vpop.f32.mrf.mxu0 }
0x171d   : > { %v2551_v50 = vpack.c.bf16 %v2550_v61, %v2550_v61 }
0x171e   : > { %v2547_v2 = vpop.f32.mrf.mxu0 }
0x171f   : > { %4166 = vmatmul.mubr.bf16.vlgmr.msra.gmra.mxu0 %v2551_v50 }
0x1720   : > { %v4148_v16 = vpop.f32.mrf.mxu0  ;;  %4205 = vmatprep.mubr.msk.bf16.mxu0 %vm4955_vm0, %v4954_v21  ;;  %4190 = vmatpush3.bf16.msra.mxu0 %v5849_v58 }
0x1721   : > { %4191 = vmatprep.subr.bf16.mxu0 %v4954_v21 }
0x1724   : > { %4192 = vmatpush3.bf16.msra.mxu0 %v5852_v35 }
0x1725   : > { %4193 = vmatprep.subr.bf16.mxu0 %v4954_v21 }
0x1728   : > { %4194 = vmatpush3.bf16.msra.mxu0 %v5856_v47 }
0x1729   : > { %4195 = vmatprep.subr.bf16.mxu0 %v4954_v21 }
0x172c   : > { %4196 = vmatpush3.bf16.msra.mxu0 %v5860_v60 }
0x172d   : > { %4197 = vmatprep.subr.bf16.mxu0 %v4954_v21 }
0x1730   : > { %4198 = vmatpush3.bf16.msra.mxu0 %v5864_v3 }
0x1731   : > { %4199 = vmatprep.subr.bf16.mxu0 %v4954_v21 }
0x1734   : > { %4200 = vmatpush3.bf16.msra.mxu0 %v5868_v4 }
0x1735   : > { %4201 = vmatprep.subr.bf16.mxu0 %v4954_v21 }
0x1738   : > { %4202 = vmatpush3.bf16.msra.mxu0 %v5887_v62 }
0x1739   : > { %4203 = vmatprep.subr.bf16.mxu0 %v4954_v21 }
0x173c   : > { %4204 = vmatpush3.bf16.msra.mxu0 %v5891_v63 }
0x173d   : > { %4229 = vmatprep.subr.bf16.mxu0 %v4954_v21 }
0x17df   : > { %v2634_v6 = vpop.f32.mrf.mxu0 }
0x17e0   : > { %v5873_v51 = vmax.f32 %v2634_v6, 0.0 }
0x17e1   : > { %v4167_v7 = vpop.f32.mrf.mxu0 }
0x17e2   : > { %v2641_v9 = vpack.c.bf16 %v5873_v51, %v5873_v51 }
0x17e3   : > { %v2637_v0 = vpop.f32.mrf.mxu0 }
0x17e4   : > { %4186 = vmatmul.mubr.bf16.vlgmr.msra.gmra.mxu1 %v2641_v9 }
0x17e5   : > { %v4168_v20 = vpop.f32.mrf.mxu0  ;;  %4210 = vmatpush3.bf16.msra.mxu1 %v4673_v22  ;;  %4225 = vmatprep.mubr.msk.bf16.mxu1 %vm4955_vm0, %v4954_v21 }
0x17e6   : > { %4211 = vmatprep.subr.bf16.mxu1 %v4954_v21 }
0x17e9   : > { %4212 = vmatpush3.bf16.msra.mxu1 %v4674_v23 }
0x17ea   : > { %4213 = vmatprep.subr.bf16.mxu1 %v4954_v21 }
0x17ed   : > { %4214 = vmatpush3.bf16.msra.mxu1 %v4675_v24 }
0x17ee   : > { %4215 = vmatprep.subr.bf16.mxu1 %v4954_v21 }
0x17f1   : > { %4216 = vmatpush3.bf16.msra.mxu1 %v4676_v33 }
0x17f2   : > { %4217 = vmatprep.subr.bf16.mxu1 %v4954_v21 }
0x17f5   : > { %4218 = vmatpush3.bf16.msra.mxu1 %v4677_v5 }
0x17f6   : > { %4219 = vmatprep.subr.bf16.mxu1 %v4954_v21 }
0x17f9   : > { %4220 = vmatpush3.bf16.msra.mxu1 %v4678_v34 }
0x17fa   : > { %4221 = vmatprep.subr.bf16.mxu1 %v4954_v21 }
0x17fd   : > { %4222 = vmatpush3.bf16.msra.mxu1 %v4679_v11 }
0x17fe   : > { %4223 = vmatprep.subr.bf16.mxu1 %v4954_v21 }
0x1801   : > { %4224 = vmatpush3.bf16.msra.mxu1 %v4680_v36 }
0x1802   : > { %4249 = vmatprep.subr.bf16.mxu1 %v4954_v21 }
0x18a4   : > { %v2730_v12 = vpop.f32.mrf.mxu1 }
0x18a5   : > { %v2731_v52 = vadd.f32 %v5898_v25, %v2730_v12 }
0x18a6   : > { %v4187_v61 = vpop.f32.mrf.mxu1 }
0x18a7   : > { %v2736_v48 = vmax.f32 %v2731_v52, 0.0  ;;  %v5940_v52 = vld [vmem:[%s6104_s18] ss:$0 sm:$0xff] }
0x18a8   : > { %v2733_v50 = vpop.f32.mrf.mxu1 }
0x18a9   : > { %v2737_v2 = vpack.c.bf16 %v2736_v48, %v2736_v48 }
0x18aa   : > { %v4188_v16 = vpop.f32.mrf.mxu1 }
0x18ab   : > { %4206 = vmatmul.mubr.bf16.vlgmr.msra.gmra.mxu0 %v2737_v2 }
0x18ac   : > { %4230 = vmatpush3.bf16.msra.mxu0 %v5643_v54  ;;  %4245 = vmatprep.mubr.msk.bf16.mxu0 %vm4955_vm0, %v4954_v21  ;;  %v4681_v54 = vld [vmem:[%s6130_s26 + $0x8] sm:$0xff]  }
0x18ad   : > { %4231 = vmatprep.subr.bf16.mxu0 %v4954_v21 }
0x18b0   : > { %4232 = vmatpush3.bf16.msra.mxu0 %v5652_v18  ;;  %v4682_v18 = vld [vmem:[%s6130_s26] sm:$0xff]  }
0x18b1   : > { %4233 = vmatprep.subr.bf16.mxu0 %v4954_v21 }
0x18b4   : > { %4234 = vmatpush3.bf16.msra.mxu0 %v5659_v59  ;;  %v5926_v59 = vld [vmem:[%s6102_s16] ss:$0 sm:$0xff] }
0x18b5   : > { %4235 = vmatprep.subr.bf16.mxu0 %v4954_v21 }
0x18b8   : > { %4236 = vmatpush3.bf16.msra.mxu0 %v5666_v28 }
0x18b9   : > { %4237 = vmatprep.subr.bf16.mxu0 %v4954_v21 }
0x18bc   : > { %4238 = vmatpush3.bf16.msra.mxu0 %v5673_v29 }
0x18bd   : > { %4239 = vmatprep.subr.bf16.mxu0 %v4954_v21 }
0x18c0   : > { %4240 = vmatpush3.bf16.msra.mxu0 %v5680_v40 }
0x18c1   : > { %4241 = vmatprep.subr.bf16.mxu0 %v4954_v21 }
0x18c4   : > { %4242 = vmatpush3.bf16.msra.mxu0 %v4681_v54 }
0x18c5   : > { %4243 = vmatprep.subr.bf16.mxu0 %v4954_v21 }
0x18c8   : > { %4244 = vmatpush3.bf16.msra.mxu0 %v4682_v18 }
0x18c9   : > { %4269 = vmatprep.subr.bf16.mxu0 %v4954_v21 }
0x196b   : > { %v2826_v28 = vpop.f32.mrf.mxu0 }
0x196c   : > { %v2827_v29 = vadd.f32 %v5926_v59, %v2826_v28  ;;  %v4683_v28 = vld [vmem:[#allocation4 + $0x38] sm:$0xff]  }
0x196d   : > { %v4207_v40 = vpop.f32.mrf.mxu0 }
0x196e   : > { %v2832_v6 = vadd.f32 %v2827_v29, %v5873_v51  ;;  %v5935_v51 = vld [vmem:[%s6103_s17] ss:$0 sm:$0xff]  ;;  %v4684_v29 = vld [vmem:[#allocation4 + $0x30] sm:$0xff]  }
0x196f   : > { %v2829_v7 = vpop.f32.mrf.mxu0  ;;  %v4686_v40 = vld [vmem:[#allocation4 + $0x20] sm:$0xff]  }
0x1970   : > { %v2833_v9 = vsel %vm2338_vm2, %v2832_v6, 0.0  ;;  %v4688_v7 = vld [vmem:[#allocation4 + $0x10] sm:$0xff]  }
0x1971   : > { %2834 = vadd.xlane.f32.xlu0 %v2833_v9  ;;  %v4208_v0 = vpop.f32.mrf.mxu0  ;;  %v4689_v9 = vld [vmem:[#allocation4 + $0x8] sm:$0xff]  }
0x1972   : > { %v4690_v0 = vld [vmem:[#allocation4] sm:$0xff]  }
0x19fa   : > { %v2835_v20 = vpop.xlane.xlu0 %2834 }
0x19fb   : > { %v2836_v22 = vmul.f32 0.0078125, %v2835_v20 }
0x19fd   : > { %v2837_v23 = vsub.f32 %v2832_v6, %v2836_v22  ;;  %v4687_v6 = vld [vmem:[#allocation4 + $0x18] sm:$0xff]  }
0x19ff   : > { %v2838_v24 = vmul.f32 %v2837_v23, %v2837_v23 }
0x1a01   : > { %v2839_v33 = vsel %vm2338_vm2, %v2838_v24, 0.0 }
0x1a02   : > { %2840 = vadd.xlane.f32.xlu1 %v2839_v33 }
0x1a8b   : > { %v2841_v5 = vpop.xlane.xlu1 %2840 }
0x1a8c   : > { %v2842_v34 = vmul.f32 0.0078125, %v2841_v5 }
0x1a8e   : > { %v2843_v11 = vadd.f32 1e-05, %v2842_v34  ;;  %v4691_v34 = vld [vmem:[#allocation6 + $0x38] sm:$0xff]  }
0x1a90   : > { %4653 = vrsqrt.f32 %v2843_v11  ;;  %v4692_v11 = vld [vmem:[#allocation6 + $0x30] sm:$0xff]  }
0x1a9d   : > { %v4654_v36 = vpop.eup %4653 }
0x1a9e   : > { %v2845_v12 = vmul.f32 %v4654_v36, %v2837_v23  ;;  %v4693_v36 = vld [vmem:[#allocation6 + $0x28] sm:$0xff]  }
0x1aa0   : > { %v2852_v61 = vmul.f32 %v5935_v51, %v2845_v12  ;;  %v4694_v12 = vld [vmem:[#allocation6 + $0x20] sm:$0xff]  }
0x1aa2   : > { %v2859_v48 = vadd.f32 %v5940_v52, %v2852_v61  ;;  %v4695_v61 = vld [vmem:[#allocation6 + $0x18] sm:$0xff]  }
0x1aa4   : > { %v2860_v50 = vadd.f32 %v2859_v48, %v5764_v1  ;;  %v4685_v1 = vld [vmem:[#allocation4 + $0x28] sm:$0xff]   ;;  %v4696_v48 = vld [vmem:[#allocation6 + $0x10] sm:$0xff]  }
0x1aa6   : > { %v2861_v2 = vsub.f32 %v2860_v50, %v2860_v50  ;;  %v4697_v50 = vld [vmem:[#allocation6 + $0x8] sm:$0xff]  }
0x1aa8   : > { %v2862_v16 = vmul.f32 316.22778, %v2861_v2  ;;  %v4698_v2 = vld [vmem:[#allocation6] sm:$0xff]  }
0x1aaa   : > { %v5945_v54 = vmax.f32 %v2862_v16, 0.0 }
0x1aac   : > { %v2864_v18 = vpack.c.bf16 %v5945_v54, %v5945_v54 }
0x1aae   : > { %4226 = vmatmul.mubr.bf16.vlgmr.msra.gmra.mxu1 %v2864_v18 }
0x1aaf   : > { %4250 = vmatpush3.bf16.msra.mxu1 %v4683_v28  ;;  %4265 = vmatprep.mubr.msk.bf16.mxu1 %vm4955_vm0, %v4954_v21 }
0x1ab0   : > { %4251 = vmatprep.subr.bf16.mxu1 %v4954_v21 }
0x1ab3   : > { %4252 = vmatpush3.bf16.msra.mxu1 %v4684_v29 }
0x1ab4   : > { %4253 = vmatprep.subr.bf16.mxu1 %v4954_v21 }
0x1ab7   : > { %4254 = vmatpush3.bf16.msra.mxu1 %v4685_v1 }
0x1ab8   : > { %4255 = vmatprep.subr.bf16.mxu1 %v4954_v21 }
0x1abb   : > { %4256 = vmatpush3.bf16.msra.mxu1 %v4686_v40 }
0x1abc   : > { %4257 = vmatprep.subr.bf16.mxu1 %v4954_v21 }
0x1abf   : > { %4258 = vmatpush3.bf16.msra.mxu1 %v4687_v6 }
0x1ac0   : > { %4259 = vmatprep.subr.bf16.mxu1 %v4954_v21 }
0x1ac3   : > { %4260 = vmatpush3.bf16.msra.mxu1 %v4688_v7 }
0x1ac4   : > { %4261 = vmatprep.subr.bf16.mxu1 %v4954_v21 }
0x1ac7   : > { %4262 = vmatpush3.bf16.msra.mxu1 %v4689_v9 }
0x1ac8   : > { %4263 = vmatprep.subr.bf16.mxu1 %v4954_v21 }
0x1acb   : > { %4264 = vmatpush3.bf16.msra.mxu1 %v4690_v0 }
0x1acc   : > { %4289 = vmatprep.subr.bf16.mxu1 %v4954_v21 }
0x1b6e   : > { %v2899_v20 = vpop.f32.mrf.mxu1 }
0x1b6f   : > { %v2905_v22 = vsub.f32 %v5945_v54, %v2899_v20 }
0x1b70   : > { %v4227_v23 = vpop.f32.mrf.mxu1 }
0x1b71   : > { %v2906_v24 = vpack.c.bf16 %v2905_v22, %v2905_v22 }
0x1b72   : > { %v2902_v33 = vpop.f32.mrf.mxu1 }
0x1b73   : > { %4246 = vmatmul.mubr.bf16.vlgmr.msra.gmra.mxu0 %v2906_v24 }
0x1b74   : > { %v4228_v5 = vpop.f32.mrf.mxu1  ;;  %4270 = vmatpush3.bf16.msra.mxu0 %v4691_v34  ;;  %4285 = vmatprep.mubr.msk.bf16.mxu0 %vm4955_vm0, %v4954_v21 }
0x1b75   : > { %4271 = vmatprep.subr.bf16.mxu0 %v4954_v21 }
0x1b78   : > { %4272 = vmatpush3.bf16.msra.mxu0 %v4692_v11 }
0x1b79   : > { %4273 = vmatprep.subr.bf16.mxu0 %v4954_v21 }
0x1b7c   : > { %4274 = vmatpush3.bf16.msra.mxu0 %v4693_v36 }
0x1b7d   : > { %4275 = vmatprep.subr.bf16.mxu0 %v4954_v21 }
0x1b80   : > { %4276 = vmatpush3.bf16.msra.mxu0 %v4694_v12 }
0x1b81   : > { %4277 = vmatprep.subr.bf16.mxu0 %v4954_v21 }
0x1b84   : > { %4278 = vmatpush3.bf16.msra.mxu0 %v4695_v61 }
0x1b85   : > { %4279 = vmatprep.subr.bf16.mxu0 %v4954_v21 }
0x1b88   : > { %4280 = vmatpush3.bf16.msra.mxu0 %v4696_v48 }
0x1b89   : > { %4281 = vmatprep.subr.bf16.mxu0 %v4954_v21 }
0x1b8c   : > { %4282 = vmatpush3.bf16.msra.mxu0 %v4697_v50 }
0x1b8d   : > { %4283 = vmatprep.subr.bf16.mxu0 %v4954_v21 }
0x1b90   : > { %4284 = vmatpush3.bf16.msra.mxu0 %v4698_v2  ;;  %v4701_v2 = vld [vmem:[%s6094_s8] ss:$0 sm:$0xff] }
0x1b91   : > { %4309 = vmatprep.subr.bf16.mxu0 %v4954_v21 }
0x1c33   : > { %v2941_v16 = vpop.f32.mrf.mxu0 }
0x1c34   : > { %v2947_v18 = vmax.f32 %v2941_v16, 0.0 }
0x1c35   : > { %v4247_v28 = vpop.f32.mrf.mxu0 }
0x1c36   : > { %v2948_v29 = vpack.c.bf16 %v2947_v18, %v2947_v18 }
0x1c37   : > { %v2944_v1 = vpop.f32.mrf.mxu0 }
0x1c38   : > { %4266 = vmatmul.mubr.bf16.vlgmr.msra.gmra.mxu1 %v2948_v29 }
0x1c39   : > { %v4248_v40 = vpop.f32.mrf.mxu0  ;;  %4290 = vmatpush3.bf16.msra.mxu1 %v5728_v26  ;;  %4305 = vmatprep.mubr.msk.bf16.mxu1 %vm4955_vm0, %v4954_v21 }
0x1c3a   : > { %4291 = vmatprep.subr.bf16.mxu1 %v4954_v21 }
0x1c3d   : > { %4292 = vmatpush3.bf16.msra.mxu1 %v5732_v42  ;;  %v4699_v42 = vld [vmem:[%s6091_s5] ss:$0 sm:$0xff] }
0x1c3e   : > { %4293 = vmatprep.subr.bf16.mxu1 %v4954_v21 }
0x1c41   : > { %4294 = vmatpush3.bf16.msra.mxu1 %v5736_v53 }
0x1c42   : > { %4295 = vmatprep.subr.bf16.mxu1 %v4954_v21 }
0x1c45   : > { %4296 = vmatpush3.bf16.msra.mxu1 %v5740_v27 }
0x1c46   : > { %4297 = vmatprep.subr.bf16.mxu1 %v4954_v21 }
0x1c49   : > { %4298 = vmatpush3.bf16.msra.mxu1 %v5744_v8 }
0x1c4a   : > { %4299 = vmatprep.subr.bf16.mxu1 %v4954_v21 }
0x1c4d   : > { %4300 = vmatpush3.bf16.msra.mxu1 %v5747_v13 }
0x1c4e   : > { %4301 = vmatprep.subr.bf16.mxu1 %v4954_v21 }
0x1c51   : > { %4302 = vmatpush3.bf16.msra.mxu1 %v5751_v45 }
0x1c52   : > { %4303 = vmatprep.subr.bf16.mxu1 %v4954_v21 }
0x1c55   : > { %4304 = vmatpush3.bf16.msra.mxu1 %v5755_v46  ;;  %v4700_v46 = vld [vmem:[%s6093_s7] ss:$0 sm:$0xff] }
0x1c56   : > { %4315 = vmatprep.subr.bf16.mxu1 %v4954_v21 }
0x1cf8   : > { %v2983_v26 = vpop.f32.mrf.mxu1 }
0x1cf9   : > { %v2984_v53 = vadd.f32 %v4699_v42, %v2983_v26 }
0x1cfa   : > { %v4267_v27 = vpop.f32.mrf.mxu1 }
0x1cfb   : > { %v2989_v8 = vmax.f32 %v2984_v53, 0.0 }
0x1cfc   : > { %v2986_v6 = vpop.f32.mrf.mxu1 }
0x1cfd   : > { %v2990_v13 = vpack.c.bf16 %v2989_v8, %v2989_v8 }
0x1cfe   : > { %v4268_v7 = vpop.f32.mrf.mxu1 }
0x1cff   : > { %4286 = vmatmul.mubr.bf16.vlgmr.msra.gmra.mxu0 %v2990_v13 }
0x1d00   : > { %4310 = vmatpush3.bf16.xpose.msra.mxu0 %v5769_v56  ;;  %4311 = vmatprep.mubr.msk.bf16.mxu0 %vm4955_vm0, %v4954_v21 }
0x1d01   : > { %4321 = vmatprep.subr.bf16.mxu0 %v4954_v21 }
0x1dbf   : > { %v3025_v45 = vpop.f32.mrf.mxu0 }
0x1dc0   : > { %v3026_v9 = vadd.f32 %v4700_v46, %v3025_v45 }
0x1dc1   : > { %v4287_v0 = vpop.f32.mrf.mxu0 }
0x1dc2   : > { %v3031_v20 = vadd.f32 %v3026_v9, %v2947_v18  ;;  %v4702_v18 = vld [vmem:[%s6095_s9] ss:$0 sm:$0xff] }
0x1dc3   : > { %v3028_v22 = vpop.f32.mrf.mxu0 }
0x1dc4   : > { %v3032_v23 = vsel %vm2338_vm2, %v3031_v20, 0.0 }
0x1dc5   : > { %3033 = vadd.xlane.f32.xlu0 %v3032_v23  ;;  %v4288_v24 = vpop.f32.mrf.mxu0 }
0x1e4e   : > { %v3034_v33 = vpop.xlane.xlu0 %3033 }
0x1e4f   : > { %v3035_v56 = vmul.f32 0.0078125, %v3034_v33 }
0x1e51   : > { %v3036_v5 = vsub.f32 %v3031_v20, %v3035_v56 }
0x1e53   : > { %v3037_v34 = vmul.f32 %v3036_v5, %v3036_v5 }
0x1e55   : > { %v3038_v11 = vsel %vm2338_vm2, %v3037_v34, 0.0 }
0x1e56   : > { %3039 = vadd.xlane.f32.xlu1 %v3038_v11 }
0x1edf   : > { %v3040_v36 = vpop.xlane.xlu1 %3039 }
0x1ee0   : > { %v3041_v12 = vmul.f32 0.0078125, %v3040_v36 }
0x1ee2   : > { %v3042_v61 = vadd.f32 1e-05, %v3041_v12 }
0x1ee4   : > { %4655 = vrsqrt.f32 %v3042_v61 }
0x1ef1   : > { %v4656_v48 = vpop.eup %4655 }
0x1ef2   : > { %v3044_v50 = vmul.f32 %v4656_v48, %v3036_v5 }
0x1ef4   : > { %v3045_v16 = vmul.f32 %v4701_v2, %v3044_v50 }
0x1ef6   : > { %v3046_v28 = vadd.f32 %v4702_v18, %v3045_v16 }
0x1ef8   : > { %v3047_v29 = vadd.f32 %v3046_v28, %v5945_v54 }
0x1efa   : > { %v3048_v1 = vsub.f32 %v3047_v29, %v3047_v29 }
0x1efc   : > { %v3049_v40 = vmul.f32 316.22778, %v3048_v1 }
0x1efe   : > { %v6007_v26 = vmax.f32 %v3049_v40, 0.0 }
0x1f00   : > { %v3051_v42 = vpack.c.bf16 %v6007_v26, %v6007_v26 }
0x1f02   : > { %4306 = vmatmul.mubr.bf16.vlgmr.msra.gmra.mxu1 %v3051_v42 }
0x1f03   : > { %4316 = vmatpush3.bf16.msra.mxu1 %v5712_v49  ;;  %4317 = vmatprep.mubr.msk.bf16.mxu1 %vm4955_vm0, %v4954_v21 }
0x1f04   : > { %4341 = vmatprep.subr.bf16.mxu1 %v4954_v21 }
0x1fc2   : > { %v3086_v53 = vpop.f32.mrf.mxu1 }
0x1fc3   : > { %v3092_v27 = vmul.f32 %v3086_v53, %v3086_v53 }
0x1fc4   : > { %v4307_v8 = vpop.f32.mrf.mxu1 }
0x1fc5   : > { %v3093_v54 = vsel %vm2338_vm2, %v3092_v27, 0.0 }
0x1fc6   : > { %3094 = vadd.xlane.f32.xlu0 %v3093_v54  ;;  %v3089_v6 = vpop.f32.mrf.mxu1 }
0x1fc8   : > { %v4308_v13 = vpop.f32.mrf.mxu1 }
0x204f   : > { %v3095_v7 = vpop.xlane.xlu0 %3094 }
0x2050   : > { %v3096_v45 = vmax.f32 %v3095_v7, 1e-24 }
0x2052   : > { %4657 = vrsqrt.f32 %v3096_v45 }
0x205f   : > { %v4658_v46 = vpop.eup %4657 }
0x2060   : > { %v3098_v9 = vmul.f32 %v4658_v46, %v3086_v53 }
0x2062   : > { %v3099_v0 = vpack.c.bf16 %v3098_v9, %v3098_v9 }
0x2064   : > { %4312 = vmatmul.mubr.bf16.vlgmr.msra.gmra.mxu0 %v3099_v0 }
0x2065   : > { %4322 = vmatpush3.bf16.msra.mxu0 %v5779_v19  ;;  %4337 = vmatprep.mubr.msk.bf16.mxu0 %vm4955_vm0, %v4954_v21 }
0x2066   : > { %4323 = vmatprep.subr.bf16.mxu0 %v4954_v21 }
0x2069   : > { %4324 = vmatpush3.bf16.msra.mxu0 %v5783_v15 }
0x206a   : > { %4325 = vmatprep.subr.bf16.mxu0 %v4954_v21 }
0x206d   : > { %4326 = vmatpush3.bf16.msra.mxu0 %v5789_v14 }
0x206e   : > { %4327 = vmatprep.subr.bf16.mxu0 %v4954_v21 }
0x2071   : > { %4328 = vmatpush3.bf16.msra.mxu0 %v5793_v30 }
0x2072   : > { %4329 = vmatprep.subr.bf16.mxu0 %v4954_v21 }
0x2075   : > { %4330 = vmatpush3.bf16.msra.mxu0 %v5797_v43 }
0x2076   : > { %4331 = vmatprep.subr.bf16.mxu0 %v4954_v21 }
0x2079   : > { %4332 = vmatpush3.bf16.msra.mxu0 %v5801_v31 }
0x207a   : > { %4333 = vmatprep.subr.bf16.mxu0 %v4954_v21 }
0x207d   : > { %4334 = vmatpush3.bf16.msra.mxu0 %v5805_v44 }
0x207e   : > { %4335 = vmatprep.subr.bf16.mxu0 %v4954_v21 }
0x2081   : > { %4336 = vmatpush3.bf16.msra.mxu0 %v5810_v32 }
0x2082   : > { %4361 = vmatprep.subr.bf16.mxu0 %v4954_v21 }
0x2124   : > { %v3134_v49 = vpop.f32.mrf.mxu0 }
0x2125   : > { %v3140_v19 = vmul.f32 1.442695, %v3134_v49 }
0x2126   : > { %v4313_v15 = vpop.f32.mrf.mxu0 }
0x2127   : > { %4659 = vpow2.f32 %v3140_v19 }
0x2128   : > { %v3137_v14 = vpop.f32.mrf.mxu0 }
0x212a   : > { %v4314_v30 = vpop.f32.mrf.mxu0 }
0x2134   : > { %v4660_v43 = vpop.eup %4659 }
0x2135   : > { %v3142_v20 = vsel %vm2497_vm3, %v4660_v43, 0.0 }
0x2136   : > { %3143 = vadd.xlane.f32.xlu1 %v3142_v20 }
0x21bf   : > { %v3144_v31 = vpop.xlane.xlu1 %3143 }
0x21c0   : > { %4661 = vrcp.f32 %v3144_v31 }
0x21cd   : > { %v4662_v22 = vpop.eup %4661 }
0x21ce   : > { %v3146_v44 = vmul.f32 %v4662_v22, %v4660_v43 }
0x21d0   : > { %v3147_v23 = vadd.f32 1e-09, %v3146_v44 }
0x21d2   : > { %4663 = vrcp.f32 %v3147_v23 }
0x21df   : > { %v4664_v24 = vpop.eup %4663 }
0x21e0   : > { %v3149_v32 = vmul.f32 %v4664_v24, %v3146_v44 }
0x21e2   : > { %v3150_v33 = vpack.c.bf16 %v3149_v32, %v3149_v32 }
0x21e4   : > { %4318 = vmatmul.mubr.msk.bf16.vlgmr.msra.gmra.mxu1 %vm1106_vm1, %v3150_v33 }
0x21e5   : > { %4342 = vmatpush3.bf16.msra.mxu1 %v5814_v37  ;;  %4357 = vmatprep.mubr.msk.bf16.mxu1 %vm4955_vm0, %v4954_v21 }
0x21e6   : > { %4343 = vmatprep.subr.bf16.mxu1 %v4954_v21 }
0x21e9   : > { %4344 = vmatpush3.bf16.msra.mxu1 %v5817_v38 }
0x21ea   : > { %4345 = vmatprep.subr.bf16.mxu1 %v4954_v21 }
0x21ed   : > { %4346 = vmatpush3.bf16.msra.mxu1 %v5821_v10 }
0x21ee   : > { %4347 = vmatprep.subr.bf16.mxu1 %v4954_v21 }
0x21f1   : > { %4348 = vmatpush3.bf16.msra.mxu1 %v5825_v17 }
0x21f2   : > { %4349 = vmatprep.subr.bf16.mxu1 %v4954_v21 }
0x21f5   : > { %4350 = vmatpush3.bf16.msra.mxu1 %v5829_v39 }
0x21f6   : > { %4351 = vmatprep.subr.bf16.mxu1 %v4954_v21 }
0x21f9   : > { %4352 = vmatpush3.bf16.msra.mxu1 %v5833_v57 }
0x21fa   : > { %4353 = vmatprep.subr.bf16.mxu1 %v4954_v21 }
0x21fd   : > { %4354 = vmatpush3.bf16.msra.mxu1 %v5837_v41 }
0x21fe   : > { %4355 = vmatprep.subr.bf16.mxu1 %v4954_v21 }
0x2201   : > { %4356 = vmatpush3.bf16.msra.mxu1 %v5845_v55 }
0x22a4   : > { %v3188_v37 = vpop.f32.mrf.mxu1 }
0x22a5   : > { %v3194_v38 = vsub.f32 %v6007_v26, %v3188_v37 }
0x22a6   : > { %v4319_v10 = vpop.f32.mrf.mxu1 }
0x22a7   : > { %v3195_v17 = vpack.c.bf16 %v3194_v38, %v3194_v38 }
0x22a8   : > { %v3191_v56 = vpop.f32.mrf.mxu1 }
0x22a9   : > { %4338 = vmatmul.mubr.bf16.vlgmr.msra.gmra.mxu0 %v3195_v17 }
0x22aa   : > { %v4320_v39 = vpop.f32.mrf.mxu1  ;;  %4362 = vmatpush3.bf16.msra.mxu0 %v5849_v58  ;;  %4377 = vmatprep.mubr.msk.bf16.mxu0 %vm4955_vm0, %v4954_v21 }
0x22ab   : > { %4363 = vmatprep.subr.bf16.mxu0 %v4954_v21 }
0x22ae   : > { %4364 = vmatpush3.bf16.msra.mxu0 %v5852_v35 }
0x22af   : > { %4365 = vmatprep.subr.bf16.mxu0 %v4954_v21 }
0x22b2   : > { %4366 = vmatpush3.bf16.msra.mxu0 %v5856_v47 }
0x22b3   : > { %4367 = vmatprep.subr.bf16.mxu0 %v4954_v21 }
0x22b6   : > { %4368 = vmatpush3.bf16.msra.mxu0 %v5860_v60 }
0x22b7   : > { %4369 = vmatprep.subr.bf16.mxu0 %v4954_v21 }
0x22ba   : > { %4370 = vmatpush3.bf16.msra.mxu0 %v5864_v3 }
0x22bb   : > { %4371 = vmatprep.subr.bf16.mxu0 %v4954_v21 }
0x22be   : > { %4372 = vmatpush3.bf16.msra.mxu0 %v5868_v4 }
0x22bf   : > { %4373 = vmatprep.subr.bf16.mxu0 %v4954_v21 }
0x22c2   : > { %4374 = vmatpush3.bf16.msra.mxu0 %v5887_v62 }
0x22c3   : > { %4375 = vmatprep.subr.bf16.mxu0 %v4954_v21 }
0x22c6   : > { %4376 = vmatpush3.bf16.msra.mxu0 %v5891_v63 }
0x2369   : > { %v3230_v57 = vpop.f32.mrf.mxu0 }
0x236a   : > { %v3236_v41 = vmax.f32 %v3230_v57, 0.0 }
0x236b   : > { %v4339_v55 = vpop.f32.mrf.mxu0 }
0x236c   : > { %v3237_v58 = vpack.c.bf16 %v3236_v41, %v3236_v41 }
0x236d   : > { %v3233_v35 = vpop.f32.mrf.mxu0 }
0x236e   : > { %4358 = vmatmul.mubr.bf16.vlgmr.msra.gmra.mxu1 %v3237_v58 }
0x236f   : > { %v4340_v47 = vpop.f32.mrf.mxu0 }
0x242e   : > { %v3272_v60 = vpop.f32.mrf.mxu1 }
0x242f   : > { %v3273_v3 = vadd.f32 %v5898_v25, %v3272_v60 }
0x2430   : > { %v4359_v5 = vpop.f32.mrf.mxu1 }
0x2431   : > { %v3278_v4 = vmax.f32 %v3273_v3, 0.0 }
0x2432   : > { %v3275_v34 = vpop.f32.mrf.mxu1 }
0x2433   : > { %v3279_v11 = vpack.c.bf16 %v3278_v4, %v3278_v4 }
0x2434   : > { %v4360_v36 = vpop.f32.mrf.mxu1 }
0x2435   : > { %4378 = vmatmul.mubr.bf16.vlgmr.msra.gmra.mxu0 %v3279_v11 }
0x24f5   : > { %v3314_v62 = vpop.f32.mrf.mxu0 }
0x24f6   : > { %v3315_v21 = vadd.f32 %v5926_v59, %v3314_v62 }
0x24f7   : > { %v4379_v63 = vpop.f32.mrf.mxu0 }
0x24f8   : > { %v3320_v12 = vadd.f32 %v3315_v21, %v3236_v41 }
0x24f9   : > { %v3317_v61 = vpop.f32.mrf.mxu0 }
0x24fa   : > { %v3321_v48 = vsel %vm2338_vm2, %v3320_v12, 0.0 }
0x24fb   : > { %3322 = vadd.xlane.f32.xlu0 %v3321_v48  ;;  %v4380_v50 = vpop.f32.mrf.mxu0 }
0x2584   : > { %v3323_v2 = vpop.xlane.xlu0 %3322 }
0x2585   : > { %v3324_v16 = vmul.f32 0.0078125, %v3323_v2 }
0x2587   : > { %v3325_v25 = vsub.f32 %v3320_v12, %v3324_v16 }
0x2589   : > { %v3326_v18 = vmul.f32 %v3325_v25, %v3325_v25 }
0x258b   : > { %v3327_v28 = vsel %vm2338_vm2, %v3326_v18, 0.0 }
0x258c   : > { %3328 = vadd.xlane.f32.xlu1 %v3327_v28 }
0x2615   : > { %v3329_v29 = vpop.xlane.xlu1 %3328 }
0x2616   : > { %v3330_v1 = vmul.f32 0.0078125, %v3329_v29 }
0x2618   : > { %v3331_v40 = vadd.f32 1e-05, %v3330_v1 }
0x261a   : > { %4665 = vrsqrt.f32 %v3331_v40 }
0x2627   : > { %v4666_v59 = vpop.eup %4665 }
0x2628   : > { %v3333_v42 = vmul.f32 %v4666_v59, %v3325_v25 }
0x262a   : > { %v3334_v53 = vmul.f32 %v5935_v51, %v3333_v42 }
0x262c   : > { %v3335_v27 = vadd.f32 %v5940_v52, %v3334_v53 }
0x262e   : > { %v3336_v8 = vadd.f32 %v3335_v27, %v6007_v26 }
0x2630   : > { %v3337_v54 = vsub.f32 %v3336_v8, %v3336_v8 }
0x2632   : > { %v3338_v6 = vmul.f32 316.22778, %v3337_v54 }
0x2634   : > { %v3339_v13 = vmax.f32 %v3338_v6, 0.0 }
0x2636   : > { %3340 = vst [vmem:[%s734_s28] sm:$0x3] %v3339_v13 }
0x2637 PF: > { %s6132_s20 = sld [smem:[#allocation20_spill]] }
0x263d   : > { %s34_s0 = sadd.s32 1, %s6132_s20  }
0x263e   : > { %p31_p2 = scmp.ge.s32.totalorder %s34_s0, 4  }
0x2640   :  { %33 = sbr.rel (!%p31_p2) target bundleno = 13 (0xd), region = 162 }
0x2645   :  { %3360 = vsyncpa [#allocation3], 1 }
0x2646   :  { %3362 = vsyncpa [#allocation3 + $0x1], 1 }
0x2647   :  { %3363 = vsyncpa [#allocation5], 1 }
0x2648   :  { %3364 = vsyncpa [#allocation8], 1 }
0x2649   :  { %3365 = vsyncpa [#allocation11], 1 }
0x264a   :  { %3366 = vsyncpa [#allocation14], 1 }

</bundles_post_ra>
